<compile_context>
chip_gen: v7x
topology: tpu7x:2x2x1
jax: 0.10.0
libtpu: 0.0.40
codegen_flags: <defaults>
</compile_context>

<pallas_src>
import jax
import jax.numpy as jnp
from jax import lax
from jax.experimental import pallas as pl
from jax.experimental.pallas import tpu as pltpu

# ----------------------------- problem sizes -------------------------------
S = 8            # sequence length
B = 2            # batch size
D = 128          # "bert_dim" (stand-in BERT hidden size)
H = 128          # lstm hidden size (lstm_dim == -1 -> hidden_size = bert_dim)
C = 4            # len(punctuation_dict): O, COMMA, PERIOD, QUESTION
C_PAD = 128      # logits padded to a full lane tile (unmasked stores)
VOCAB = 64       # stand-in vocab size

BP = 8           # one packed sublane tile per (batch-tile, timestep)
B_TILE = BP // 2 # sequences per grid tile: fwd rows 0:4, bwd rows 4:8
R = S * BP       # packed time-major rows per grid tile


# ------------------------------ Pallas kernel -------------------------------
def _bilstm_mlp_kernel(x_ref,      # (R, 2D) bf16  packed [x_t | x_{S-1-t}] rows
                       wih_ref,    # (2D, 4H) bf16 [w_ih_f ; w_ih_b] stacked on K
                       b_ref,      # (BP, 4H) f32  rows 0:4 = b_f, rows 4:8 = b_b
                       whh_ref,    # (2H, 4H) bf16 [w_hh_f ; w_hh_b] stacked on K
                       w1_ref,     # (2H, H) bf16
                       b1_ref,     # (1, H) f32
                       w2_ref,     # (H, C_PAD) bf16
                       b2_ref,     # (1, C_PAD) f32
                       out_ref,    # (R, C_PAD) f32
                       gates_in,   # scratch (R, 4H) f32
                       hseq):      # scratch (R, 2H) f32  [fwd | bwd] per timestep
    half = R // 2

    # (1) Hoisted input projection for BOTH directions.  The packed input
    #     layout (fwd rows carry x_t on K columns 0:D, bwd rows carry x_{S-1-t}
    #     on K columns D:2D) means one bf16 K=2D matmul already yields the
    #     per-step packed gate tiles.  Split into two row halves inside a real
    #     loop so the f32 result never exceeds ~16 vregs of transient liveness.
    # TODO(synk): for production sequence lengths, also tile/shorten this
    # scratch (or store it bf16) to stay inside v7x's 64 MiB VMEM.
    @pl.loop(0, 2)
    def _proj(i):
        r0 = pl.multiple_of(i * half, half)
        gates_in[pl.ds(r0, half), :] = jnp.dot(
            x_ref[pl.ds(r0, half), :], wih_ref[...],
            preferred_element_type=jnp.float32)

    # rows 0:B_TILE are the forward direction, rows B_TILE:BP the backward one
    row = lax.broadcasted_iota(jnp.int32, (BP, H), 0)
    is_fwd = row < B_TILE                      # hoisted out of the loop

    h0 = jnp.zeros((BP, H), jnp.float32)
    c0 = jnp.zeros((BP, H), jnp.float32)

    # (2) Recurrence: fwd cell (t = k) and bwd cell (t = S-1-k) live in ONE
    #     packed (BP, .) tile, so gate transcendentals run once per step and
    #     the h @ W_hh update is a single K=256 bf16 matmul.
    def body(k, carry):
        h, c = carry                           # packed: rows 0:4 fwd, 4:8 bwd
        r_f = pl.multiple_of(k * BP, BP)
        r_b = pl.multiple_of((S - 1 - k) * BP, BP)

        # mask so fwd rows only hit w_hh_f (K block 0:H) and bwd rows only hit
        # w_hh_b (K block H:2H); bf16 operands, f32 accumulate.
        hm = jnp.concatenate(
            [jnp.where(is_fwd, h, 0.0), jnp.where(is_fwd, 0.0, h)],
            axis=1).astype(jnp.bfloat16)
        g = (gates_in[pl.ds(r_f, BP), :] + b_ref[...]
             + jnp.dot(hm, whh_ref[...], preferred_element_type=jnp.float32))

        # PyTorch LSTM gate order: i, f, g, o (all gate/cell math in f32)
        i_g = jax.nn.sigmoid(g[:, 0 * H:1 * H])
        f_g = jax.nn.sigmoid(g[:, 1 * H:2 * H])
        g_g = jnp.tanh(g[:, 2 * H:3 * H])
        o_g = jax.nn.sigmoid(g[:, 3 * H:4 * H])
        c = f_g * c + i_g * g_g
        h = o_g * jnp.tanh(c)

        # fwd half of the per-timestep features at t = k (rows 0:4 are real)
        hseq[pl.ds(r_f, BP), 0:H] = h
        # bwd half at its own timestep t = S-1-k; XLU sublane roll moves the
        # bwd rows (4:8) of the packed tile up to rows 0:4.
        hseq[pl.ds(r_b, BP), H:2 * H] = pltpu.roll(h, BP - B_TILE, 0)
        return (h, c)

    lax.fori_loop(0, S, body, (h0, c0), unroll=True)

    # (3) Fused MLP head (drop1/drop2 are identity at inference):
    #     Linear(2H->H) + ReLU, then Linear(H->C) on C_PAD = 128 lanes.
    y = jnp.maximum(
        jnp.dot(hseq[...].astype(jnp.bfloat16), w1_ref[...],
                preferred_element_type=jnp.float32) + b1_ref[...], 0.0)
    out_ref[...] = (
        jnp.dot(y.astype(jnp.bfloat16), w2_ref[...],
                preferred_element_type=jnp.float32) + b2_ref[...])


# ------------------------------ head wrapper --------------------------------
def bilstm_mlp_head(x_sbd, params):
    """x_sbd: (S, batch, D) time-major hidden states -> (S, batch, C) logits."""
    s, bsz, d = x_sbd.shape
    assert s == S and d == D
    nb = pl.cdiv(bsz, B_TILE)                  # grid tiles of up to 4 sequences
    bpad = nb * B_TILE
    x_pad = jnp.pad(x_sbd, ((0, 0), (0, bpad - bsz), (0, 0)))   # (S, bpad, D)

    # Packed input layout, per (tile, timestep) block of BP = 8 rows:
    #   rows 0:4 , cols 0:D   = x_t        (forward direction)
    #   rows 4:8 , cols D:2D  = x_{S-1-t}  (backward direction)
    x_f = x_pad.reshape(S, nb, B_TILE, D)
    x_b = x_pad[::-1].reshape(S, nb, B_TILE, D)
    blk = jnp.zeros((S, nb, BP, 2 * D), jnp.float32)
    blk = blk.at[:, :, 0:B_TILE, 0:D].set(x_f)
    blk = blk.at[:, :, B_TILE:2 * B_TILE, D:2 * D].set(x_b)
    x_packed = jnp.transpose(blk, (1, 0, 2, 3)).reshape(nb * R, 2 * D)
    x_packed = x_packed.astype(jnp.bfloat16)

    const = lambda shape: pl.BlockSpec(shape, lambda n: (0, 0))
    out_flat = pl.pallas_call(
        _bilstm_mlp_kernel,
        out_shape=jax.ShapeDtypeStruct((nb * R, C_PAD), jnp.float32),
        grid_spec=pltpu.PrefetchScalarGridSpec(
            num_scalar_prefetch=0,
            grid=(nb,),                                 # batch tiles (parallel)
            in_specs=[
                pl.BlockSpec((R, 2 * D), lambda n: (n, 0)),
                const((2 * D, 4 * H)),                  # wih (fetched once)
                const((BP, 4 * H)),                     # packed biases
                const((2 * H, 4 * H)),                  # whh (fetched once)
                const((2 * H, H)), const((1, H)),       # linear1
                const((H, C_PAD)), const((1, C_PAD)),   # linear2 (lane-padded)
            ],
            out_specs=pl.BlockSpec((R, C_PAD), lambda n: (n, 0)),
            scratch_shapes=[pltpu.VMEM((R, 4 * H), jnp.float32),   # gates
                            pltpu.VMEM((R, 2 * H), jnp.float32)]), # [fwd | bwd]
        compiler_params=pltpu.CompilerParams(
            dimension_semantics=("parallel",)),
    )(x_packed,
      params["wih_packed"], params["b_packed"], params["whh_packed"],
      params["w1"], params["b1"], params["w2p"], params["b2p"])

    out = out_flat.reshape(nb, S, BP, C_PAD)[:, :, 0:B_TILE, :C]  # (nb,S,4,C)
    out = jnp.transpose(out, (1, 0, 2, 3)).reshape(S, bpad, C)[:, :bsz, :]
    return out                                                     # (S, batch, C)


# ------------------------------ parameter init ------------------------------
def init_params(key):
    ks = jax.random.split(key, 13)
    scale = 0.1

    def rnd(k, shape):
        return scale * jax.random.normal(k, shape, dtype=jnp.float32)

    # nn.LSTM weights (PyTorch shapes), one set per direction; gate order i,f,g,o
    w_ih_f = rnd(ks[0], (4 * H, D)); w_hh_f = rnd(ks[1], (4 * H, H))
    b_ih_f = rnd(ks[2], (4 * H,));   b_hh_f = rnd(ks[3], (4 * H,))
    w_ih_b = rnd(ks[4], (4 * H, D)); w_hh_b = rnd(ks[5], (4 * H, H))
    b_ih_b = rnd(ks[6], (4 * H,));   b_hh_b = rnd(ks[7], (4 * H,))
    # nn.Linear(2H -> H), nn.Linear(H -> C)  (PyTorch weight shape: (out, in))
    w1 = rnd(ks[8], (H, 2 * H)); b1 = rnd(ks[9], (H,))
    w2 = rnd(ks[10], (C, H));    b2 = rnd(ks[11], (C,))
    emb = rnd(ks[12], (VOCAB, D))      # stand-in BERT token embedding table

    bf16 = jnp.bfloat16
    # Packed / transposed / lane-padded kernel layouts.  Matmul operands are
    # bf16; accumulation stays f32 (preferred_element_type) in the kernel.
    wih_packed = jnp.concatenate([w_ih_f.T, w_ih_b.T], axis=0).astype(bf16)  # (2D,4H)
    whh_packed = jnp.concatenate([w_hh_f.T, w_hh_b.T], axis=0).astype(bf16)  # (2H,4H)
    b_packed = jnp.zeros((BP, 4 * H), jnp.float32)                 # packed biases
    b_packed = b_packed.at[0:B_TILE, :].set((b_ih_f + b_hh_f)[None, :])
    b_packed = b_packed.at[B_TILE:2 * B_TILE, :].set((b_ih_b + b_hh_b)[None, :])
    w2p = jnp.zeros((H, C_PAD), jnp.float32).at[:, :C].set(w2.T)
    b2p = jnp.zeros((1, C_PAD), jnp.float32).at[0, :C].set(b2)

    return {
        "wih_packed": wih_packed, "whh_packed": whh_packed, "b_packed": b_packed,
        "w1": w1.T.astype(bf16), "b1": b1[None, :],
        "w2p": w2p.astype(bf16), "b2p": b2p,
        "bert_embedding": emb,
    }


# ------------------------------ full forward --------------------------------
def deep_punctuation_forward(params, x_ids, attn_masks):
    """x_ids: (B, S) int32 token ids, attn_masks: (B, S) -> logits (B, S, C)."""
    if x_ids.ndim == 1:                       # mirror the view(1, -1) branch
        x_ids = x_ids[None, :]
        attn_masks = attn_masks[None, :]
    # TODO(synk): the pretrained HuggingFace BERT encoder (bert_layer) has no
    # clean in-script Pallas equivalent; stand-in last_hidden_state is a
    # deterministic token-embedding + layernorm (attn_masks unused here).
    emb = params["bert_embedding"][x_ids]                        # (B, S, D)
    mu = emb.mean(axis=-1, keepdims=True)
    var = emb.var(axis=-1, keepdims=True)
    last_hidden = (emb - mu) / jnp.sqrt(var + 1e-12)

    x_sbd = jnp.transpose(last_hidden, (1, 0, 2))                # (S, B, D)
    out_sbc = bilstm_mlp_head(x_sbd, params)                     # (S, B, C)
    return jnp.transpose(out_sbc, (1, 0, 2))                     # (B, S, C)


# ---------------------------------- main -------------------------------------
if __name__ == "__main__":
    key = jax.random.PRNGKey(0)
    k_param, k_ids = jax.random.split(key)

    params = init_params(k_param)
    x_ids = jax.random.randint(k_ids, (B, S), 0, VOCAB, dtype=jnp.int32)
    attn_masks = jnp.ones((B, S), dtype=jnp.int32)

    logits = deep_punctuation_forward(params, x_ids, attn_masks)
    logits = jax.block_until_ready(logits)

    assert logits.shape == (B, S, C), logits.shape
    assert bool(jnp.all(jnp.isfinite(logits)))
    print("KERNEL_OK")
</pallas_src>

<mosaic_0001>
module attributes {stable_mosaic.version = 11 : i64} {
  func.func @_bilstm_mlp_kernel(%arg0: i32, %arg1: memref<64x256xbf16, #tpu.memory_space<vmem>>, %arg2: memref<256x512xbf16, #tpu.memory_space<vmem>>, %arg3: memref<8x512xf32, #tpu.memory_space<vmem>>, %arg4: memref<256x512xbf16, #tpu.memory_space<vmem>>, %arg5: memref<256x128xbf16, #tpu.memory_space<vmem>>, %arg6: memref<1x128xf32, #tpu.memory_space<vmem>>, %arg7: memref<128x128xbf16, #tpu.memory_space<vmem>>, %arg8: memref<1x128xf32, #tpu.memory_space<vmem>>, %arg9: memref<64x128xf32, #tpu.memory_space<vmem>>, %arg10: memref<64x512xf32, #tpu.memory_space<vmem>>, %arg11: memref<64x256xf32, #tpu.memory_space<vmem>>) attributes {dimension_semantics = [#tpu.dimension_semantics<parallel>], iteration_bounds = array<i64: 1>, scalar_prefetch = 0 : i64, scratch_operands = 2 : i64, tpu.core_type = #tpu.core_type<tc>, window_params = [{transform_indices = @transform_0, window_bounds = array<i64: 64, 256>}, {pipeline_mode = #tpu.pipeline_mode<synchronous>, transform_indices = @transform_1, window_bounds = array<i64: 256, 512>}, {pipeline_mode = #tpu.pipeline_mode<synchronous>, transform_indices = @transform_2, window_bounds = array<i64: 8, 512>}, {pipeline_mode = #tpu.pipeline_mode<synchronous>, transform_indices = @transform_3, window_bounds = array<i64: 256, 512>}, {pipeline_mode = #tpu.pipeline_mode<synchronous>, transform_indices = @transform_4, window_bounds = array<i64: 256, 128>}, {pipeline_mode = #tpu.pipeline_mode<synchronous>, transform_indices = @transform_5, window_bounds = array<i64: 1, 128>}, {pipeline_mode = #tpu.pipeline_mode<synchronous>, transform_indices = @transform_6, window_bounds = array<i64: 128, 128>}, {pipeline_mode = #tpu.pipeline_mode<synchronous>, transform_indices = @transform_7, window_bounds = array<i64: 1, 128>}, {transform_indices = @transform_8, window_bounds = array<i64: 64, 128>}]} {
    %c0_i32 = arith.constant 0 : i32
    %c2_i32 = arith.constant 2 : i32
    %0 = arith.addi %c0_i32, %c2_i32 : i32
    %c1_i32 = arith.constant 1 : i32
    scf.for %arg12 = %c0_i32 to %0 step %c1_i32  : i32 {
      %c1_i32_155 = arith.constant 1 : i32
      %406 = arith.muli %arg12, %c1_i32_155 : i32
      %c0_i32_156 = arith.constant 0 : i32
      %407 = arith.addi %c0_i32_156, %406 : i32
      %c32_i32 = arith.constant 32 : i32
      %408 = arith.muli %407, %c32_i32 : i32
      %409 = tpu.assume_multiple %408, 32 : i32
      %410 = arith.index_cast %409 : i32 to index
      %c0_157 = arith.constant 0 : index
      %411 = vector.load %arg1[%410, %c0_157] : memref<64x256xbf16, #tpu.memory_space<vmem>>, vector<32x256xbf16>
      %c0_158 = arith.constant 0 : index
      %c0_159 = arith.constant 0 : index
      %412 = vector.load %arg2[%c0_158, %c0_159] : memref<256x512xbf16, #tpu.memory_space<vmem>>, vector<256x512xbf16>
      %cst_160 = arith.constant dense<0.000000e+00> : vector<32x512xf32>
      %413 = tpu.matmul %411, %412, %cst_160 {dimension_numbers = #tpu.dot_dimension_numbers<[1], [0], [0], [1], [0, 0, 1, 1], [], []>} : vector<32x256xbf16>, vector<256x512xbf16>, vector<32x512xf32> -> vector<32x512xf32>
      %414 = arith.index_cast %409 : i32 to index
      %c0_161 = arith.constant 0 : index
      %415 = vector.load %arg10[%414, %c0_161] : memref<64x512xf32, #tpu.memory_space<vmem>>, vector<32x512xf32>
      tpu.vector_store %arg10[%414, %c0_161], %413 {strides = array<i32>} : memref<64x512xf32, #tpu.memory_space<vmem>>, vector<32x512xf32>,
    }
    %c2_i32_0 = arith.constant 2 : i32
    %1 = tpu.iota {dimensions = array<i32: 0>} : vector<8x128xi32>
    %c4_i32 = arith.constant 4 : i32
    %2 = vector.broadcast %c4_i32 : i32 to vector<8x128xi32>
    %3 = arith.cmpi slt, %1, %2 : vector<8x128xi32>
    %cst = arith.constant 0.000000e+00 : f32
    %4 = vector.broadcast %cst : f32 to vector<8x128xf32>
    %cst_1 = arith.constant 0.000000e+00 : f32
    %5 = vector.broadcast %cst_1 : f32 to vector<8x128xf32>
    %c0_i32_2 = arith.constant 0 : i32
    %c8_i32 = arith.constant 8 : i32
    %6 = arith.muli %c0_i32_2, %c8_i32 : i32
    %7 = tpu.assume_multiple %6, 8 : i32
    %c7_i32 = arith.constant 7 : i32
    %8 = arith.subi %c7_i32, %c0_i32_2 : i32
    %c8_i32_3 = arith.constant 8 : i32
    %9 = arith.muli %8, %c8_i32_3 : i32
    %10 = tpu.assume_multiple %9, 8 : i32
    %cst_4 = arith.constant 0.000000e+00 : f32
    %11 = vector.broadcast %cst_4 : f32 to vector<8x128xf32>
    %12 = arith.select %3, %4, %11 : vector<8x128xi1>, vector<8x128xf32>
    %cst_5 = arith.constant 0.000000e+00 : f32
    %13 = vector.broadcast %cst_5 : f32 to vector<8x128xf32>
    %14 = arith.select %3, %13, %4 : vector<8x128xi1>, vector<8x128xf32>
    %15 = tpu.concatenate %12, %14 in 1 : vector<8x128xf32>, vector<8x128xf32> -> vector<8x256xf32>
    %16 = arith.truncf %15 : vector<8x256xf32> to vector<8x256xbf16>
    %17 = arith.index_cast %7 : i32 to index
    %c0 = arith.constant 0 : index
    %18 = vector.load %arg10[%17, %c0] : memref<64x512xf32, #tpu.memory_space<vmem>>, vector<8x512xf32>
    %c0_6 = arith.constant 0 : index
    %c0_7 = arith.constant 0 : index
    %19 = vector.load %arg3[%c0_6, %c0_7] : memref<8x512xf32, #tpu.memory_space<vmem>>, vector<8x512xf32>
    %20 = arith.addf %18, %19 : vector<8x512xf32>
    %c0_8 = arith.constant 0 : index
    %c0_9 = arith.constant 0 : index
    %21 = vector.load %arg4[%c0_8, %c0_9] : memref<256x512xbf16, #tpu.memory_space<vmem>>, vector<256x512xbf16>
    %cst_10 = arith.constant dense<0.000000e+00> : vector<8x512xf32>
    %22 = tpu.matmul %16, %21, %cst_10 {dimension_numbers = #tpu.dot_dimension_numbers<[1], [0], [0], [1], [0, 0, 1, 1], [], []>} : vector<8x256xbf16>, vector<256x512xbf16>, vector<8x512xf32> -> vector<8x512xf32>
    %23 = arith.addf %20, %22 : vector<8x512xf32>
    %24 = vector.extract_strided_slice %23 {offsets = [0, 0], sizes = [8, 128], strides = [1, 1]} : vector<8x512xf32> to vector<8x128xf32>
    %25 = arith.negf %24 : vector<8x128xf32>
    %26 = math.exp %25 : vector<8x128xf32>
    %cst_11 = arith.constant 1.000000e+00 : f32
    %27 = vector.broadcast %cst_11 : f32 to vector<8x128xf32>
    %28 = arith.addf %27, %26 : vector<8x128xf32>
    %29 = arith.divf %27, %28 : vector<8x128xf32>
    %30 = vector.extract_strided_slice %23 {offsets = [0, 128], sizes = [8, 128], strides = [1, 1]} : vector<8x512xf32> to vector<8x128xf32>
    %31 = arith.negf %30 : vector<8x128xf32>
    %32 = math.exp %31 : vector<8x128xf32>
    %cst_12 = arith.constant 1.000000e+00 : f32
    %33 = vector.broadcast %cst_12 : f32 to vector<8x128xf32>
    %34 = arith.addf %33, %32 : vector<8x128xf32>
    %35 = arith.divf %33, %34 : vector<8x128xf32>
    %36 = vector.extract_strided_slice %23 {offsets = [0, 256], sizes = [8, 128], strides = [1, 1]} : vector<8x512xf32> to vector<8x128xf32>
    %37 = math.tanh %36 : vector<8x128xf32>
    %38 = vector.extract_strided_slice %23 {offsets = [0, 384], sizes = [8, 128], strides = [1, 1]} : vector<8x512xf32> to vector<8x128xf32>
    %39 = arith.negf %38 : vector<8x128xf32>
    %40 = math.exp %39 : vector<8x128xf32>
    %cst_13 = arith.constant 1.000000e+00 : f32
    %41 = vector.broadcast %cst_13 : f32 to vector<8x128xf32>
    %42 = arith.addf %41, %40 : vector<8x128xf32>
    %43 = arith.divf %41, %42 : vector<8x128xf32>
    %44 = arith.mulf %35, %5 : vector<8x128xf32>
    %45 = arith.mulf %29, %37 : vector<8x128xf32>
    %46 = arith.addf %44, %45 : vector<8x128xf32>
    %47 = math.tanh %46 : vector<8x128xf32>
    %48 = arith.mulf %43, %47 : vector<8x128xf32>
    %49 = arith.index_cast %7 : i32 to index
    %c0_14 = arith.constant 0 : index
    %50 = vector.load %arg11[%49, %c0_14] : memref<64x256xf32, #tpu.memory_space<vmem>>, vector<8x128xf32>
    tpu.vector_store %arg11[%49, %c0_14], %48 {strides = array<i32>} : memref<64x256xf32, #tpu.memory_space<vmem>>, vector<8x128xf32>,
    %c4_i32_15 = arith.constant 4 : i32
    %51 = tpu.dynamic_rotate %48 by %c4_i32_15 dim 0 : vector<8x128xf32>, i32 -> vector<8x128xf32>
    %52 = arith.index_cast %10 : i32 to index
    %c128 = arith.constant 128 : index
    %53 = vector.load %arg11[%52, %c128] : memref<64x256xf32, #tpu.memory_space<vmem>>, vector<8x128xf32>
    tpu.vector_store %arg11[%52, %c128], %51 {strides = array<i32>} : memref<64x256xf32, #tpu.memory_space<vmem>>, vector<8x128xf32>,
    %c1_i32_16 = arith.constant 1 : i32
    %c8_i32_17 = arith.constant 8 : i32
    %54 = arith.muli %c1_i32_16, %c8_i32_17 : i32
    %55 = tpu.assume_multiple %54, 8 : i32
    %c7_i32_18 = arith.constant 7 : i32
    %56 = arith.subi %c7_i32_18, %c1_i32_16 : i32
    %c8_i32_19 = arith.constant 8 : i32
    %57 = arith.muli %56, %c8_i32_19 : i32
    %58 = tpu.assume_multiple %57, 8 : i32
    %cst_20 = arith.constant 0.000000e+00 : f32
    %59 = vector.broadcast %cst_20 : f32 to vector<8x128xf32>
    %60 = arith.select %3, %48, %59 : vector<8x128xi1>, vector<8x128xf32>
    %cst_21 = arith.constant 0.000000e+00 : f32
    %61 = vector.broadcast %cst_21 : f32 to vector<8x128xf32>
    %62 = arith.select %3, %61, %48 : vector<8x128xi1>, vector<8x128xf32>
    %63 = tpu.concatenate %60, %62 in 1 : vector<8x128xf32>, vector<8x128xf32> -> vector<8x256xf32>
    %64 = arith.truncf %63 : vector<8x256xf32> to vector<8x256xbf16>
    %65 = arith.index_cast %55 : i32 to index
    %c0_22 = arith.constant 0 : index
    %66 = vector.load %arg10[%65, %c0_22] : memref<64x512xf32, #tpu.memory_space<vmem>>, vector<8x512xf32>
    %c0_23 = arith.constant 0 : index
    %c0_24 = arith.constant 0 : index
    %67 = vector.load %arg3[%c0_23, %c0_24] : memref<8x512xf32, #tpu.memory_space<vmem>>, vector<8x512xf32>
    %68 = arith.addf %66, %67 : vector<8x512xf32>
    %c0_25 = arith.constant 0 : index
    %c0_26 = arith.constant 0 : index
    %69 = vector.load %arg4[%c0_25, %c0_26] : memref<256x512xbf16, #tpu.memory_space<vmem>>, vector<256x512xbf16>
    %cst_27 = arith.constant dense<0.000000e+00> : vector<8x512xf32>
    %70 = tpu.matmul %64, %69, %cst_27 {dimension_numbers = #tpu.dot_dimension_numbers<[1], [0], [0], [1], [0, 0, 1, 1], [], []>} : vector<8x256xbf16>, vector<256x512xbf16>, vector<8x512xf32> -> vector<8x512xf32>
    %71 = arith.addf %68, %70 : vector<8x512xf32>
    %72 = vector.extract_strided_slice %71 {offsets = [0, 0], sizes = [8, 128], strides = [1, 1]} : vector<8x512xf32> to vector<8x128xf32>
    %73 = arith.negf %72 : vector<8x128xf32>
    %74 = math.exp %73 : vector<8x128xf32>
    %cst_28 = arith.constant 1.000000e+00 : f32
    %75 = vector.broadcast %cst_28 : f32 to vector<8x128xf32>
    %76 = arith.addf %75, %74 : vector<8x128xf32>
    %77 = arith.divf %75, %76 : vector<8x128xf32>
    %78 = vector.extract_strided_slice %71 {offsets = [0, 128], sizes = [8, 128], strides = [1, 1]} : vector<8x512xf32> to vector<8x128xf32>
    %79 = arith.negf %78 : vector<8x128xf32>
    %80 = math.exp %79 : vector<8x128xf32>
    %cst_29 = arith.constant 1.000000e+00 : f32
    %81 = vector.broadcast %cst_29 : f32 to vector<8x128xf32>
    %82 = arith.addf %81, %80 : vector<8x128xf32>
    %83 = arith.divf %81, %82 : vector<8x128xf32>
    %84 = vector.extract_strided_slice %71 {offsets = [0, 256], sizes = [8, 128], strides = [1, 1]} : vector<8x512xf32> to vector<8x128xf32>
    %85 = math.tanh %84 : vector<8x128xf32>
    %86 = vector.extract_strided_slice %71 {offsets = [0, 384], sizes = [8, 128], strides = [1, 1]} : vector<8x512xf32> to vector<8x128xf32>
    %87 = arith.negf %86 : vector<8x128xf32>
    %88 = math.exp %87 : vector<8x128xf32>
    %cst_30 = arith.constant 1.000000e+00 : f32
    %89 = vector.broadcast %cst_30 : f32 to vector<8x128xf32>
    %90 = arith.addf %89, %88 : vector<8x128xf32>
    %91 = arith.divf %89, %90 : vector<8x128xf32>
    %92 = arith.mulf %83, %46 : vector<8x128xf32>
    %93 = arith.mulf %77, %85 : vector<8x128xf32>
    %94 = arith.addf %92, %93 : vector<8x128xf32>
    %95 = math.tanh %94 : vector<8x128xf32>
    %96 = arith.mulf %91, %95 : vector<8x128xf32>
    %97 = arith.index_cast %55 : i32 to index
    %c0_31 = arith.constant 0 : index
    %98 = vector.load %arg11[%97, %c0_31] : memref<64x256xf32, #tpu.memory_space<vmem>>, vector<8x128xf32>
    tpu.vector_store %arg11[%97, %c0_31], %96 {strides = array<i32>} : memref<64x256xf32, #tpu.memory_space<vmem>>, vector<8x128xf32>,
    %c4_i32_32 = arith.constant 4 : i32
    %99 = tpu.dynamic_rotate %96 by %c4_i32_32 dim 0 : vector<8x128xf32>, i32 -> vector<8x128xf32>
    %100 = arith.index_cast %58 : i32 to index
    %c128_33 = arith.constant 128 : index
    %101 = vector.load %arg11[%100, %c128_33] : memref<64x256xf32, #tpu.memory_space<vmem>>, vector<8x128xf32>
    tpu.vector_store %arg11[%100, %c128_33], %99 {strides = array<i32>} : memref<64x256xf32, #tpu.memory_space<vmem>>, vector<8x128xf32>,
    %c2_i32_34 = arith.constant 2 : i32
    %c8_i32_35 = arith.constant 8 : i32
    %102 = arith.muli %c2_i32_34, %c8_i32_35 : i32
    %103 = tpu.assume_multiple %102, 8 : i32
    %c7_i32_36 = arith.constant 7 : i32
    %104 = arith.subi %c7_i32_36, %c2_i32_34 : i32
    %c8_i32_37 = arith.constant 8 : i32
    %105 = arith.muli %104, %c8_i32_37 : i32
    %106 = tpu.assume_multiple %105, 8 : i32
    %cst_38 = arith.constant 0.000000e+00 : f32
    %107 = vector.broadcast %cst_38 : f32 to vector<8x128xf32>
    %108 = arith.select %3, %96, %107 : vector<8x128xi1>, vector<8x128xf32>
    %cst_39 = arith.constant 0.000000e+00 : f32
    %109 = vector.broadcast %cst_39 : f32 to vector<8x128xf32>
    %110 = arith.select %3, %109, %96 : vector<8x128xi1>, vector<8x128xf32>
    %111 = tpu.concatenate %108, %110 in 1 : vector<8x128xf32>, vector<8x128xf32> -> vector<8x256xf32>
    %112 = arith.truncf %111 : vector<8x256xf32> to vector<8x256xbf16>
    %113 = arith.index_cast %103 : i32 to index
    %c0_40 = arith.constant 0 : index
    %114 = vector.load %arg10[%113, %c0_40] : memref<64x512xf32, #tpu.memory_space<vmem>>, vector<8x512xf32>
    %c0_41 = arith.constant 0 : index
    %c0_42 = arith.constant 0 : index
    %115 = vector.load %arg3[%c0_41, %c0_42] : memref<8x512xf32, #tpu.memory_space<vmem>>, vector<8x512xf32>
    %116 = arith.addf %114, %115 : vector<8x512xf32>
    %c0_43 = arith.constant 0 : index
    %c0_44 = arith.constant 0 : index
    %117 = vector.load %arg4[%c0_43, %c0_44] : memref<256x512xbf16, #tpu.memory_space<vmem>>, vector<256x512xbf16>
    %cst_45 = arith.constant dense<0.000000e+00> : vector<8x512xf32>
    %118 = tpu.matmul %112, %117, %cst_45 {dimension_numbers = #tpu.dot_dimension_numbers<[1], [0], [0], [1], [0, 0, 1, 1], [], []>} : vector<8x256xbf16>, vector<256x512xbf16>, vector<8x512xf32> -> vector<8x512xf32>
    %119 = arith.addf %116, %118 : vector<8x512xf32>
    %120 = vector.extract_strided_slice %119 {offsets = [0, 0], sizes = [8, 128], strides = [1, 1]} : vector<8x512xf32> to vector<8x128xf32>
    %121 = arith.negf %120 : vector<8x128xf32>
    %122 = math.exp %121 : vector<8x128xf32>
    %cst_46 = arith.constant 1.000000e+00 : f32
    %123 = vector.broadcast %cst_46 : f32 to vector<8x128xf32>
    %124 = arith.addf %123, %122 : vector<8x128xf32>
    %125 = arith.divf %123, %124 : vector<8x128xf32>
    %126 = vector.extract_strided_slice %119 {offsets = [0, 128], sizes = [8, 128], strides = [1, 1]} : vector<8x512xf32> to vector<8x128xf32>
    %127 = arith.negf %126 : vector<8x128xf32>
    %128 = math.exp %127 : vector<8x128xf32>
    %cst_47 = arith.constant 1.000000e+00 : f32
    %129 = vector.broadcast %cst_47 : f32 to vector<8x128xf32>
    %130 = arith.addf %129, %128 : vector<8x128xf32>
    %131 = arith.divf %129, %130 : vector<8x128xf32>
    %132 = vector.extract_strided_slice %119 {offsets = [0, 256], sizes = [8, 128], strides = [1, 1]} : vector<8x512xf32> to vector<8x128xf32>
    %133 = math.tanh %132 : vector<8x128xf32>
    %134 = vector.extract_strided_slice %119 {offsets = [0, 384], sizes = [8, 128], strides = [1, 1]} : vector<8x512xf32> to vector<8x128xf32>
    %135 = arith.negf %134 : vector<8x128xf32>
    %136 = math.exp %135 : vector<8x128xf32>
    %cst_48 = arith.constant 1.000000e+00 : f32
    %137 = vector.broadcast %cst_48 : f32 to vector<8x128xf32>
    %138 = arith.addf %137, %136 : vector<8x128xf32>
    %139 = arith.divf %137, %138 : vector<8x128xf32>
    %140 = arith.mulf %131, %94 : vector<8x128xf32>
    %141 = arith.mulf %125, %133 : vector<8x128xf32>
    %142 = arith.addf %140, %141 : vector<8x128xf32>
    %143 = math.tanh %142 : vector<8x128xf32>
    %144 = arith.mulf %139, %143 : vector<8x128xf32>
    %145 = arith.index_cast %103 : i32 to index
    %c0_49 = arith.constant 0 : index
    %146 = vector.load %arg11[%145, %c0_49] : memref<64x256xf32, #tpu.memory_space<vmem>>, vector<8x128xf32>
    tpu.vector_store %arg11[%145, %c0_49], %144 {strides = array<i32>} : memref<64x256xf32, #tpu.memory_space<vmem>>, vector<8x128xf32>,
    %c4_i32_50 = arith.constant 4 : i32
    %147 = tpu.dynamic_rotate %144 by %c4_i32_50 dim 0 : vector<8x128xf32>, i32 -> vector<8x128xf32>
    %148 = arith.index_cast %106 : i32 to index
    %c128_51 = arith.constant 128 : index
    %149 = vector.load %arg11[%148, %c128_51] : memref<64x256xf32, #tpu.memory_space<vmem>>, vector<8x128xf32>
    tpu.vector_store %arg11[%148, %c128_51], %147 {strides = array<i32>} : memref<64x256xf32, #tpu.memory_space<vmem>>, vector<8x128xf32>,
    %c3_i32 = arith.constant 3 : i32
    %c8_i32_52 = arith.constant 8 : i32
    %150 = arith.muli %c3_i32, %c8_i32_52 : i32
    %151 = tpu.assume_multiple %150, 8 : i32
    %c7_i32_53 = arith.constant 7 : i32
    %152 = arith.subi %c7_i32_53, %c3_i32 : i32
    %c8_i32_54 = arith.constant 8 : i32
    %153 = arith.muli %152, %c8_i32_54 : i32
    %154 = tpu.assume_multiple %153, 8 : i32
    %cst_55 = arith.constant 0.000000e+00 : f32
    %155 = vector.broadcast %cst_55 : f32 to vector<8x128xf32>
    %156 = arith.select %3, %144, %155 : vector<8x128xi1>, vector<8x128xf32>
    %cst_56 = arith.constant 0.000000e+00 : f32
    %157 = vector.broadcast %cst_56 : f32 to vector<8x128xf32>
    %158 = arith.select %3, %157, %144 : vector<8x128xi1>, vector<8x128xf32>
    %159 = tpu.concatenate %156, %158 in 1 : vector<8x128xf32>, vector<8x128xf32> -> vector<8x256xf32>
    %160 = arith.truncf %159 : vector<8x256xf32> to vector<8x256xbf16>
    %161 = arith.index_cast %151 : i32 to index
    %c0_57 = arith.constant 0 : index
    %162 = vector.load %arg10[%161, %c0_57] : memref<64x512xf32, #tpu.memory_space<vmem>>, vector<8x512xf32>
    %c0_58 = arith.constant 0 : index
    %c0_59 = arith.constant 0 : index
    %163 = vector.load %arg3[%c0_58, %c0_59] : memref<8x512xf32, #tpu.memory_space<vmem>>, vector<8x512xf32>
    %164 = arith.addf %162, %163 : vector<8x512xf32>
    %c0_60 = arith.constant 0 : index
    %c0_61 = arith.constant 0 : index
    %165 = vector.load %arg4[%c0_60, %c0_61] : memref<256x512xbf16, #tpu.memory_space<vmem>>, vector<256x512xbf16>
    %cst_62 = arith.constant dense<0.000000e+00> : vector<8x512xf32>
    %166 = tpu.matmul %160, %165, %cst_62 {dimension_numbers = #tpu.dot_dimension_numbers<[1], [0], [0], [1], [0, 0, 1, 1], [], []>} : vector<8x256xbf16>, vector<256x512xbf16>, vector<8x512xf32> -> vector<8x512xf32>
    %167 = arith.addf %164, %166 : vector<8x512xf32>
    %168 = vector.extract_strided_slice %167 {offsets = [0, 0], sizes = [8, 128], strides = [1, 1]} : vector<8x512xf32> to vector<8x128xf32>
    %169 = arith.negf %168 : vector<8x128xf32>
    %170 = math.exp %169 : vector<8x128xf32>
    %cst_63 = arith.constant 1.000000e+00 : f32
    %171 = vector.broadcast %cst_63 : f32 to vector<8x128xf32>
    %172 = arith.addf %171, %170 : vector<8x128xf32>
    %173 = arith.divf %171, %172 : vector<8x128xf32>
    %174 = vector.extract_strided_slice %167 {offsets = [0, 128], sizes = [8, 128], strides = [1, 1]} : vector<8x512xf32> to vector<8x128xf32>
    %175 = arith.negf %174 : vector<8x128xf32>
    %176 = math.exp %175 : vector<8x128xf32>
    %cst_64 = arith.constant 1.000000e+00 : f32
    %177 = vector.broadcast %cst_64 : f32 to vector<8x128xf32>
    %178 = arith.addf %177, %176 : vector<8x128xf32>
    %179 = arith.divf %177, %178 : vector<8x128xf32>
    %180 = vector.extract_strided_slice %167 {offsets = [0, 256], sizes = [8, 128], strides = [1, 1]} : vector<8x512xf32> to vector<8x128xf32>
    %181 = math.tanh %180 : vector<8x128xf32>
    %182 = vector.extract_strided_slice %167 {offsets = [0, 384], sizes = [8, 128], strides = [1, 1]} : vector<8x512xf32> to vector<8x128xf32>
    %183 = arith.negf %182 : vector<8x128xf32>
    %184 = math.exp %183 : vector<8x128xf32>
    %cst_65 = arith.constant 1.000000e+00 : f32
    %185 = vector.broadcast %cst_65 : f32 to vector<8x128xf32>
    %186 = arith.addf %185, %184 : vector<8x128xf32>
    %187 = arith.divf %185, %186 : vector<8x128xf32>
    %188 = arith.mulf %179, %142 : vector<8x128xf32>
    %189 = arith.mulf %173, %181 : vector<8x128xf32>
    %190 = arith.addf %188, %189 : vector<8x128xf32>
    %191 = math.tanh %190 : vector<8x128xf32>
    %192 = arith.mulf %187, %191 : vector<8x128xf32>
    %193 = arith.index_cast %151 : i32 to index
    %c0_66 = arith.constant 0 : index
    %194 = vector.load %arg11[%193, %c0_66] : memref<64x256xf32, #tpu.memory_space<vmem>>, vector<8x128xf32>
    tpu.vector_store %arg11[%193, %c0_66], %192 {strides = array<i32>} : memref<64x256xf32, #tpu.memory_space<vmem>>, vector<8x128xf32>,
    %c4_i32_67 = arith.constant 4 : i32
    %195 = tpu.dynamic_rotate %192 by %c4_i32_67 dim 0 : vector<8x128xf32>, i32 -> vector<8x128xf32>
    %196 = arith.index_cast %154 : i32 to index
    %c128_68 = arith.constant 128 : index
    %197 = vector.load %arg11[%196, %c128_68] : memref<64x256xf32, #tpu.memory_space<vmem>>, vector<8x128xf32>
    tpu.vector_store %arg11[%196, %c128_68], %195 {strides = array<i32>} : memref<64x256xf32, #tpu.memory_space<vmem>>, vector<8x128xf32>,
    %c4_i32_69 = arith.constant 4 : i32
    %c8_i32_70 = arith.constant 8 : i32
    %198 = arith.muli %c4_i32_69, %c8_i32_70 : i32
    %199 = tpu.assume_multiple %198, 8 : i32
    %c7_i32_71 = arith.constant 7 : i32
    %200 = arith.subi %c7_i32_71, %c4_i32_69 : i32
    %c8_i32_72 = arith.constant 8 : i32
    %201 = arith.muli %200, %c8_i32_72 : i32
    %202 = tpu.assume_multiple %201, 8 : i32
    %cst_73 = arith.constant 0.000000e+00 : f32
    %203 = vector.broadcast %cst_73 : f32 to vector<8x128xf32>
    %204 = arith.select %3, %192, %203 : vector<8x128xi1>, vector<8x128xf32>
    %cst_74 = arith.constant 0.000000e+00 : f32
    %205 = vector.broadcast %cst_74 : f32 to vector<8x128xf32>
    %206 = arith.select %3, %205, %192 : vector<8x128xi1>, vector<8x128xf32>
    %207 = tpu.concatenate %204, %206 in 1 : vector<8x128xf32>, vector<8x128xf32> -> vector<8x256xf32>
    %208 = arith.truncf %207 : vector<8x256xf32> to vector<8x256xbf16>
    %209 = arith.index_cast %199 : i32 to index
    %c0_75 = arith.constant 0 : index
    %210 = vector.load %arg10[%209, %c0_75] : memref<64x512xf32, #tpu.memory_space<vmem>>, vector<8x512xf32>
    %c0_76 = arith.constant 0 : index
    %c0_77 = arith.constant 0 : index
    %211 = vector.load %arg3[%c0_76, %c0_77] : memref<8x512xf32, #tpu.memory_space<vmem>>, vector<8x512xf32>
    %212 = arith.addf %210, %211 : vector<8x512xf32>
    %c0_78 = arith.constant 0 : index
    %c0_79 = arith.constant 0 : index
    %213 = vector.load %arg4[%c0_78, %c0_79] : memref<256x512xbf16, #tpu.memory_space<vmem>>, vector<256x512xbf16>
    %cst_80 = arith.constant dense<0.000000e+00> : vector<8x512xf32>
    %214 = tpu.matmul %208, %213, %cst_80 {dimension_numbers = #tpu.dot_dimension_numbers<[1], [0], [0], [1], [0, 0, 1, 1], [], []>} : vector<8x256xbf16>, vector<256x512xbf16>, vector<8x512xf32> -> vector<8x512xf32>
    %215 = arith.addf %212, %214 : vector<8x512xf32>
    %216 = vector.extract_strided_slice %215 {offsets = [0, 0], sizes = [8, 128], strides = [1, 1]} : vector<8x512xf32> to vector<8x128xf32>
    %217 = arith.negf %216 : vector<8x128xf32>
    %218 = math.exp %217 : vector<8x128xf32>
    %cst_81 = arith.constant 1.000000e+00 : f32
    %219 = vector.broadcast %cst_81 : f32 to vector<8x128xf32>
    %220 = arith.addf %219, %218 : vector<8x128xf32>
    %221 = arith.divf %219, %220 : vector<8x128xf32>
    %222 = vector.extract_strided_slice %215 {offsets = [0, 128], sizes = [8, 128], strides = [1, 1]} : vector<8x512xf32> to vector<8x128xf32>
    %223 = arith.negf %222 : vector<8x128xf32>
    %224 = math.exp %223 : vector<8x128xf32>
    %cst_82 = arith.constant 1.000000e+00 : f32
    %225 = vector.broadcast %cst_82 : f32 to vector<8x128xf32>
    %226 = arith.addf %225, %224 : vector<8x128xf32>
    %227 = arith.divf %225, %226 : vector<8x128xf32>
    %228 = vector.extract_strided_slice %215 {offsets = [0, 256], sizes = [8, 128], strides = [1, 1]} : vector<8x512xf32> to vector<8x128xf32>
    %229 = math.tanh %228 : vector<8x128xf32>
    %230 = vector.extract_strided_slice %215 {offsets = [0, 384], sizes = [8, 128], strides = [1, 1]} : vector<8x512xf32> to vector<8x128xf32>
    %231 = arith.negf %230 : vector<8x128xf32>
    %232 = math.exp %231 : vector<8x128xf32>
    %cst_83 = arith.constant 1.000000e+00 : f32
    %233 = vector.broadcast %cst_83 : f32 to vector<8x128xf32>
    %234 = arith.addf %233, %232 : vector<8x128xf32>
    %235 = arith.divf %233, %234 : vector<8x128xf32>
    %236 = arith.mulf %227, %190 : vector<8x128xf32>
    %237 = arith.mulf %221, %229 : vector<8x128xf32>
    %238 = arith.addf %236, %237 : vector<8x128xf32>
    %239 = math.tanh %238 : vector<8x128xf32>
    %240 = arith.mulf %235, %239 : vector<8x128xf32>
    %241 = arith.index_cast %199 : i32 to index
    %c0_84 = arith.constant 0 : index
    %242 = vector.load %arg11[%241, %c0_84] : memref<64x256xf32, #tpu.memory_space<vmem>>, vector<8x128xf32>
    tpu.vector_store %arg11[%241, %c0_84], %240 {strides = array<i32>} : memref<64x256xf32, #tpu.memory_space<vmem>>, vector<8x128xf32>,
    %c4_i32_85 = arith.constant 4 : i32
    %243 = tpu.dynamic_rotate %240 by %c4_i32_85 dim 0 : vector<8x128xf32>, i32 -> vector<8x128xf32>
    %244 = arith.index_cast %202 : i32 to index
    %c128_86 = arith.constant 128 : index
    %245 = vector.load %arg11[%244, %c128_86] : memref<64x256xf32, #tpu.memory_space<vmem>>, vector<8x128xf32>
    tpu.vector_store %arg11[%244, %c128_86], %243 {strides = array<i32>} : memref<64x256xf32, #tpu.memory_space<vmem>>, vector<8x128xf32>,
    %c5_i32 = arith.constant 5 : i32
    %c8_i32_87 = arith.constant 8 : i32
    %246 = arith.muli %c5_i32, %c8_i32_87 : i32
    %247 = tpu.assume_multiple %246, 8 : i32
    %c7_i32_88 = arith.constant 7 : i32
    %248 = arith.subi %c7_i32_88, %c5_i32 : i32
    %c8_i32_89 = arith.constant 8 : i32
    %249 = arith.muli %248, %c8_i32_89 : i32
    %250 = tpu.assume_multiple %249, 8 : i32
    %cst_90 = arith.constant 0.000000e+00 : f32
    %251 = vector.broadcast %cst_90 : f32 to vector<8x128xf32>
    %252 = arith.select %3, %240, %251 : vector<8x128xi1>, vector<8x128xf32>
    %cst_91 = arith.constant 0.000000e+00 : f32
    %253 = vector.broadcast %cst_91 : f32 to vector<8x128xf32>
    %254 = arith.select %3, %253, %240 : vector<8x128xi1>, vector<8x128xf32>
    %255 = tpu.concatenate %252, %254 in 1 : vector<8x128xf32>, vector<8x128xf32> -> vector<8x256xf32>
    %256 = arith.truncf %255 : vector<8x256xf32> to vector<8x256xbf16>
    %257 = arith.index_cast %247 : i32 to index
    %c0_92 = arith.constant 0 : index
    %258 = vector.load %arg10[%257, %c0_92] : memref<64x512xf32, #tpu.memory_space<vmem>>, vector<8x512xf32>
    %c0_93 = arith.constant 0 : index
    %c0_94 = arith.constant 0 : index
    %259 = vector.load %arg3[%c0_93, %c0_94] : memref<8x512xf32, #tpu.memory_space<vmem>>, vector<8x512xf32>
    %260 = arith.addf %258, %259 : vector<8x512xf32>
    %c0_95 = arith.constant 0 : index
    %c0_96 = arith.constant 0 : index
    %261 = vector.load %arg4[%c0_95, %c0_96] : memref<256x512xbf16, #tpu.memory_space<vmem>>, vector<256x512xbf16>
    %cst_97 = arith.constant dense<0.000000e+00> : vector<8x512xf32>
    %262 = tpu.matmul %256, %261, %cst_97 {dimension_numbers = #tpu.dot_dimension_numbers<[1], [0], [0], [1], [0, 0, 1, 1], [], []>} : vector<8x256xbf16>, vector<256x512xbf16>, vector<8x512xf32> -> vector<8x512xf32>
    %263 = arith.addf %260, %262 : vector<8x512xf32>
    %264 = vector.extract_strided_slice %263 {offsets = [0, 0], sizes = [8, 128], strides = [1, 1]} : vector<8x512xf32> to vector<8x128xf32>
    %265 = arith.negf %264 : vector<8x128xf32>
    %266 = math.exp %265 : vector<8x128xf32>
    %cst_98 = arith.constant 1.000000e+00 : f32
    %267 = vector.broadcast %cst_98 : f32 to vector<8x128xf32>
    %268 = arith.addf %267, %266 : vector<8x128xf32>
    %269 = arith.divf %267, %268 : vector<8x128xf32>
    %270 = vector.extract_strided_slice %263 {offsets = [0, 128], sizes = [8, 128], strides = [1, 1]} : vector<8x512xf32> to vector<8x128xf32>
    %271 = arith.negf %270 : vector<8x128xf32>
    %272 = math.exp %271 : vector<8x128xf32>
    %cst_99 = arith.constant 1.000000e+00 : f32
    %273 = vector.broadcast %cst_99 : f32 to vector<8x128xf32>
    %274 = arith.addf %273, %272 : vector<8x128xf32>
    %275 = arith.divf %273, %274 : vector<8x128xf32>
    %276 = vector.extract_strided_slice %263 {offsets = [0, 256], sizes = [8, 128], strides = [1, 1]} : vector<8x512xf32> to vector<8x128xf32>
    %277 = math.tanh %276 : vector<8x128xf32>
    %278 = vector.extract_strided_slice %263 {offsets = [0, 384], sizes = [8, 128], strides = [1, 1]} : vector<8x512xf32> to vector<8x128xf32>
    %279 = arith.negf %278 : vector<8x128xf32>
    %280 = math.exp %279 : vector<8x128xf32>
    %cst_100 = arith.constant 1.000000e+00 : f32
    %281 = vector.broadcast %cst_100 : f32 to vector<8x128xf32>
    %282 = arith.addf %281, %280 : vector<8x128xf32>
    %283 = arith.divf %281, %282 : vector<8x128xf32>
    %284 = arith.mulf %275, %238 : vector<8x128xf32>
    %285 = arith.mulf %269, %277 : vector<8x128xf32>
    %286 = arith.addf %284, %285 : vector<8x128xf32>
    %287 = math.tanh %286 : vector<8x128xf32>
    %288 = arith.mulf %283, %287 : vector<8x128xf32>
    %289 = arith.index_cast %247 : i32 to index
    %c0_101 = arith.constant 0 : index
    %290 = vector.load %arg11[%289, %c0_101] : memref<64x256xf32, #tpu.memory_space<vmem>>, vector<8x128xf32>
    tpu.vector_store %arg11[%289, %c0_101], %288 {strides = array<i32>} : memref<64x256xf32, #tpu.memory_space<vmem>>, vector<8x128xf32>,
    %c4_i32_102 = arith.constant 4 : i32
    %291 = tpu.dynamic_rotate %288 by %c4_i32_102 dim 0 : vector<8x128xf32>, i32 -> vector<8x128xf32>
    %292 = arith.index_cast %250 : i32 to index
    %c128_103 = arith.constant 128 : index
    %293 = vector.load %arg11[%292, %c128_103] : memref<64x256xf32, #tpu.memory_space<vmem>>, vector<8x128xf32>
    tpu.vector_store %arg11[%292, %c128_103], %291 {strides = array<i32>} : memref<64x256xf32, #tpu.memory_space<vmem>>, vector<8x128xf32>,
    %c6_i32 = arith.constant 6 : i32
    %c8_i32_104 = arith.constant 8 : i32
    %294 = arith.muli %c6_i32, %c8_i32_104 : i32
    %295 = tpu.assume_multiple %294, 8 : i32
    %c7_i32_105 = arith.constant 7 : i32
    %296 = arith.subi %c7_i32_105, %c6_i32 : i32
    %c8_i32_106 = arith.constant 8 : i32
    %297 = arith.muli %296, %c8_i32_106 : i32
    %298 = tpu.assume_multiple %297, 8 : i32
    %cst_107 = arith.constant 0.000000e+00 : f32
    %299 = vector.broadcast %cst_107 : f32 to vector<8x128xf32>
    %300 = arith.select %3, %288, %299 : vector<8x128xi1>, vector<8x128xf32>
    %cst_108 = arith.constant 0.000000e+00 : f32
    %301 = vector.broadcast %cst_108 : f32 to vector<8x128xf32>
    %302 = arith.select %3, %301, %288 : vector<8x128xi1>, vector<8x128xf32>
    %303 = tpu.concatenate %300, %302 in 1 : vector<8x128xf32>, vector<8x128xf32> -> vector<8x256xf32>
    %304 = arith.truncf %303 : vector<8x256xf32> to vector<8x256xbf16>
    %305 = arith.index_cast %295 : i32 to index
    %c0_109 = arith.constant 0 : index
    %306 = vector.load %arg10[%305, %c0_109] : memref<64x512xf32, #tpu.memory_space<vmem>>, vector<8x512xf32>
    %c0_110 = arith.constant 0 : index
    %c0_111 = arith.constant 0 : index
    %307 = vector.load %arg3[%c0_110, %c0_111] : memref<8x512xf32, #tpu.memory_space<vmem>>, vector<8x512xf32>
    %308 = arith.addf %306, %307 : vector<8x512xf32>
    %c0_112 = arith.constant 0 : index
    %c0_113 = arith.constant 0 : index
    %309 = vector.load %arg4[%c0_112, %c0_113] : memref<256x512xbf16, #tpu.memory_space<vmem>>, vector<256x512xbf16>
    %cst_114 = arith.constant dense<0.000000e+00> : vector<8x512xf32>
    %310 = tpu.matmul %304, %309, %cst_114 {dimension_numbers = #tpu.dot_dimension_numbers<[1], [0], [0], [1], [0, 0, 1, 1], [], []>} : vector<8x256xbf16>, vector<256x512xbf16>, vector<8x512xf32> -> vector<8x512xf32>
    %311 = arith.addf %308, %310 : vector<8x512xf32>
    %312 = vector.extract_strided_slice %311 {offsets = [0, 0], sizes = [8, 128], strides = [1, 1]} : vector<8x512xf32> to vector<8x128xf32>
    %313 = arith.negf %312 : vector<8x128xf32>
    %314 = math.exp %313 : vector<8x128xf32>
    %cst_115 = arith.constant 1.000000e+00 : f32
    %315 = vector.broadcast %cst_115 : f32 to vector<8x128xf32>
    %316 = arith.addf %315, %314 : vector<8x128xf32>
    %317 = arith.divf %315, %316 : vector<8x128xf32>
    %318 = vector.extract_strided_slice %311 {offsets = [0, 128], sizes = [8, 128], strides = [1, 1]} : vector<8x512xf32> to vector<8x128xf32>
    %319 = arith.negf %318 : vector<8x128xf32>
    %320 = math.exp %319 : vector<8x128xf32>
    %cst_116 = arith.constant 1.000000e+00 : f32
    %321 = vector.broadcast %cst_116 : f32 to vector<8x128xf32>
    %322 = arith.addf %321, %320 : vector<8x128xf32>
    %323 = arith.divf %321, %322 : vector<8x128xf32>
    %324 = vector.extract_strided_slice %311 {offsets = [0, 256], sizes = [8, 128], strides = [1, 1]} : vector<8x512xf32> to vector<8x128xf32>
    %325 = math.tanh %324 : vector<8x128xf32>
    %326 = vector.extract_strided_slice %311 {offsets = [0, 384], sizes = [8, 128], strides = [1, 1]} : vector<8x512xf32> to vector<8x128xf32>
    %327 = arith.negf %326 : vector<8x128xf32>
    %328 = math.exp %327 : vector<8x128xf32>
    %cst_117 = arith.constant 1.000000e+00 : f32
    %329 = vector.broadcast %cst_117 : f32 to vector<8x128xf32>
    %330 = arith.addf %329, %328 : vector<8x128xf32>
    %331 = arith.divf %329, %330 : vector<8x128xf32>
    %332 = arith.mulf %323, %286 : vector<8x128xf32>
    %333 = arith.mulf %317, %325 : vector<8x128xf32>
    %334 = arith.addf %332, %333 : vector<8x128xf32>
    %335 = math.tanh %334 : vector<8x128xf32>
    %336 = arith.mulf %331, %335 : vector<8x128xf32>
    %337 = arith.index_cast %295 : i32 to index
    %c0_118 = arith.constant 0 : index
    %338 = vector.load %arg11[%337, %c0_118] : memref<64x256xf32, #tpu.memory_space<vmem>>, vector<8x128xf32>
    tpu.vector_store %arg11[%337, %c0_118], %336 {strides = array<i32>} : memref<64x256xf32, #tpu.memory_space<vmem>>, vector<8x128xf32>,
    %c4_i32_119 = arith.constant 4 : i32
    %339 = tpu.dynamic_rotate %336 by %c4_i32_119 dim 0 : vector<8x128xf32>, i32 -> vector<8x128xf32>
    %340 = arith.index_cast %298 : i32 to index
    %c128_120 = arith.constant 128 : index
    %341 = vector.load %arg11[%340, %c128_120] : memref<64x256xf32, #tpu.memory_space<vmem>>, vector<8x128xf32>
    tpu.vector_store %arg11[%340, %c128_120], %339 {strides = array<i32>} : memref<64x256xf32, #tpu.memory_space<vmem>>, vector<8x128xf32>,
    %c7_i32_121 = arith.constant 7 : i32
    %c8_i32_122 = arith.constant 8 : i32
    %342 = arith.muli %c7_i32_121, %c8_i32_122 : i32
    %343 = tpu.assume_multiple %342, 8 : i32
    %c7_i32_123 = arith.constant 7 : i32
    %344 = arith.subi %c7_i32_123, %c7_i32_121 : i32
    %c8_i32_124 = arith.constant 8 : i32
    %345 = arith.muli %344, %c8_i32_124 : i32
    %346 = tpu.assume_multiple %345, 8 : i32
    %cst_125 = arith.constant 0.000000e+00 : f32
    %347 = vector.broadcast %cst_125 : f32 to vector<8x128xf32>
    %348 = arith.select %3, %336, %347 : vector<8x128xi1>, vector<8x128xf32>
    %cst_126 = arith.constant 0.000000e+00 : f32
    %349 = vector.broadcast %cst_126 : f32 to vector<8x128xf32>
    %350 = arith.select %3, %349, %336 : vector<8x128xi1>, vector<8x128xf32>
    %351 = tpu.concatenate %348, %350 in 1 : vector<8x128xf32>, vector<8x128xf32> -> vector<8x256xf32>
    %352 = arith.truncf %351 : vector<8x256xf32> to vector<8x256xbf16>
    %353 = arith.index_cast %343 : i32 to index
    %c0_127 = arith.constant 0 : index
    %354 = vector.load %arg10[%353, %c0_127] : memref<64x512xf32, #tpu.memory_space<vmem>>, vector<8x512xf32>
    %c0_128 = arith.constant 0 : index
    %c0_129 = arith.constant 0 : index
    %355 = vector.load %arg3[%c0_128, %c0_129] : memref<8x512xf32, #tpu.memory_space<vmem>>, vector<8x512xf32>
    %356 = arith.addf %354, %355 : vector<8x512xf32>
    %c0_130 = arith.constant 0 : index
    %c0_131 = arith.constant 0 : index
    %357 = vector.load %arg4[%c0_130, %c0_131] : memref<256x512xbf16, #tpu.memory_space<vmem>>, vector<256x512xbf16>
    %cst_132 = arith.constant dense<0.000000e+00> : vector<8x512xf32>
    %358 = tpu.matmul %352, %357, %cst_132 {dimension_numbers = #tpu.dot_dimension_numbers<[1], [0], [0], [1], [0, 0, 1, 1], [], []>} : vector<8x256xbf16>, vector<256x512xbf16>, vector<8x512xf32> -> vector<8x512xf32>
    %359 = arith.addf %356, %358 : vector<8x512xf32>
    %360 = vector.extract_strided_slice %359 {offsets = [0, 0], sizes = [8, 128], strides = [1, 1]} : vector<8x512xf32> to vector<8x128xf32>
    %361 = arith.negf %360 : vector<8x128xf32>
    %362 = math.exp %361 : vector<8x128xf32>
    %cst_133 = arith.constant 1.000000e+00 : f32
    %363 = vector.broadcast %cst_133 : f32 to vector<8x128xf32>
    %364 = arith.addf %363, %362 : vector<8x128xf32>
    %365 = arith.divf %363, %364 : vector<8x128xf32>
    %366 = vector.extract_strided_slice %359 {offsets = [0, 128], sizes = [8, 128], strides = [1, 1]} : vector<8x512xf32> to vector<8x128xf32>
    %367 = arith.negf %366 : vector<8x128xf32>
    %368 = math.exp %367 : vector<8x128xf32>
    %cst_134 = arith.constant 1.000000e+00 : f32
    %369 = vector.broadcast %cst_134 : f32 to vector<8x128xf32>
    %370 = arith.addf %369, %368 : vector<8x128xf32>
    %371 = arith.divf %369, %370 : vector<8x128xf32>
    %372 = vector.extract_strided_slice %359 {offsets = [0, 256], sizes = [8, 128], strides = [1, 1]} : vector<8x512xf32> to vector<8x128xf32>
    %373 = math.tanh %372 : vector<8x128xf32>
    %374 = vector.extract_strided_slice %359 {offsets = [0, 384], sizes = [8, 128], strides = [1, 1]} : vector<8x512xf32> to vector<8x128xf32>
    %375 = arith.negf %374 : vector<8x128xf32>
    %376 = math.exp %375 : vector<8x128xf32>
    %cst_135 = arith.constant 1.000000e+00 : f32
    %377 = vector.broadcast %cst_135 : f32 to vector<8x128xf32>
    %378 = arith.addf %377, %376 : vector<8x128xf32>
    %379 = arith.divf %377, %378 : vector<8x128xf32>
    %380 = arith.mulf %371, %334 : vector<8x128xf32>
    %381 = arith.mulf %365, %373 : vector<8x128xf32>
    %382 = arith.addf %380, %381 : vector<8x128xf32>
    %383 = math.tanh %382 : vector<8x128xf32>
    %384 = arith.mulf %379, %383 : vector<8x128xf32>
    %385 = arith.index_cast %343 : i32 to index
    %c0_136 = arith.constant 0 : index
    %386 = vector.load %arg11[%385, %c0_136] : memref<64x256xf32, #tpu.memory_space<vmem>>, vector<8x128xf32>
    tpu.vector_store %arg11[%385, %c0_136], %384 {strides = array<i32>} : memref<64x256xf32, #tpu.memory_space<vmem>>, vector<8x128xf32>,
    %c4_i32_137 = arith.constant 4 : i32
    %387 = tpu.dynamic_rotate %384 by %c4_i32_137 dim 0 : vector<8x128xf32>, i32 -> vector<8x128xf32>
    %388 = arith.index_cast %346 : i32 to index
    %c128_138 = arith.constant 128 : index
    %389 = vector.load %arg11[%388, %c128_138] : memref<64x256xf32, #tpu.memory_space<vmem>>, vector<8x128xf32>
    tpu.vector_store %arg11[%388, %c128_138], %387 {strides = array<i32>} : memref<64x256xf32, #tpu.memory_space<vmem>>, vector<8x128xf32>,
    %c8_i32_139 = arith.constant 8 : i32
    %c0_140 = arith.constant 0 : index
    %c0_141 = arith.constant 0 : index
    %390 = vector.load %arg11[%c0_140, %c0_141] : memref<64x256xf32, #tpu.memory_space<vmem>>, vector<64x256xf32>
    %391 = arith.truncf %390 : vector<64x256xf32> to vector<64x256xbf16>
    %c0_142 = arith.constant 0 : index
    %c0_143 = arith.constant 0 : index
    %392 = vector.load %arg5[%c0_142, %c0_143] : memref<256x128xbf16, #tpu.memory_space<vmem>>, vector<256x128xbf16>
    %cst_144 = arith.constant dense<0.000000e+00> : vector<64x128xf32>
    %393 = tpu.matmul %391, %392, %cst_144 {dimension_numbers = #tpu.dot_dimension_numbers<[1], [0], [0], [1], [0, 0, 1, 1], [], []>} : vector<64x256xbf16>, vector<256x128xbf16>, vector<64x128xf32> -> vector<64x128xf32>
    %c0_145 = arith.constant 0 : index
    %c0_146 = arith.constant 0 : index
    %394 = vector.load %arg6[%c0_145, %c0_146] : memref<1x128xf32, #tpu.memory_space<vmem>>, vector<1x128xf32>
    %395 = vector.broadcast %394 : vector<1x128xf32> to vector<64x128xf32>
    %396 = arith.addf %393, %395 : vector<64x128xf32>
    %cst_147 = arith.constant 0.000000e+00 : f32
    %397 = vector.broadcast %cst_147 : f32 to vector<64x128xf32>
    %398 = arith.maximumf %396, %397 : vector<64x128xf32>
    %399 = arith.truncf %398 : vector<64x128xf32> to vector<64x128xbf16>
    %c0_148 = arith.constant 0 : index
    %c0_149 = arith.constant 0 : index
    %400 = vector.load %arg7[%c0_148, %c0_149] : memref<128x128xbf16, #tpu.memory_space<vmem>>, vector<128x128xbf16>
    %cst_150 = arith.constant dense<0.000000e+00> : vector<64x128xf32>
    %401 = tpu.matmul %399, %400, %cst_150 {dimension_numbers = #tpu.dot_dimension_numbers<[1], [0], [0], [1], [0, 0, 1, 1], [], []>} : vector<64x128xbf16>, vector<128x128xbf16>, vector<64x128xf32> -> vector<64x128xf32>
    %c0_151 = arith.constant 0 : index
    %c0_152 = arith.constant 0 : index
    %402 = vector.load %arg8[%c0_151, %c0_152] : memref<1x128xf32, #tpu.memory_space<vmem>>, vector<1x128xf32>
    %403 = vector.broadcast %402 : vector<1x128xf32> to vector<64x128xf32>
    %404 = arith.addf %401, %403 : vector<64x128xf32>
    %c0_153 = arith.constant 0 : index
    %c0_154 = arith.constant 0 : index
    %405 = vector.load %arg9[%c0_153, %c0_154] : memref<64x128xf32, #tpu.memory_space<vmem>>, vector<64x128xf32>
    tpu.vector_store %arg9[%c0_153, %c0_154], %404 {strides = array<i32>} : memref<64x128xf32, #tpu.memory_space<vmem>>, vector<64x128xf32>,
    return
  }
  func.func @transform_0(%arg0: i32) -> (i32, i32) {
    %c0_i32 = arith.constant 0 : i32
    %c0_i32_0 = arith.constant 0 : i32
    return %arg0, %c0_i32 : i32, i32
  }
  func.func @transform_1(%arg0: i32) -> (i32, i32) {
    %c0_i32 = arith.constant 0 : i32
    %c0_i32_0 = arith.constant 0 : i32
    %c0_i32_1 = arith.constant 0 : i32
    return %c0_i32, %c0_i32_0 : i32, i32
  }
  func.func @transform_2(%arg0: i32) -> (i32, i32) {
    %c0_i32 = arith.constant 0 : i32
    %c0_i32_0 = arith.constant 0 : i32
    %c0_i32_1 = arith.constant 0 : i32
    return %c0_i32, %c0_i32_0 : i32, i32
  }
  func.func @transform_3(%arg0: i32) -> (i32, i32) {
    %c0_i32 = arith.constant 0 : i32
    %c0_i32_0 = arith.constant 0 : i32
    %c0_i32_1 = arith.constant 0 : i32
    return %c0_i32, %c0_i32_0 : i32, i32
  }
  func.func @transform_4(%arg0: i32) -> (i32, i32) {
    %c0_i32 = arith.constant 0 : i32
    %c0_i32_0 = arith.constant 0 : i32
    %c0_i32_1 = arith.constant 0 : i32
    return %c0_i32, %c0_i32_0 : i32, i32
  }
  func.func @transform_5(%arg0: i32) -> (i32, i32) {
    %c0_i32 = arith.constant 0 : i32
    %c0_i32_0 = arith.constant 0 : i32
    %c0_i32_1 = arith.constant 0 : i32
    return %c0_i32, %c0_i32_0 : i32, i32
  }
  func.func @transform_6(%arg0: i32) -> (i32, i32) {
    %c0_i32 = arith.constant 0 : i32
    %c0_i32_0 = arith.constant 0 : i32
    %c0_i32_1 = arith.constant 0 : i32
    return %c0_i32, %c0_i32_0 : i32, i32
  }
  func.func @transform_7(%arg0: i32) -> (i32, i32) {
    %c0_i32 = arith.constant 0 : i32
    %c0_i32_0 = arith.constant 0 : i32
    %c0_i32_1 = arith.constant 0 : i32
    return %c0_i32, %c0_i32_0 : i32, i32
  }
  func.func @transform_8(%arg0: i32) -> (i32, i32) {
    %c0_i32 = arith.constant 0 : i32
    %c0_i32_0 = arith.constant 0 : i32
    return %arg0, %c0_i32 : i32, i32
  }
}

</mosaic_0001>

<bundles_post_ra>
// kernel: tpu_custom_call.1
= control target key start
LH: loop header
LB: loop body
LE: loop exit
PB: predicated region body
PF: predicated region fallthrough
CT: control target
= control target key end

     0   :  { %13 = vsyncpa [#allocation5], 0  ;;  %s8056_s0 = inlined_call_operand.hbm [shape: bf16[64,256], index: 0, kind: input, shape index: {}]   ;;  %s8057_s1 = inlined_call_operand.hbm [shape: bf16[256,512], index: 1, kind: input, shape index: {}]   ;;  %s8058_s2 = inlined_call_operand.hbm [shape: f32[8,512], index: 2, kind: input, shape index: {}]   ;;  %s8059_s3 = inlined_call_operand.hbm [shape: bf16[256,512], index: 3, kind: input, shape index: {}]   ;;  %s8060_s4 = inlined_call_operand.hbm [shape: bf16[256,128], index: 4, kind: input, shape index: {}]   ;;  %s8061_s5 = inlined_call_operand.vmem [shape: f32[1,128], index: 5, kind: input, shape index: {}]   ;;  %s8062_s6 = inlined_call_operand.hbm [shape: bf16[128,128], index: 6, kind: input, shape index: {}]   ;;  %s8063_s7 = inlined_call_operand.vmem [shape: f32[1,128], index: 7, kind: input, shape index: {}]   ;;  %s8064_s8 = inlined_call_operand.hbm [shape: f32[64,128], index: 8, kind: output, shape index: {}]  }
   0x1   :  { %14 = vsyncpa [#allocation8], 0 }
   0x2   :  { %15 = vsyncpa [#allocation11], 0 }
   0x3   :  { %16 = vsyncpa [#allocation14], 0 }
   0x4   :  { %17 = vsyncpa [#allocation6], 0  ;;  %s6792_s27 = smov [#allocation7]   ;;  %s6620_s9 = scalar_lea.hbm %s8057_s1, 8192 }
   0x5   :  { %s35_s28 = sshll.u32 %s6792_s27, 4  ;;  %p6621_p0 = scmp.ne.s32.totalorder %s8057_s1, %s6620_s9  ;;  %s36_s28 = int_to_ptr.vmem [resolvable:$true] %s35_s28 }
   0x6   :  { %p6624_p1 = scmp.lt.u32.totalorder %s6620_s9, %s8057_s1 }
   0x8   :  { %p6626_p2 = pnand %p6624_p1, %p6621_p0 }
   0xa   :  { %6629 = shalt.err (!%p6626_p2)
}
   0xb   :  { %s6630_s14 = scalar_lea.vmem %s36_s28, 8192  ;;  %p6635_p4 = scmp.lt.s32.totalorder %s36_s28, %s36_s28 }
   0xc   :  { %p6631_p3 = scmp.ne.s32.totalorder %s36_s28, %s6630_s14  ;;  %p6636_p5 = scmp.lt.s32.totalorder %s6630_s14, %s6630_s14 }
   0xe   :  { %p6637_p6 = por %p6636_p5, %p6635_p4 }
  0x10   :  { %p6638_p7 = pnand %p6637_p6, %p6631_p3 }
  0x12   :  { %6641 = shalt.err (!%p6638_p7)
}
  0x13   :  { %s6793_s15 = smov 256   ;;  %s6794_s16 = smov 16  }
  0x14   :  { %41 = dma.hbm_to_vmem [thread:$0]  %s8057_s1, 8192, %s36_s28, [#allocation8], %s6793_s15, %s6793_s15, %s6794_s16  }
  0x15   :  { %s6795_s19 = smov [#allocation10]   ;;  %s6796_s21 = smov [#allocation4]  }
  0x16   :  { %s57_s20 = sshll.u32 %s6795_s19, 4  ;;  %s23_s22 = sshll.u32 %s6796_s21, 4  ;;  %s58_s20 = int_to_ptr.vmem [resolvable:$true] %s57_s20  ;;  %s24_s22 = int_to_ptr.vmem [resolvable:$true] %s23_s22 }
  0x17   :  { %s6642_s25 = scalar_lea.hbm %s8059_s3, 8192 }
  0x18   :  { %p6643_p8 = scmp.ne.s32.totalorder %s8059_s3, %s6642_s25  ;;  %p6646_p9 = scmp.lt.u32.totalorder %s6642_s25, %s8059_s3 }
  0x1a   :  { %p6648_p10 = pnand %p6646_p9, %p6643_p8 }
  0x1c   :  { %6651 = shalt.err (!%p6648_p10)
}
  0x1d   :  { %s6652_s1 = scalar_lea.vmem %s58_s20, 8192  ;;  %p6657_p12 = scmp.lt.s32.totalorder %s58_s20, %s58_s20 }
  0x1e   :  { %p6653_p11 = scmp.ne.s32.totalorder %s58_s20, %s6652_s1  ;;  %p6658_p13 = scmp.lt.s32.totalorder %s6652_s1, %s6652_s1 }
  0x20   :  { %p6659_p0 = por %p6658_p13, %p6657_p12 }
  0x22   :  { %p6660_p1 = pnand %p6659_p0, %p6653_p11 }
  0x24   :  { %6663 = shalt.err (!%p6660_p1)
}
  0x25   :  { %63 = dma.hbm_to_vmem [thread:$0]  %s8059_s3, 8192, %s58_s20, [#allocation11], %s6793_s15, %s6793_s15, %s6794_s16  }
  0x26   :  { %s6664_s12 = scalar_lea.hbm %s8056_s0, 1024 }
  0x27   :  { %p6665_p2 = scmp.ne.s32.totalorder %s8056_s0, %s6664_s12  ;;  %p6668_p3 = scmp.lt.u32.totalorder %s6664_s12, %s8056_s0 }
  0x29   :  { %p6670_p4 = pnand %p6668_p3, %p6665_p2 }
  0x2b   :  { %6673 = shalt.err (!%p6670_p4)
}
  0x2c   :  { %s6674_s19 = scalar_lea.vmem %s24_s22, 1024  ;;  %p6679_p6 = scmp.lt.s32.totalorder %s24_s22, %s24_s22 }
  0x2d   :  { %p6675_p5 = scmp.ne.s32.totalorder %s24_s22, %s6674_s19  ;;  %p6680_p7 = scmp.lt.s32.totalorder %s6674_s19, %s6674_s19 }
  0x2f   :  { %p6681_p8 = por %p6680_p7, %p6679_p6 }
  0x31   :  { %p6682_p9 = pnand %p6681_p8, %p6675_p5 }
  0x33   :  { %6685 = shalt.err (!%p6682_p9)
}
  0x34   :  { %s6797_s3 = smov 128   ;;  %s6798_s15 = smov 8  }
  0x35   :  { %29 = dma.hbm_to_vmem [thread:$0]  %s8056_s0, 1024, %s24_s22, [#allocation5], %s6797_s3, %s6797_s3, %s6798_s15  }
  0x36   :  { %s6799_s21 = smov [#allocation9]   ;;  %s6800_s24 = smov [#allocation12]  }
  0x37   :  { %s48_s23 = sshll.u32 %s6799_s21, 4  ;;  %s69_s25 = sshll.u32 %s6800_s24, 4  ;;  %s49_s23 = int_to_ptr.vmem [resolvable:$true] %s48_s23  ;;  %s70_s25 = int_to_ptr.vmem [resolvable:$true] %s69_s25 }
  0x38   :  { %s6686_s29 = scalar_lea.hbm %s8058_s2, 512 }
  0x39   :  { %p6687_p10 = scmp.ne.s32.totalorder %s8058_s2, %s6686_s29  ;;  %p6690_p11 = scmp.lt.u32.totalorder %s6686_s29, %s8058_s2 }
  0x3b   :  { %p6692_p12 = pnand %p6690_p11, %p6687_p10 }
  0x3d   :  { %6695 = shalt.err (!%p6692_p12)
}
  0x3e   :  { %s6696_s0 = scalar_lea.vmem %s49_s23, 512  ;;  %p6701_p0 = scmp.lt.s32.totalorder %s49_s23, %s49_s23 }
  0x3f   :  { %p6697_p13 = scmp.ne.s32.totalorder %s49_s23, %s6696_s0  ;;  %p6702_p1 = scmp.lt.s32.totalorder %s6696_s0, %s6696_s0 }
  0x41   :  { %p6703_p2 = por %p6702_p1, %p6701_p0 }
  0x43   :  { %p6704_p3 = pnand %p6703_p2, %p6697_p13 }
  0x45   :  { %6707 = shalt.err (!%p6704_p3)
}
  0x46   :  { %51 = dma.hbm_to_vmem [thread:$0]  %s8058_s2, 512, %s49_s23, [#allocation8]  }
  0x47   :  { %s6708_s13 = scalar_lea.hbm %s8060_s4, 2048 }
  0x48   :  { %p6709_p4 = scmp.ne.s32.totalorder %s8060_s4, %s6708_s13  ;;  %p6712_p5 = scmp.lt.u32.totalorder %s6708_s13, %s8060_s4 }
  0x4a   :  { %p6714_p6 = pnand %p6712_p5, %p6709_p4 }
  0x4c   :  { %6717 = shalt.err (!%p6714_p6)
}
  0x4d   :  { %s6718_s16 = scalar_lea.vmem %s70_s25, 2048  ;;  %p6723_p8 = scmp.lt.s32.totalorder %s70_s25, %s70_s25 }
  0x4e   :  { %p6719_p7 = scmp.ne.s32.totalorder %s70_s25, %s6718_s16  ;;  %p6724_p9 = scmp.lt.s32.totalorder %s6718_s16, %s6718_s16 }
  0x50   :  { %p6725_p10 = por %p6724_p9, %p6723_p8 }
  0x52   :  { %p6726_p11 = pnand %p6725_p10, %p6719_p7 }
  0x54   :  { %6729 = shalt.err (!%p6726_p11)
}
  0x55   :  { %s6801_s2 = smov 64   ;;  %s6802_s20 = smov 4  }
  0x56   :  { %75 = dma.hbm_to_vmem [thread:$0]  %s8060_s4, 2048, %s70_s25, [#allocation11], %s6801_s2, %s6801_s2, %s6802_s20  }
  0x57   :  { %s6803_s24 = smov [#allocation13]   ;;  %s6730_s30 = scalar_lea.hbm %s8062_s6, 1024 }
  0x58   :  { %s83_s26 = sshll.u32 %s6803_s24, 4  ;;  %p6731_p12 = scmp.ne.s32.totalorder %s8062_s6, %s6730_s30  ;;  %s84_s26 = int_to_ptr.vmem [resolvable:$true] %s83_s26 }
  0x59   :  { %p6734_p13 = scmp.lt.u32.totalorder %s6730_s30, %s8062_s6 }
  0x5b   :  { %p6736_p0 = pnand %p6734_p13, %p6731_p12 }
  0x5d   :  { %6739 = shalt.err (!%p6736_p0)
}
  0x5e   :  { %s6740_s22 = scalar_lea.vmem %s84_s26, 1024  ;;  %p6745_p2 = scmp.lt.s32.totalorder %s84_s26, %s84_s26 }
  0x5f   :  { %p6741_p1 = scmp.ne.s32.totalorder %s84_s26, %s6740_s22  ;;  %p6746_p3 = scmp.lt.s32.totalorder %s6740_s22, %s6740_s22 }
  0x61   :  { %p6747_p4 = por %p6746_p3, %p6745_p2 }
  0x63   :  { %p6748_p5 = pnand %p6747_p4, %p6741_p1 }
  0x65   :  { %6751 = shalt.err (!%p6748_p5)
}
  0x66   :  { %89 = dma.hbm_to_vmem [thread:$0]  %s8062_s6, 1024, %s84_s26, [#allocation14], %s6801_s2, %s6801_s2, %s6802_s20  }
  0x67   :  { %6778 = dma.done.wait [#allocation5], 1024  }
  0x68   :  { %6779 = vsyncadd [#allocation5], 4294966272 }
  0x69   :  { %6780 = dma.done.wait [#allocation8], 8704  }
  0x6a   :  { %6781 = vsyncadd [#allocation8], 4294958592 }
  0x6b   :  { %6782 = dma.done.wait [#allocation11], 10240  }
  0x6c   :  { %6783 = vsyncadd [#allocation11], 4294957056 }
  0x6d   :  { %6784 = dma.done.wait [#allocation14], 1024  }
  0x6e   :  { %6785 = vsyncadd [#allocation14], 4294966272  ;;  %s6926_s10 = smov 0  }
  0x6f LB: > { %v6078_v0 = vld [vmem:[#allocation7 + $0x4] ss:$16 sps:$4 sm:$0xff]   ;;  %v6080_v1 = vld [vmem:[#allocation7 + $0xc] ss:$16 sps:$4 sm:$0xff]   ;;  %v6082_v2 = vld [vmem:[#allocation7] ss:$16 sps:$4 sm:$0xff]   ;;  %s6790_s10 = sphi %s6926_s10, %s116_s10  }
  0x70   : > { %531 = vmatprep.subr.bf16.mxu0 %v6078_v0  ;;  %v6083_v3 = vld [vmem:[#allocation7 + $0x8] ss:$16 sps:$4 sm:$0xff]   ;;  %584 = vmatprep.subr.bf16.mxu1 %v6080_v1  ;;  %v6084_v4 = vld [vmem:[#allocation7 + $0x24] ss:$16 sps:$4 sm:$0xff]   ;;  %v6086_v5 = vld [vmem:[#allocation7 + $0x2c] ss:$16 sps:$4 sm:$0xff]  }
  0x71   : > { %532 = vmatpush1.bf16.msra.mxu0 %v6082_v2  ;;  %585 = vmatpush1.bf16.msra.mxu1 %v6083_v3  ;;  %v6088_v6 = vld [vmem:[#allocation7 + $0x20] ss:$16 sps:$4 sm:$0xff]   ;;  %v6089_v7 = vld [vmem:[#allocation7 + $0x28] ss:$16 sps:$4 sm:$0xff]   ;;  %v6090_v8 = vld [vmem:[#allocation7 + $0x44] ss:$16 sps:$4 sm:$0xff]  }
  0x72   : > { %533 = vmatprep.subr.bf16.mxu0 %v6084_v4  ;;  %586 = vmatprep.subr.bf16.mxu1 %v6086_v5  ;;  %v6092_v9 = vld [vmem:[#allocation7 + $0x4c] ss:$16 sps:$4 sm:$0xff]   ;;  %v6094_v10 = vld [vmem:[#allocation7 + $0x40] ss:$16 sps:$4 sm:$0xff]   ;;  %v6095_v11 = vld [vmem:[#allocation7 + $0x48] ss:$16 sps:$4 sm:$0xff]  }
  0x73   : > { %v6096_v12 = vld [vmem:[#allocation7 + $0x64] ss:$16 sps:$4 sm:$0xff]   ;;  %v6098_v13 = vld [vmem:[#allocation7 + $0x6c] ss:$16 sps:$4 sm:$0xff]   ;;  %v6100_v14 = vld [vmem:[#allocation7 + $0x60] ss:$16 sps:$4 sm:$0xff]  }
  0x74   : > { %v6101_v15 = vld [vmem:[#allocation7 + $0x68] ss:$16 sps:$4 sm:$0xff]   ;;  %v6102_v16 = vld [vmem:[#allocation7 + $0x84] ss:$16 sps:$4 sm:$0xff]   ;;  %v6104_v17 = vld [vmem:[#allocation7 + $0x8c] ss:$16 sps:$4 sm:$0xff]  }
  0x75   : > { %534 = vmatpush1.bf16.msra.mxu0 %v6088_v6  ;;  %587 = vmatpush1.bf16.msra.mxu1 %v6089_v7  ;;  %v6106_v18 = vld [vmem:[#allocation7 + $0x80] ss:$16 sps:$4 sm:$0xff]   ;;  %v6107_v19 = vld [vmem:[#allocation7 + $0x88] ss:$16 sps:$4 sm:$0xff]   ;;  %v6108_v20 = vld [vmem:[#allocation7 + $0xa4] ss:$16 sps:$4 sm:$0xff]  }
  0x76   : > { %535 = vmatprep.subr.bf16.mxu0 %v6090_v8  ;;  %588 = vmatprep.subr.bf16.mxu1 %v6092_v9  ;;  %v6110_v21 = vld [vmem:[#allocation7 + $0xac] ss:$16 sps:$4 sm:$0xff]   ;;  %v6112_v22 = vld [vmem:[#allocation7 + $0xa0] ss:$16 sps:$4 sm:$0xff]   ;;  %v6113_v23 = vld [vmem:[#allocation7 + $0xa8] ss:$16 sps:$4 sm:$0xff]  }
  0x77   : > { %v6114_v24 = vld [vmem:[#allocation7 + $0xc4] ss:$16 sps:$4 sm:$0xff]   ;;  %v6116_v25 = vld [vmem:[#allocation7 + $0xcc] ss:$16 sps:$4 sm:$0xff]   ;;  %v6118_v26 = vld [vmem:[#allocation7 + $0xc0] ss:$16 sps:$4 sm:$0xff]  }
  0x78   : > { %v6119_v27 = vld [vmem:[#allocation7 + $0xc8] ss:$16 sps:$4 sm:$0xff]   ;;  %v6120_v28 = vld [vmem:[#allocation7 + $0xe4] ss:$16 sps:$4 sm:$0xff]   ;;  %v6122_v29 = vld [vmem:[#allocation7 + $0xec] ss:$16 sps:$4 sm:$0xff]  }
  0x79   : > { %536 = vmatpush1.bf16.msra.mxu0 %v6094_v10  ;;  %589 = vmatpush1.bf16.msra.mxu1 %v6095_v11  ;;  %v6124_v30 = vld [vmem:[#allocation7 + $0xe0] ss:$16 sps:$4 sm:$0xff]   ;;  %v6125_v31 = vld [vmem:[#allocation7 + $0xe8] ss:$16 sps:$4 sm:$0xff]   ;;  %v6126_v32 = vld [vmem:[#allocation7 + $0x104] ss:$16 sps:$4 sm:$0xff]  }
  0x7a   : > { %537 = vmatprep.subr.bf16.mxu0 %v6096_v12  ;;  %590 = vmatprep.subr.bf16.mxu1 %v6098_v13  ;;  %v6128_v33 = vld [vmem:[#allocation7 + $0x10c] ss:$16 sps:$4 sm:$0xff]   ;;  %v6130_v34 = vld [vmem:[#allocation7 + $0x100] ss:$16 sps:$4 sm:$0xff]   ;;  %v6131_v35 = vld [vmem:[#allocation7 + $0x108] ss:$16 sps:$4 sm:$0xff]  }
  0x7b   : > { %v6132_v36 = vld [vmem:[#allocation7 + $0x124] ss:$16 sps:$4 sm:$0xff]   ;;  %v6134_v37 = vld [vmem:[#allocation7 + $0x12c] ss:$16 sps:$4 sm:$0xff]   ;;  %v6136_v38 = vld [vmem:[#allocation7 + $0x120] ss:$16 sps:$4 sm:$0xff]  }
  0x7c   : > { %v6137_v39 = vld [vmem:[#allocation7 + $0x128] ss:$16 sps:$4 sm:$0xff]   ;;  %v6138_v40 = vld [vmem:[#allocation7 + $0x144] ss:$16 sps:$4 sm:$0xff]   ;;  %v6140_v41 = vld [vmem:[#allocation7 + $0x14c] ss:$16 sps:$4 sm:$0xff]  }
  0x7d   : > { %538 = vmatpush1.bf16.msra.mxu0 %v6100_v14  ;;  %591 = vmatpush1.bf16.msra.mxu1 %v6101_v15  ;;  %s5231_s6 = sshll.u32 %s6790_s10, 5  ;;  %v6142_v42 = vld [vmem:[#allocation7 + $0x140] ss:$16 sps:$4 sm:$0xff]   ;;  %v6143_v43 = vld [vmem:[#allocation7 + $0x148] ss:$16 sps:$4 sm:$0xff]   ;;  %s116_s10 = sadd.s32 1, %s6790_s10  }
  0x7e   : > { %539 = vmatprep.subr.bf16.mxu0 %v6102_v16  ;;  %592 = vmatprep.subr.bf16.mxu1 %v6104_v17  ;;  %v6144_v44 = vld [vmem:[#allocation7 + $0x164] ss:$16 sps:$4 sm:$0xff]   ;;  %v6146_v45 = vld [vmem:[#allocation7 + $0x16c] ss:$16 sps:$4 sm:$0xff]   ;;  %s6934_s11 = scalar_lea.vmem [#allocation4], %s5231_s6  ;;  %s118_s12 = sshra.s32 %s5231_s6, 3 }
  0x7f   : > { %v6148_v46 = vld [vmem:[#allocation7 + $0x160] ss:$16 sps:$4 sm:$0xff]   ;;  %v6176_v47 = vld [vmem:[%s6934_s11 + $0x4] ss:$8 sps:$4 sm:$0xff]   ;;  %v6149_v48 = vld [vmem:[#allocation7 + $0x168] ss:$16 sps:$4 sm:$0xff]  }
  0x80   : > { %v6150_v49 = vld [vmem:[#allocation7 + $0x184] ss:$16 sps:$4 sm:$0xff]   ;;  %v6152_v50 = vld [vmem:[#allocation7 + $0x18c] ss:$16 sps:$4 sm:$0xff]   ;;  %563 = vmatprep.mubr.bf16.mxu0 %v6176_v47  ;;  %616 = vmatprep.mubr.bf16.mxu1 %v6176_v47  ;;  %v6154_v51 = vld [vmem:[#allocation7 + $0x180] ss:$16 sps:$4 sm:$0xff]  }
  0x81   : > { %540 = vmatpush1.bf16.msra.mxu0 %v6106_v18  ;;  %593 = vmatpush1.bf16.msra.mxu1 %v6107_v19  ;;  %v6155_v52 = vld [vmem:[#allocation7 + $0x188] ss:$16 sps:$4 sm:$0xff]   ;;  %v6156_v53 = vld [vmem:[#allocation7 + $0x1a4] ss:$16 sps:$4 sm:$0xff]   ;;  %v6158_v54 = vld [vmem:[#allocation7 + $0x1ac] ss:$16 sps:$4 sm:$0xff]  }
  0x82   : > { %541 = vmatprep.subr.bf16.mxu0 %v6108_v20  ;;  %594 = vmatprep.subr.bf16.mxu1 %v6110_v21  ;;  %v6160_v55 = vld [vmem:[#allocation7 + $0x1a0] ss:$16 sps:$4 sm:$0xff]   ;;  %v6161_v56 = vld [vmem:[#allocation7 + $0x1a8] ss:$16 sps:$4 sm:$0xff]   ;;  %v6162_v57 = vld [vmem:[#allocation7 + $0x1c4] ss:$16 sps:$4 sm:$0xff]  }
  0x83   : > { %v6164_v58 = vld [vmem:[#allocation7 + $0x1cc] ss:$16 sps:$4 sm:$0xff]   ;;  %v6166_v59 = vld [vmem:[#allocation7 + $0x1c0] ss:$16 sps:$4 sm:$0xff]   ;;  %v6167_v60 = vld [vmem:[#allocation7 + $0x1c8] ss:$16 sps:$4 sm:$0xff]  }
  0x84   : > { %v6168_v61 = vld [vmem:[#allocation7 + $0x1e4] ss:$16 sps:$4 sm:$0xff]   ;;  %v6170_v62 = vld [vmem:[#allocation7 + $0x1ec] ss:$16 sps:$4 sm:$0xff]   ;;  %v6172_v63 = vld [vmem:[#allocation7 + $0x1e0] ss:$16 sps:$4 sm:$0xff]  }
  0x85   : > { %542 = vmatpush1.bf16.msra.mxu0 %v6112_v22  ;;  %595 = vmatpush1.bf16.msra.mxu1 %v6113_v23  ;;  %v6173_v0 = vld [vmem:[#allocation7 + $0x1e8] ss:$16 sps:$4 sm:$0xff]   ;;  %v6177_v2 = vld [vmem:[%s6934_s11 + $0x14] ss:$8 sps:$4 sm:$0xff]   ;;  %s5979_s13 = sshll.u32 %s118_s12, 5  ;;  %p113_p6 = scmp.ge.s32.totalorder %s116_s10, 2  }
  0x86   : > { %543 = vmatprep.subr.bf16.mxu0 %v6114_v24  ;;  %596 = vmatprep.subr.bf16.mxu1 %v6116_v25  ;;  %v6174_v1 = vld [vmem:[%s6934_s11] ss:$8 sps:$4 sm:$0xff]   ;;  %v6179_v3 = vld [vmem:[%s6934_s11 + $0x10] ss:$8 sps:$4 sm:$0xff]   ;;  %s639_s14 = scalar_lea.vmem [#allocation2], %s5979_s13  ;;  %v8065_v22 = vmov (%p113_p6), 0.0|0.0  }
  0x87   :  { %v6945_v20 = vld [vmem:[#allocation10 + $0x4] ss:$16 sps:$4 sm:$0xff] (%p113_p6)   ;;  %v6947_v21 = vld [vmem:[#allocation10] ss:$16 sps:$4 sm:$0xff] (%p113_p6)   ;;  %v7022_v47 = vld [vmem:[#allocation10 + $0xa8] ss:$16 sps:$4 sm:$0xff] (%p113_p6)  }
  0x88   :  { %v6952_v23 = vld [vmem:[#allocation10 + $0x24] ss:$16 sps:$4 sm:$0xff] (%p113_p6)   ;;  %v6955_v24 = vld [vmem:[#allocation10 + $0x20] ss:$16 sps:$4 sm:$0xff] (%p113_p6)   ;;  %s6805_s16 = smov (%p113_p6), [#allocation15]  }
  0x89   : > { %544 = vmatpush1.bf16.msra.mxu0 %v6118_v26  ;;  %597 = vmatpush1.bf16.msra.mxu1 %v6119_v27  ;;  %v6958_v25 = vld [vmem:[#allocation10 + $0x44] ss:$16 sps:$4 sm:$0xff] (%p113_p6)   ;;  %v6960_v26 = vld [vmem:[#allocation10 + $0xc] ss:$16 sps:$4 sm:$0xff] (%p113_p6)   ;;  %v6962_v27 = vld [vmem:[#allocation10 + $0x8] ss:$16 sps:$4 sm:$0xff] (%p113_p6)  }
  0x8a   : > { %545 = vmatprep.subr.bf16.mxu0 %v6120_v28  ;;  %598 = vmatprep.subr.bf16.mxu1 %v6122_v29  ;;  %v6965_v28 = vld [vmem:[#allocation10 + $0x40] ss:$16 sps:$4 sm:$0xff] (%p113_p6)   ;;  %v6969_v29 = vld [vmem:[#allocation10 + $0x64] ss:$16 sps:$4 sm:$0xff] (%p113_p6)   ;;  %s5193_s2 = sshll.u32 (%p113_p6), %s6805_s16, 4  ;;  %s5194_s2 = int_to_ptr.vmem [resolvable:$true] %s5193_s2 }
  0x8b   :  { %p6757_p8 = scmp.lt.s32.totalorder (%p113_p6), %s5194_s2, %s5194_s2 }
  0x8d   : > { %546 = vmatpush1.bf16.msra.mxu0 %v6124_v30  ;;  %599 = vmatpush1.bf16.msra.mxu1 %v6125_v31  ;;  %v6972_v30 = vld [vmem:[#allocation10 + $0x2c] ss:$16 sps:$4 sm:$0xff] (%p113_p6)   ;;  %v6974_v31 = vld [vmem:[#allocation10 + $0x28] ss:$16 sps:$4 sm:$0xff] (%p113_p6)  }
  0x8e   : > { %547 = vmatprep.subr.bf16.mxu0 %v6126_v32  ;;  %600 = vmatprep.subr.bf16.mxu1 %v6128_v33  ;;  %v6978_v32 = vld [vmem:[#allocation10 + $0x60] ss:$16 sps:$4 sm:$0xff] (%p113_p6)   ;;  %v6980_v33 = vld [vmem:[#allocation10 + $0x84] ss:$16 sps:$4 sm:$0xff] (%p113_p6)  }
  0x91   : > { %548 = vmatpush1.bf16.msra.mxu0 %v6130_v34  ;;  %601 = vmatpush1.bf16.msra.mxu1 %v6131_v35  ;;  %v6982_v34 = vld [vmem:[#allocation10 + $0x4c] ss:$16 sps:$4 sm:$0xff] (%p113_p6)   ;;  %v6986_v35 = vld [vmem:[#allocation10 + $0x48] ss:$16 sps:$4 sm:$0xff] (%p113_p6)  }
  0x92   : > { %549 = vmatprep.subr.bf16.mxu0 %v6132_v36  ;;  %602 = vmatprep.subr.bf16.mxu1 %v6134_v37  ;;  %v6989_v36 = vld [vmem:[#allocation10 + $0x6c] ss:$16 sps:$4 sm:$0xff] (%p113_p6)   ;;  %v6992_v37 = vld [vmem:[#allocation10 + $0x80] ss:$16 sps:$4 sm:$0xff] (%p113_p6)  }
  0x95   : > { %550 = vmatpush1.bf16.msra.mxu0 %v6136_v38  ;;  %603 = vmatpush1.bf16.msra.mxu1 %v6137_v39  ;;  %v6995_v38 = vld [vmem:[#allocation10 + $0xa4] ss:$16 sps:$4 sm:$0xff] (%p113_p6)   ;;  %v6998_v39 = vld [vmem:[#allocation10 + $0x68] ss:$16 sps:$4 sm:$0xff] (%p113_p6)  }
  0x96   : > { %551 = vmatprep.subr.bf16.mxu0 %v6138_v40  ;;  %604 = vmatprep.subr.bf16.mxu1 %v6140_v41  ;;  %v7001_v40 = vld [vmem:[#allocation10 + $0x8c] ss:$16 sps:$4 sm:$0xff] (%p113_p6)   ;;  %v7004_v41 = vld [vmem:[#allocation10 + $0xa0] ss:$16 sps:$4 sm:$0xff] (%p113_p6)  }
  0x99   : > { %552 = vmatpush1.bf16.msra.mxu0 %v6142_v42  ;;  %605 = vmatpush1.bf16.msra.mxu1 %v6143_v43  ;;  %v7006_v42 = vld [vmem:[#allocation10 + $0xc4] ss:$16 sps:$4 sm:$0xff] (%p113_p6)   ;;  %v7010_v43 = vld [vmem:[#allocation10 + $0x88] ss:$16 sps:$4 sm:$0xff] (%p113_p6)  }
  0x9a   : > { %553 = vmatprep.subr.bf16.mxu0 %v6144_v44  ;;  %606 = vmatprep.subr.bf16.mxu1 %v6146_v45  ;;  %v7013_v44 = vld [vmem:[#allocation10 + $0xac] ss:$16 sps:$4 sm:$0xff] (%p113_p6)   ;;  %v7016_v45 = vld [vmem:[#allocation10 + $0xc0] ss:$16 sps:$4 sm:$0xff] (%p113_p6)  }
  0x9d   : > { %554 = vmatpush1.bf16.msra.mxu0 %v6148_v46  ;;  %607 = vmatpush1.bf16.msra.mxu1 %v6149_v48  ;;  %v7019_v46 = vld [vmem:[#allocation10 + $0xe4] ss:$16 sps:$4 sm:$0xff] (%p113_p6)   ;;  %v7025_v48 = vld [vmem:[#allocation10 + $0xcc] ss:$16 sps:$4 sm:$0xff] (%p113_p6)  }
  0x9e   : > { %555 = vmatprep.subr.bf16.mxu0 %v6150_v49  ;;  %608 = vmatprep.subr.bf16.mxu1 %v6152_v50  ;;  %v7028_v49 = vld [vmem:[#allocation10 + $0xe0] ss:$16 sps:$4 sm:$0xff] (%p113_p6)   ;;  %v7030_v50 = vld [vmem:[#allocation10 + $0x104] ss:$16 sps:$4 sm:$0xff] (%p113_p6)  }
  0xa1   : > { %556 = vmatpush1.bf16.msra.mxu0 %v6154_v51  ;;  %609 = vmatpush1.bf16.msra.mxu1 %v6155_v52  ;;  %v7034_v51 = vld [vmem:[#allocation10 + $0xc8] ss:$16 sps:$4 sm:$0xff] (%p113_p6)   ;;  %v7037_v52 = vld [vmem:[#allocation10 + $0xec] ss:$16 sps:$4 sm:$0xff] (%p113_p6)  }
  0xa2   : > { %557 = vmatprep.subr.bf16.mxu0 %v6156_v53  ;;  %610 = vmatprep.subr.bf16.mxu1 %v6158_v54  ;;  %v7040_v53 = vld [vmem:[#allocation10 + $0x100] ss:$16 sps:$4 sm:$0xff] (%p113_p6)   ;;  %v7043_v54 = vld [vmem:[#allocation10 + $0x124] ss:$16 sps:$4 sm:$0xff] (%p113_p6)  }
  0xa5   : > { %558 = vmatpush1.bf16.msra.mxu0 %v6160_v55  ;;  %611 = vmatpush1.bf16.msra.mxu1 %v6161_v56  ;;  %v7046_v55 = vld [vmem:[#allocation10 + $0xe8] ss:$16 sps:$4 sm:$0xff] (%p113_p6)   ;;  %v7049_v56 = vld [vmem:[#allocation10 + $0x10c] ss:$16 sps:$4 sm:$0xff] (%p113_p6)  }
  0xa6   : > { %559 = vmatprep.subr.bf16.mxu0 %v6162_v57  ;;  %612 = vmatprep.subr.bf16.mxu1 %v6164_v58  ;;  %v7052_v57 = vld [vmem:[#allocation10 + $0x120] ss:$16 sps:$4 sm:$0xff] (%p113_p6)   ;;  %v7054_v58 = vld [vmem:[#allocation10 + $0x144] ss:$16 sps:$4 sm:$0xff] (%p113_p6)  }
  0xa9   : > { %560 = vmatpush1.bf16.msra.mxu0 %v6166_v59  ;;  %613 = vmatpush1.bf16.msra.mxu1 %v6167_v60  ;;  %v7058_v59 = vld [vmem:[#allocation10 + $0x108] ss:$16 sps:$4 sm:$0xff] (%p113_p6)   ;;  %v7061_v60 = vld [vmem:[#allocation10 + $0x12c] ss:$16 sps:$4 sm:$0xff] (%p113_p6)  }
  0xaa   : > { %561 = vmatprep.subr.bf16.mxu0 %v6168_v61  ;;  %614 = vmatprep.subr.bf16.mxu1 %v6170_v62  ;;  %v7064_v61 = vld [vmem:[#allocation10 + $0x140] ss:$16 sps:$4 sm:$0xff] (%p113_p6)   ;;  %v7066_v62 = vld [vmem:[#allocation10 + $0x164] ss:$16 sps:$4 sm:$0xff] (%p113_p6)  }
  0xad   : > { %562 = vmatpush1.bf16.msra.mxu0 %v6172_v63  ;;  %615 = vmatpush1.bf16.msra.mxu1 %v6173_v0  ;;  %v7070_v63 = vld [vmem:[#allocation10 + $0x128] ss:$16 sps:$4 sm:$0xff] (%p113_p6)   ;;  %v7073_v0 = vld [vmem:[#allocation10 + $0x14c] ss:$16 sps:$4 sm:$0xff] (%p113_p6)  }
  0xae   :  { %1059 = vmatprep.subr.bf16.mxu0 (%p113_p6), %v6945_v20  ;;  %1100 = vmatprep.subr.bf16.mxu1 (%p113_p6), %v6960_v26 }
  0xb0   : > { %564 = vmatmul.mubr.bf16.vlgmr.msra.gmra.mrb[0].mxu0 %v6174_v1  ;;  %617 = vmatmul.mubr.bf16.vlgmr.msra.gmra.mrb[0].mxu1 %v6174_v1  ;;  %v7075_v1 = vld [vmem:[#allocation10 + $0x160] ss:$16 sps:$4 sm:$0xff] (%p113_p6)  }
  0xb1   : > { %573 = vmatprep.mubr.bf16.mxu0 %v6177_v2  ;;  %626 = vmatprep.mubr.bf16.mxu1 %v6177_v2  ;;  %8183 = vst [vmem:[#allocation21_spill] sm:$0xff] (%p113_p6), %v7075_v1  ;;  %v7077_v2 = vld [vmem:[#allocation10 + $0x184] ss:$16 sps:$4 sm:$0xff] (%p113_p6)  }
  0xb2   :  { %1060 = vmatpush1.bf16.msra.mxu0 (%p113_p6), %v6947_v21  ;;  %1101 = vmatpush1.bf16.msra.mxu1 (%p113_p6), %v6962_v27  ;;  %8184 = vst [vmem:[#allocation22_spill] sm:$0xff] (%p113_p6), %v7077_v2 }
  0xb3   :  { %1061 = vmatprep.subr.bf16.mxu0 (%p113_p6), %v6952_v23  ;;  %1102 = vmatprep.subr.bf16.mxu1 (%p113_p6), %v6972_v30 }
  0xb6   :  { %1062 = vmatpush1.bf16.msra.mxu0 (%p113_p6), %v6955_v24  ;;  %1103 = vmatpush1.bf16.msra.mxu1 (%p113_p6), %v6974_v31 }
  0xb7   :  { %1063 = vmatprep.subr.bf16.mxu0 (%p113_p6), %v6958_v25  ;;  %1104 = vmatprep.subr.bf16.mxu1 (%p113_p6), %v6982_v34 }
  0xb8   : > { %574 = vmatmul.mubr.bf16.gmra.mrb[4].mxu0 %v6179_v3  ;;  %627 = vmatmul.mubr.bf16.gmra.mrb[4].mxu1 %v6179_v3  ;;  %v7079_v3 = vld [vmem:[#allocation10 + $0x148] ss:$16 sps:$4 sm:$0xff] (%p113_p6)  }
  0xb9   :  { %1091 = vmatprep.mubr.bf16.mxu0 (%p113_p6), %v8065_v22  ;;  %1132 = vmatprep.mubr.bf16.mxu1 (%p113_p6), %v8065_v22  ;;  %v7133_v22 = vld [vmem:[#allocation10 + $0x1e8] ss:$16 sps:$4 sm:$0xff] (%p113_p6)  }
  0xba   :  { %1064 = vmatpush1.bf16.msra.mxu0 (%p113_p6), %v6965_v28  ;;  %1105 = vmatpush1.bf16.msra.mxu1 (%p113_p6), %v6986_v35  ;;  %8200 = vst [vmem:[#allocation38_spill] sm:$0xff] (%p113_p6), %v7133_v22 }
  0xbb   :  { %1065 = vmatprep.subr.bf16.mxu0 (%p113_p6), %v6969_v29  ;;  %1106 = vmatprep.subr.bf16.mxu1 (%p113_p6), %v6989_v36 }
  0xbe   :  { %1066 = vmatpush1.bf16.msra.mxu0 (%p113_p6), %v6978_v32  ;;  %1107 = vmatpush1.bf16.msra.mxu1 (%p113_p6), %v6998_v39 }
  0xbf   :  { %1067 = vmatprep.subr.bf16.mxu0 (%p113_p6), %v6980_v33  ;;  %1108 = vmatprep.subr.bf16.mxu1 (%p113_p6), %v7001_v40 }
  0xc2   :  { %1068 = vmatpush1.bf16.msra.mxu0 (%p113_p6), %v6992_v37  ;;  %1109 = vmatpush1.bf16.msra.mxu1 (%p113_p6), %v7010_v43 }
  0xc3   :  { %1069 = vmatprep.subr.bf16.mxu0 (%p113_p6), %v6995_v38  ;;  %1110 = vmatprep.subr.bf16.mxu1 (%p113_p6), %v7013_v44 }
  0xc6   :  { %1070 = vmatpush1.bf16.msra.mxu0 (%p113_p6), %v7004_v41  ;;  %1111 = vmatpush1.bf16.msra.mxu1 (%p113_p6), %v7022_v47 }
  0xc7   :  { %1071 = vmatprep.subr.bf16.mxu0 (%p113_p6), %v7006_v42  ;;  %1112 = vmatprep.subr.bf16.mxu1 (%p113_p6), %v7025_v48 }
  0xca   :  { %1072 = vmatpush1.bf16.msra.mxu0 (%p113_p6), %v7016_v45  ;;  %1113 = vmatpush1.bf16.msra.mxu1 (%p113_p6), %v7034_v51 }
  0xcb   :  { %1073 = vmatprep.subr.bf16.mxu0 (%p113_p6), %v7019_v46  ;;  %1114 = vmatprep.subr.bf16.mxu1 (%p113_p6), %v7037_v52 }
  0xce   :  { %1074 = vmatpush1.bf16.msra.mxu0 (%p113_p6), %v7028_v49  ;;  %1115 = vmatpush1.bf16.msra.mxu1 (%p113_p6), %v7046_v55 }
  0xcf   :  { %1075 = vmatprep.subr.bf16.mxu0 (%p113_p6), %v7030_v50  ;;  %1116 = vmatprep.subr.bf16.mxu1 (%p113_p6), %v7049_v56 }
  0xd2   :  { %1076 = vmatpush1.bf16.msra.mxu0 (%p113_p6), %v7040_v53  ;;  %1117 = vmatpush1.bf16.msra.mxu1 (%p113_p6), %v7058_v59 }
  0xd3   :  { %1077 = vmatprep.subr.bf16.mxu0 (%p113_p6), %v7043_v54  ;;  %1118 = vmatprep.subr.bf16.mxu1 (%p113_p6), %v7061_v60 }
  0xd6   :  { %1078 = vmatpush1.bf16.msra.mxu0 (%p113_p6), %v7052_v57  ;;  %1119 = vmatpush1.bf16.msra.mxu1 (%p113_p6), %v7070_v63 }
  0xd7   :  { %1079 = vmatprep.subr.bf16.mxu0 (%p113_p6), %v7054_v58  ;;  %1120 = vmatprep.subr.bf16.mxu1 (%p113_p6), %v7073_v0 }
  0xda   :  { %1080 = vmatpush1.bf16.msra.mxu0 (%p113_p6), %v7064_v61  ;;  %1121 = vmatpush1.bf16.msra.mxu1 (%p113_p6), %v7079_v3 }
  0xdb   :  { %1081 = vmatprep.subr.bf16.mxu0 (%p113_p6), %v7066_v62 }
  0xde   :  { %1082 = vmatpush1.bf16.msra.mxu0 (%p113_p6), %v7075_v1 }
  0xdf   :  { %1083 = vmatprep.subr.bf16.mxu0 (%p113_p6), %v7077_v2 }
 0x183   : > { %v565_v4 = vpop.f32.mrb[0].mxu0  ;;  %v618_v5 = vpop.f32.mrb[0].mxu1 }
 0x184   : > { %640 = vst [vmem:[%s639_s14] sm:$0xff] %v565_v4  ;;  %642 = vst [vmem:[%s639_s14 + $0x10] sm:$0xff] %v618_v5  ;;  %v567_v6 = vpop.f32.mrb[1].mxu0  ;;  %v620_v7 = vpop.f32.mrb[1].mxu1  ;;  %v7082_v4 = vld [vmem:[#allocation10 + $0x16c] ss:$16 sps:$4 sm:$0xff] (%p113_p6)  }
 0x185   : > { %641 = vst [vmem:[%s639_s14 + $0x8] sm:$0xff] %v567_v6  ;;  %643 = vst [vmem:[%s639_s14 + $0x18] sm:$0xff] %v620_v7  ;;  %v569_v8 = vpop.f32.mrb[2].mxu0  ;;  %v622_v9 = vpop.f32.mrb[2].mxu1  ;;  %v7086_v5 = vld [vmem:[#allocation10 + $0x180] ss:$16 sps:$4 sm:$0xff] (%p113_p6)   ;;  %1122 = vmatprep.subr.bf16.mxu1 (%p113_p6), %v7082_v4 }
 0x186   : > { %644 = vst [vmem:[%s639_s14 + $0x20] sm:$0xff] %v569_v8  ;;  %646 = vst [vmem:[%s639_s14 + $0x30] sm:$0xff] %v622_v9  ;;  %v571_v10 = vpop.f32.mrb[3].mxu0  ;;  %v624_v11 = vpop.f32.mrb[3].mxu1  ;;  %v7089_v6 = vld [vmem:[#allocation10 + $0x1a4] ss:$16 sps:$4 sm:$0xff] (%p113_p6)   ;;  %1084 = vmatpush1.bf16.msra.mxu0 (%p113_p6), %v7086_v5 }
 0x187   : > { %645 = vst [vmem:[%s639_s14 + $0x28] sm:$0xff] %v571_v10  ;;  %647 = vst [vmem:[%s639_s14 + $0x38] sm:$0xff] %v624_v11  ;;  %v7091_v7 = vld [vmem:[#allocation10 + $0x168] ss:$16 sps:$4 sm:$0xff] (%p113_p6)   ;;  %v7094_v8 = vld [vmem:[#allocation10 + $0x18c] ss:$16 sps:$4 sm:$0xff] (%p113_p6)   ;;  %1085 = vmatprep.subr.bf16.mxu0 (%p113_p6), %v7089_v6 }
 0x188   :  { %8185 = vst [vmem:[#allocation23_spill] sm:$0xff] (%p113_p6), %v7086_v5  ;;  %8186 = vst [vmem:[#allocation24_spill] sm:$0xff] (%p113_p6), %v7089_v6  ;;  %v7098_v9 = vld [vmem:[#allocation10 + $0x1a0] ss:$16 sps:$4 sm:$0xff] (%p113_p6)   ;;  %v7101_v10 = vld [vmem:[#allocation10 + $0x1c4] ss:$16 sps:$4 sm:$0xff] (%p113_p6)   ;;  %1123 = vmatpush1.bf16.msra.mxu1 (%p113_p6), %v7091_v7 }
 0x189   :  { %115 = sbr.rel (!%p113_p6) target bundleno = 111 (0x6f), region = 101  ;;  %8187 = vst [vmem:[#allocation25_spill] sm:$0xff] (%p113_p6), %v7091_v7  ;;  %8188 = vst [vmem:[#allocation26_spill] sm:$0xff] (%p113_p6), %v7094_v8  ;;  %v7103_v11 = vld [vmem:[#allocation10 + $0x188] ss:$16 sps:$4 sm:$0xff] (%p113_p6)   ;;  %1124 = vmatprep.subr.bf16.mxu1 (%p113_p6), %v7094_v8 }
 0x18a   :  { %8189 = vst [vmem:[#allocation27_spill] sm:$0xff] (%p113_p6), %v7098_v9  ;;  %8190 = vst [vmem:[#allocation28_spill] sm:$0xff] (%p113_p6), %v7101_v10  ;;  %1086 = vmatpush1.bf16.msra.mxu0 (%p113_p6), %v7098_v9 }
 0x18b   : > { %v575_v12 = vpop.f32.mrb[4].mxu0  ;;  %v628_v13 = vpop.f32.mrb[4].mxu1  ;;  %8191 = vst [vmem:[#allocation29_spill] sm:$0xff] (%p113_p6), %v7103_v11  ;;  %1087 = vmatprep.subr.bf16.mxu0 (%p113_p6), %v7101_v10 }
 0x18c   : > { %648 = vst [vmem:[%s639_s14 + $0x40] sm:$0xff] %v575_v12  ;;  %650 = vst [vmem:[%s639_s14 + $0x50] sm:$0xff] %v628_v13  ;;  %v577_v14 = vpop.f32.mrb[5].mxu0  ;;  %v630_v15 = vpop.f32.mrb[5].mxu1  ;;  %v7106_v12 = vld [vmem:[#allocation10 + $0x1ac] ss:$16 sps:$4 sm:$0xff] (%p113_p6)   ;;  %1125 = vmatpush1.bf16.msra.mxu1 (%p113_p6), %v7103_v11 }
 0x18d   : > { %649 = vst [vmem:[%s639_s14 + $0x48] sm:$0xff] %v577_v14  ;;  %651 = vst [vmem:[%s639_s14 + $0x58] sm:$0xff] %v630_v15  ;;  %v579_v16 = vpop.f32.mrb[6].mxu0  ;;  %v632_v17 = vpop.f32.mrb[6].mxu1  ;;  %v7110_v13 = vld [vmem:[#allocation10 + $0x1c0] ss:$16 sps:$4 sm:$0xff] (%p113_p6)   ;;  %1126 = vmatprep.subr.bf16.mxu1 (%p113_p6), %v7106_v12 }
 0x18e   : > { %652 = vst [vmem:[%s639_s14 + $0x60] sm:$0xff] %v579_v16  ;;  %654 = vst [vmem:[%s639_s14 + $0x70] sm:$0xff] %v632_v17  ;;  %v581_v18 = vpop.f32.mrb[7].mxu0  ;;  %v634_v19 = vpop.f32.mrb[7].mxu1  ;;  %v7113_v14 = vld [vmem:[#allocation10 + $0x1e4] ss:$16 sps:$4 sm:$0xff] (%p113_p6)   ;;  %1088 = vmatpush1.bf16.msra.mxu0 (%p113_p6), %v7110_v13 }
 0x18f   : > { %653 = vst [vmem:[%s639_s14 + $0x68] sm:$0xff] %v581_v18  ;;  %655 = vst [vmem:[%s639_s14 + $0x78] sm:$0xff] %v634_v19  ;;  %v7115_v15 = vld [vmem:[#allocation10 + $0x1a8] ss:$16 sps:$4 sm:$0xff] (%p113_p6)   ;;  %v7118_v16 = vld [vmem:[#allocation10 + $0x1cc] ss:$16 sps:$4 sm:$0xff] (%p113_p6)   ;;  %1089 = vmatprep.subr.bf16.mxu0 (%p113_p6), %v7113_v14 }
 0x190   :  { %8192 = vst [vmem:[#allocation30_spill] sm:$0xff] %v7106_v12  ;;  %8193 = vst [vmem:[#allocation31_spill] sm:$0xff] %v7110_v13  ;;  %v7122_v17 = vld [vmem:[#allocation10 + $0x1e0] ss:$16 sps:$4 sm:$0xff]   ;;  %v7125_v18 = vld [vmem:[#allocation10 + $0x1c8] ss:$16 sps:$4 sm:$0xff]   ;;  %1127 = vmatpush1.bf16.msra.mxu1 %v7115_v15 }
 0x191   :  { %8194 = vst [vmem:[#allocation32_spill] sm:$0xff] %v7113_v14  ;;  %8195 = vst [vmem:[#allocation33_spill] sm:$0xff] %v7115_v15  ;;  %v7128_v19 = vld [vmem:[#allocation10 + $0x1ec] ss:$16 sps:$4 sm:$0xff]   ;;  %1128 = vmatprep.subr.bf16.mxu1 %v7118_v16  ;;  %v8201_v12 = vmov 0.0|0.0  }
 0x192   :  { %8196 = vst [vmem:[#allocation34_spill] sm:$0xff] %v7118_v16  ;;  %8197 = vst [vmem:[#allocation35_spill] sm:$0xff] %v7122_v17  ;;  %1090 = vmatpush1.bf16.msra.mxu0 %v7122_v17 }
 0x193   :  { %8198 = vst [vmem:[#allocation36_spill] sm:$0xff] %v7125_v18  ;;  %8199 = vst [vmem:[#allocation37_spill] sm:$0xff] %v7128_v19  ;;  %1581 = vmatprep.subr.bf16.mxu0 %v6945_v20 }
 0x194   :  { %1129 = vmatpush1.bf16.msra.mxu1 %v7125_v18 }
 0x195   :  { %1130 = vmatprep.subr.bf16.mxu1 %v7128_v19  ;;  %1092 = vmatmul.mubr.bf16.vlgmr.msra.gmra.mrb[0].mxu0 %v8201_v12 }
 0x196   :  { %1582 = vmatpush1.bf16.msra.mxu0 %v6947_v21 }
 0x197   :  { %1583 = vmatprep.subr.bf16.mxu0 %v6952_v23 }
 0x198   :  { %1131 = vmatpush1.bf16.msra.mxu1 %v7133_v22 }
 0x199   :  { %1622 = vmatprep.subr.bf16.mxu1 %v6960_v26 }
 0x19a   :  { %1584 = vmatpush1.bf16.msra.mxu0 %v6955_v24 }
 0x19b   :  { %1133 = vmatmul.mubr.bf16.vlgmr.msra.gmra.mrb[0].mxu1 %v8201_v12  ;;  %1585 = vmatprep.subr.bf16.mxu0 %v6958_v25  ;;  %v8202_v12 = vld [vmem:[#allocation30_spill] sm:$0xff] }
 0x19c   :  { %1623 = vmatpush1.bf16.msra.mxu1 %v6962_v27 }
 0x19d   :  { %1624 = vmatprep.subr.bf16.mxu1 %v6972_v30 }
 0x19e   :  { %1586 = vmatpush1.bf16.msra.mxu0 %v6965_v28 }
 0x19f   :  { %1587 = vmatprep.subr.bf16.mxu0 %v6969_v29 }
 0x1a0   :  { %1625 = vmatpush1.bf16.msra.mxu1 %v6974_v31 }
 0x1a1   :  { %1626 = vmatprep.subr.bf16.mxu1 %v6982_v34 }
 0x1a2   :  { %1588 = vmatpush1.bf16.msra.mxu0 %v6978_v32 }
 0x1a3   :  { %1589 = vmatprep.subr.bf16.mxu0 %v6980_v33 }
 0x1a4   :  { %1627 = vmatpush1.bf16.msra.mxu1 %v6986_v35 }
 0x1a5   :  { %1628 = vmatprep.subr.bf16.mxu1 %v6989_v36 }
 0x1a6   :  { %1590 = vmatpush1.bf16.msra.mxu0 %v6992_v37 }
 0x1a7   :  { %1591 = vmatprep.subr.bf16.mxu0 %v6995_v38 }
 0x1a8   :  { %1629 = vmatpush1.bf16.msra.mxu1 %v6998_v39 }
 0x1a9   :  { %1630 = vmatprep.subr.bf16.mxu1 %v7001_v40 }
 0x1aa   :  { %1592 = vmatpush1.bf16.msra.mxu0 %v7004_v41 }
 0x1ab   :  { %1593 = vmatprep.subr.bf16.mxu0 %v7006_v42 }
 0x1ac   :  { %1631 = vmatpush1.bf16.msra.mxu1 %v7010_v43 }
 0x1ad   :  { %1632 = vmatprep.subr.bf16.mxu1 %v7013_v44 }
 0x1ae   :  { %1594 = vmatpush1.bf16.msra.mxu0 %v7016_v45 }
 0x1af   :  { %1595 = vmatprep.subr.bf16.mxu0 %v7019_v46 }
 0x1b0   :  { %1633 = vmatpush1.bf16.msra.mxu1 %v7022_v47 }
 0x1b1   :  { %1634 = vmatprep.subr.bf16.mxu1 %v7025_v48 }
 0x1b2   :  { %1596 = vmatpush1.bf16.msra.mxu0 %v7028_v49 }
 0x1b3   :  { %1597 = vmatprep.subr.bf16.mxu0 %v7030_v50 }
 0x1b4   :  { %1635 = vmatpush1.bf16.msra.mxu1 %v7034_v51 }
 0x1b5   :  { %1636 = vmatprep.subr.bf16.mxu1 %v7037_v52 }
 0x1b6   :  { %1598 = vmatpush1.bf16.msra.mxu0 %v7040_v53 }
 0x1b7   :  { %1599 = vmatprep.subr.bf16.mxu0 %v7043_v54 }
 0x1b8   :  { %1637 = vmatpush1.bf16.msra.mxu1 %v7046_v55 }
 0x1b9   :  { %1638 = vmatprep.subr.bf16.mxu1 %v7049_v56 }
 0x1ba   :  { %1600 = vmatpush1.bf16.msra.mxu0 %v7052_v57 }
 0x1bb   :  { %1601 = vmatprep.subr.bf16.mxu0 %v7054_v58 }
 0x1bc   :  { %1639 = vmatpush1.bf16.msra.mxu1 %v7058_v59 }
 0x1bd   :  { %1640 = vmatprep.subr.bf16.mxu1 %v7061_v60 }
 0x1be   :  { %1602 = vmatpush1.bf16.msra.mxu0 %v7064_v61 }
 0x1bf   :  { %1603 = vmatprep.subr.bf16.mxu0 %v7066_v62 }
 0x1c0   :  { %1641 = vmatpush1.bf16.msra.mxu1 %v7070_v63 }
 0x1c1   :  { %1642 = vmatprep.subr.bf16.mxu1 %v7073_v0 }
 0x1c2   :  { %1604 = vmatpush1.bf16.msra.mxu0 %v7075_v1 }
 0x1c3   :  { %1605 = vmatprep.subr.bf16.mxu0 %v7077_v2  ;;  %v665_v2 = vld [vmem:[#allocation2 + $0x10] sm:$0xff] }
 0x1c4   :  { %1643 = vmatpush1.bf16.msra.mxu1 %v7079_v3 }
 0x1c5   :  { %1644 = vmatprep.subr.bf16.mxu1 %v7082_v4 }
 0x1c6   :  { %1606 = vmatpush1.bf16.msra.mxu0 %v7086_v5 }
 0x1c7   :  { %1607 = vmatprep.subr.bf16.mxu0 %v7089_v6 }
 0x1c8   :  { %1645 = vmatpush1.bf16.msra.mxu1 %v7091_v7  ;;  %v7216_v7 = vld [vmem:[#allocation9 + $0x10] sm:$0xff] }
 0x1c9   :  { %1646 = vmatprep.subr.bf16.mxu1 %v7094_v8  ;;  %v673_v1 = vadd.f32 %v7216_v7, %v665_v2  ;;  %v656_v2 = vlaneseq }
 0x1ca   :  { %1608 = vmatpush1.bf16.msra.mxu0 %v7098_v9  ;;  %v7209_v9 = vld [vmem:[#allocation9 + $0x8] sm:$0xff] }
 0x1cb   :  { %1609 = vmatprep.subr.bf16.mxu0 %v7101_v10  ;;  %v663_v10 = vld [vmem:[#allocation2] sm:$0xff]  ;;  %8204 = vst [vmem:[#allocation40_spill] sm:$0xff] %v7209_v9 }
 0x1cc   :  { %1647 = vmatpush1.bf16.msra.mxu1 %v7103_v11 }
 0x1cd   :  { %1648 = vmatprep.subr.bf16.mxu1 %v8202_v12  ;;  %v7213_v12 = vld [vmem:[#allocation9 + $0x18] sm:$0xff] }
 0x1ce   :  { %1610 = vmatpush1.bf16.msra.mxu0 %v7110_v13  ;;  %v7207_v13 = vld [vmem:[#allocation9] sm:$0xff]  ;;  %8205 = vst [vmem:[#allocation41_spill] sm:$0xff] %v7213_v12 }
 0x1cf   :  { %1611 = vmatprep.subr.bf16.mxu0 %v7113_v14  ;;  %8203 = vst [vmem:[#allocation39_spill] sm:$0xff] %v7207_v13  ;;  %v671_v14 = vadd.f32 %v7207_v13, %v663_v10 }
 0x1d0   :  { %1649 = vmatpush1.bf16.msra.mxu1 %v7115_v15  ;;  %v664_v15 = vld [vmem:[#allocation2 + $0x8] sm:$0xff] }
 0x1d1   :  { %1650 = vmatprep.subr.bf16.mxu1 %v7118_v16 }
 0x1d2   :  { %1612 = vmatpush1.bf16.msra.mxu0 %v7122_v17  ;;  %v672_v17 = vadd.f32 %v7209_v9, %v664_v15 }
 0x1d3   :  { %2103 = vmatprep.subr.bf16.mxu0 %v6945_v20 }
 0x1d4   :  { %1651 = vmatpush1.bf16.msra.mxu1 %v7125_v18  ;;  %v666_v18 = vld [vmem:[#allocation2 + $0x18] sm:$0xff] }
 0x1d5   :  { %1652 = vmatprep.subr.bf16.mxu1 %v7128_v19  ;;  %v674_v5 = vadd.f32 %v7213_v12, %v666_v18 }
 0x1d8   :  { %1653 = vmatpush1.bf16.msra.mxu1 %v7133_v22 }
 0x1d9   :  { %2144 = vmatprep.subr.bf16.mxu1 %v6960_v26 }
 0x268   :  { %v1093_v16 = vpop.f32.mrb[0].mxu0 }
 0x269   :  { %v1141_v20 = vadd.f32 %v1093_v16, %v671_v14  ;;  %v1095_v19 = vpop.f32.mrb[1].mxu0 }
 0x26a   :  { %v1142_v6 = vadd.f32 %v1095_v19, %v672_v17  ;;  %v1097_v22 = vpop.f32.mrb[2].mxu0 }
 0x26b   :  { %v5368_v11 = vmul.f32 -1.442695, %v1141_v20  ;;  %v1098_v26 = vpop.f32.mrb[3].mxu0 }
 0x26c   :  { %v5369_v8 = vmul.f32 -1.442695, %v1142_v6 }
 0x26d   :  { %6492 = vpow2.f32 %v5368_v11 }
 0x26e   :  { %v1134_v10 = vpop.f32.mrb[0].mxu1  ;;  %6494 = vpow2.f32 %v5369_v8 }
 0x26f   :  { %v1136_v15 = vpop.f32.mrb[1].mxu1  ;;  %v1143_v17 = vadd.f32 %v1134_v10, %v673_v1  ;;  %v657_v1 = vshrl.u32 %v656_v2, 7 }
 0x270   :  { %v1144_v9 = vadd.f32 %v1136_v15, %v674_v5  ;;  %v1138_v13 = vpop.f32.mrb[2].mxu1 }
 0x271   :  { %v1139_v14 = vpop.f32.mrb[3].mxu1  ;;  %vm658_vm0 = vcmp.lt.s32.totalorder %v657_v1, 4 }
 0x272   :  { %v5370_v16 = vmul.f32 -1.442695, %v1144_v9  ;;  %vm5435_vm1 = vmneg %vm658_vm0 }
 0x273   :  { %vm7224_vm2 = vmpackc.low %vm5435_vm1, %vm5435_vm1 }
 0x274   :  { %6496 = vpow2.f32 %v5370_v16  ;;  %vm7230_vm3 = vmpackc.low %vm658_vm0, %vm658_vm0  ;;  %v6474_v16 = vld [vmem:[#allocation12 + $0x58] sm:$0xff]  }
 0x275   :  { %6498 = vtanh.f32 %v1143_v17  ;;  %v6478_v17 = vld [vmem:[#allocation12 + $0x68] sm:$0xff]  }
 0x277   :  { %v6493_v22 = vpop.eup %6492 }
 0x278   :  { %v6495_v19 = vpop.eup %6494  ;;  %v1148_v20 = vadd.f32 1.0, %v6493_v22 }
 0x279   :  { %v1154_v6 = vadd.f32 1.0, %v6495_v19 }
 0x27a   :  { %6500 = vrcp.f32 %v1148_v20 }
 0x27b   :  { %6502 = vrcp.f32 %v1154_v6 }
 0x27e   :  { %v6497_v11 = vpop.eup %6496 }
 0x27f   :  { %v6499_v18 = vpop.eup %6498  ;;  %v1161_v8 = vadd.f32 1.0, %v6497_v11 }
 0x281   :  { %6504 = vrcp.f32 %v1161_v8 }
 0x284   :  { %v6501_v26 = vpop.eup %6500 }
 0x285   :  { %v6503_v12 = vpop.eup %6502  ;;  %v1165_v5 = vmul.f32 %v6501_v26, %v6499_v18 }
 0x286   :  { %v1164_v13 = vmul.f32 0.0, %v6503_v12 }
 0x288   :  { %v7219_v15 = vadd.f32 %v1165_v5, %v1164_v13 }
 0x28a   :  { %6506 = vtanh.f32 %v7219_v15 }
 0x28b   :  { %v6505_v9 = vpop.eup %6504 }
 0x294   :  { %v6507_v10 = vpop.eup %6506 }
 0x295   :  { %v7222_v14 = vmul.f32 %v6507_v10, %v6505_v9 }
 0x297   :  { %8206 = vst [vmem:[#allocation42_spill] sm:$0xff] %v7222_v14  ;;  %v5438_v12 = vpack.c.bf16 %v7222_v14, %v7222_v14  ;;  %v7490_v14 = vld [vmem:[#allocation10 + $0x1c4] ss:$16 sps:$4 sm:$0xff]  }
 0x299   :  { %5439 = vmatprep.mubr.msk.bf16.mxu0 %vm7224_vm2, %v5438_v12  ;;  %5447 = vmatprep.mubr.msk.bf16.mxu1 %vm7224_vm2, %v5438_v12 }
 0x29a   :  { %5442 = vmatmul.mubr.msk.bf16.vlgmr.msra.gmra.mrb[4].mxu0 %vm7230_vm3, %v5438_v12  ;;  %5450 = vmatmul.mubr.msk.bf16.vlgmr.msra.gmra.mrb[4].mxu1 %vm7230_vm3, %v5438_v12 }
 0x29b   :  { %2104 = vmatpush1.bf16.msra.mxu0 %v6947_v21  ;;  %2145 = vmatpush1.bf16.msra.mxu1 %v6962_v27  ;;  %v8211_v21 = vld [vmem:[#allocation21_spill] sm:$0xff]  ;;  %v8215_v27 = vld [vmem:[#allocation23_spill] sm:$0xff] }
 0x29c   :  { %2105 = vmatprep.subr.bf16.mxu0 %v6952_v23  ;;  %2146 = vmatprep.subr.bf16.mxu1 %v6972_v30  ;;  %v8212_v23 = vld [vmem:[#allocation25_spill] sm:$0xff]  ;;  %v8218_v30 = vld [vmem:[#allocation30_spill] sm:$0xff] }
 0x29f   :  { %2106 = vmatpush1.bf16.msra.mxu0 %v6955_v24  ;;  %2147 = vmatpush1.bf16.msra.mxu1 %v6974_v31  ;;  %v8213_v24 = vld [vmem:[#allocation22_spill] sm:$0xff]  ;;  %v8219_v31 = vld [vmem:[#allocation27_spill] sm:$0xff] }
 0x2a0   :  { %2107 = vmatprep.subr.bf16.mxu0 %v6958_v25  ;;  %2148 = vmatprep.subr.bf16.mxu1 %v6982_v34  ;;  %v8214_v25 = vld [vmem:[#allocation26_spill] sm:$0xff] }
 0x2a1   :  { %v8222_v34 = vld [vmem:[#allocation34_spill] sm:$0xff] }
 0x2a3   :  { %2108 = vmatpush1.bf16.msra.mxu0 %v6965_v28  ;;  %2149 = vmatpush1.bf16.msra.mxu1 %v6986_v35  ;;  %v8216_v28 = vld [vmem:[#allocation29_spill] sm:$0xff]  ;;  %v8223_v35 = vld [vmem:[#allocation31_spill] sm:$0xff] }
 0x2a4   :  { %2109 = vmatprep.subr.bf16.mxu0 %v6969_v29  ;;  %2150 = vmatprep.subr.bf16.mxu1 %v6989_v36  ;;  %v8217_v29 = vld [vmem:[#allocation24_spill] sm:$0xff] }
 0x2a5   :  { %v8224_v36 = vld [vmem:[#allocation36_spill] sm:$0xff] }
 0x2a7   :  { %2110 = vmatpush1.bf16.msra.mxu0 %v6978_v32  ;;  %2151 = vmatpush1.bf16.msra.mxu1 %v6998_v39  ;;  %v8220_v32 = vld [vmem:[#allocation33_spill] sm:$0xff]  ;;  %v8227_v39 = vld [vmem:[#allocation35_spill] sm:$0xff] }
 0x2a8   :  { %2111 = vmatprep.subr.bf16.mxu0 %v6980_v33  ;;  %2152 = vmatprep.subr.bf16.mxu1 %v7001_v40  ;;  %v8221_v33 = vld [vmem:[#allocation28_spill] sm:$0xff]  ;;  %v8228_v40 = vld [vmem:[#allocation38_spill] sm:$0xff] }
 0x2ab   :  { %2112 = vmatpush1.bf16.msra.mxu0 %v6992_v37  ;;  %2153 = vmatpush1.bf16.msra.mxu1 %v7010_v43  ;;  %v8225_v37 = vld [vmem:[#allocation32_spill] sm:$0xff]  ;;  %v1185_v43 = vld [vmem:[#allocation2 + $0x20] sm:$0xff] }
 0x2ac   :  { %2113 = vmatprep.subr.bf16.mxu0 %v6995_v38  ;;  %2154 = vmatprep.subr.bf16.mxu1 %v7013_v44  ;;  %v8226_v38 = vld [vmem:[#allocation37_spill] sm:$0xff]  ;;  %v1186_v44 = vld [vmem:[#allocation2 + $0x28] sm:$0xff] }
 0x2af   :  { %2114 = vmatpush1.bf16.msra.mxu0 %v7004_v41  ;;  %2155 = vmatpush1.bf16.msra.mxu1 %v7022_v47  ;;  %v7304_v41 = vld [vmem:[#allocation10 + $0x4] ss:$16 sps:$4 sm:$0xff]   ;;  %v8232_v47 = vld [vmem:[#allocation40_spill] sm:$0xff] }
 0x2b0   :  { %2115 = vmatprep.subr.bf16.mxu0 %v7006_v42  ;;  %2156 = vmatprep.subr.bf16.mxu1 %v7025_v48  ;;  %8229 = vst [vmem:[#allocation21_spill] sm:$0xff] %v7304_v41  ;;  %v7306_v42 = vld [vmem:[#allocation10 + $0xc] ss:$16 sps:$4 sm:$0xff]   ;;  %v1194_v48 = vadd.f32 %v1186_v44, %v8232_v47  ;;  %v7378_v44 = vld [vmem:[#allocation10 + $0x88] ss:$16 sps:$4 sm:$0xff]  }
 0x2b1   :  { %8230 = vst [vmem:[#allocation25_spill] sm:$0xff] %v7306_v42 }
 0x2b3   :  { %2116 = vmatpush1.bf16.msra.mxu0 %v7016_v45  ;;  %2157 = vmatpush1.bf16.msra.mxu1 %v7034_v51  ;;  %v8231_v45 = vld [vmem:[#allocation39_spill] sm:$0xff] }
 0x2b4   :  { %2117 = vmatprep.subr.bf16.mxu0 %v7019_v46  ;;  %2158 = vmatprep.subr.bf16.mxu1 %v7037_v52  ;;  %v1193_v46 = vadd.f32 %v1185_v43, %v8231_v45  ;;  %v7376_v43 = vld [vmem:[#allocation10 + $0x80] ss:$16 sps:$4 sm:$0xff]  }
 0x2b7   :  { %2118 = vmatpush1.bf16.msra.mxu0 %v7028_v49  ;;  %2159 = vmatpush1.bf16.msra.mxu1 %v7046_v55 }
 0x2b8   :  { %2119 = vmatprep.subr.bf16.mxu0 %v7030_v50  ;;  %2160 = vmatprep.subr.bf16.mxu1 %v7049_v56 }
 0x2bb   :  { %2120 = vmatpush1.bf16.msra.mxu0 %v7040_v53  ;;  %2161 = vmatpush1.bf16.msra.mxu1 %v7058_v59  ;;  %v1188_v53 = vld [vmem:[#allocation2 + $0x38] sm:$0xff] }
 0x2bc   :  { %2121 = vmatprep.subr.bf16.mxu0 %v7043_v54  ;;  %2162 = vmatprep.subr.bf16.mxu1 %v7061_v60 }
 0x2bf   :  { %2122 = vmatpush1.bf16.msra.mxu0 %v7052_v57  ;;  %2163 = vmatpush1.bf16.msra.mxu1 %v7070_v63 }
 0x2c0   :  { %2123 = vmatprep.subr.bf16.mxu0 %v7054_v58  ;;  %2164 = vmatprep.subr.bf16.mxu1 %v7073_v0  ;;  %v1187_v0 = vld [vmem:[#allocation2 + $0x30] sm:$0xff] }
 0x2c3   :  { %2124 = vmatpush1.bf16.msra.mxu0 %v7064_v61  ;;  %2165 = vmatpush1.bf16.msra.mxu1 %v7079_v3 }
 0x2c4   :  { %2125 = vmatprep.subr.bf16.mxu0 %v7066_v62  ;;  %2166 = vmatprep.subr.bf16.mxu1 %v7082_v4  ;;  %v8233_v62 = vld [vmem:[#allocation41_spill] sm:$0xff]  ;;  %v1195_v4 = vadd.f32 %v1187_v0, %v7216_v7 }
 0x2c5   :  { %v1196_v63 = vadd.f32 %v1188_v53, %v8233_v62  ;;  %v7400_v53 = vld [vmem:[#allocation10 + $0xc0] ss:$16 sps:$4 sm:$0xff]   ;;  %v7432_v0 = vld [vmem:[#allocation10 + $0x124] ss:$16 sps:$4 sm:$0xff]   ;;  %8252 = vst [vmem:[#allocation41_spill] sm:$0xff] %v7490_v14 }
 0x2c7   :  { %2126 = vmatpush1.bf16.msra.mxu0 %v8211_v21  ;;  %2167 = vmatpush1.bf16.msra.mxu1 %v8212_v23 }
 0x2c8   :  { %2127 = vmatprep.subr.bf16.mxu0 %v8213_v24  ;;  %2168 = vmatprep.subr.bf16.mxu1 %v8214_v25  ;;  %v7322_v25 = vld [vmem:[#allocation10] ss:$16 sps:$4 sm:$0xff]  }
 0x2cb   :  { %2128 = vmatpush1.bf16.msra.mxu0 %v8215_v27  ;;  %2169 = vmatpush1.bf16.msra.mxu1 %v8216_v28  ;;  %v7324_v27 = vld [vmem:[#allocation10 + $0x8] ss:$16 sps:$4 sm:$0xff]   ;;  %v7326_v28 = vld [vmem:[#allocation10 + $0x24] ss:$16 sps:$4 sm:$0xff]  }
 0x2cc   :  { %2129 = vmatprep.subr.bf16.mxu0 %v8217_v29  ;;  %2170 = vmatprep.subr.bf16.mxu1 %v8218_v30  ;;  %v7328_v29 = vld [vmem:[#allocation10 + $0x2c] ss:$16 sps:$4 sm:$0xff]   ;;  %v7342_v30 = vld [vmem:[#allocation10 + $0x28] ss:$16 sps:$4 sm:$0xff]  }
 0x2cf   :  { %2130 = vmatpush1.bf16.msra.mxu0 %v8219_v31  ;;  %2171 = vmatpush1.bf16.msra.mxu1 %v8220_v32  ;;  %v7346_v31 = vld [vmem:[#allocation10 + $0x44] ss:$16 sps:$4 sm:$0xff]   ;;  %v7348_v32 = vld [vmem:[#allocation10 + $0x4c] ss:$16 sps:$4 sm:$0xff]  }
 0x2d0   :  { %2131 = vmatprep.subr.bf16.mxu0 %v8221_v33  ;;  %2172 = vmatprep.subr.bf16.mxu1 %v8222_v34  ;;  %v7352_v33 = vld [vmem:[#allocation10 + $0x40] ss:$16 sps:$4 sm:$0xff]   ;;  %v7354_v34 = vld [vmem:[#allocation10 + $0x48] ss:$16 sps:$4 sm:$0xff]  }
 0x2d3   :  { %2132 = vmatpush1.bf16.msra.mxu0 %v8223_v35  ;;  %2173 = vmatpush1.bf16.msra.mxu1 %v8224_v36  ;;  %v7358_v35 = vld [vmem:[#allocation10 + $0x64] ss:$16 sps:$4 sm:$0xff]   ;;  %v7360_v36 = vld [vmem:[#allocation10 + $0x6c] ss:$16 sps:$4 sm:$0xff]  }
 0x2d4   :  { %2133 = vmatprep.subr.bf16.mxu0 %v8225_v37  ;;  %2174 = vmatprep.subr.bf16.mxu1 %v8226_v38  ;;  %v7364_v37 = vld [vmem:[#allocation10 + $0x60] ss:$16 sps:$4 sm:$0xff]   ;;  %v7366_v38 = vld [vmem:[#allocation10 + $0x68] ss:$16 sps:$4 sm:$0xff]  }
 0x2d7   :  { %2134 = vmatpush1.bf16.msra.mxu0 %v8227_v39  ;;  %2175 = vmatpush1.bf16.msra.mxu1 %v8228_v40  ;;  %v7372_v39 = vld [vmem:[#allocation10 + $0x84] ss:$16 sps:$4 sm:$0xff]   ;;  %v7374_v40 = vld [vmem:[#allocation10 + $0x8c] ss:$16 sps:$4 sm:$0xff]  }
 0x2d8   :  { %2625 = vmatprep.subr.bf16.mxu0 %v7304_v41  ;;  %2666 = vmatprep.subr.bf16.mxu1 %v7306_v42 }
 0x36d   :  { %v1615_v49 = vpop.f32.mrb[4].mxu0  ;;  %v1656_v50 = vpop.f32.mrb[4].mxu1 }
 0x36e   :  { %v1663_v51 = vadd.f32 %v1615_v49, %v1193_v46  ;;  %v1617_v52 = vpop.f32.mrb[5].mxu0  ;;  %v1658_v54 = vpop.f32.mrb[5].mxu1  ;;  %v1665_v19 = vadd.f32 %v1656_v50, %v1195_v4  ;;  %v7384_v46 = vld [vmem:[#allocation10 + $0xa4] ss:$16 sps:$4 sm:$0xff]   ;;  %v7388_v49 = vld [vmem:[#allocation10 + $0xa0] ss:$16 sps:$4 sm:$0xff]  }
 0x36f   :  { %v1664_v55 = vadd.f32 %v1617_v52, %v1194_v48  ;;  %v1619_v56 = vpop.f32.mrb[6].mxu0  ;;  %v1660_v57 = vpop.f32.mrb[6].mxu1  ;;  %v1666_v3 = vadd.f32 %v1658_v54, %v1196_v63  ;;  %v7386_v48 = vld [vmem:[#allocation10 + $0xac] ss:$16 sps:$4 sm:$0xff]   ;;  %v7390_v50 = vld [vmem:[#allocation10 + $0xa8] ss:$16 sps:$4 sm:$0xff]  }
 0x370   :  { %v5451_v58 = vmul.f32 -1.442695, %v1663_v51  ;;  %v1620_v59 = vpop.f32.mrb[7].mxu0  ;;  %v1661_v60 = vpop.f32.mrb[7].mxu1  ;;  %v7396_v51 = vld [vmem:[#allocation10 + $0xc4] ss:$16 sps:$4 sm:$0xff]  }
 0x371   :  { %v5452_v61 = vmul.f32 -1.442695, %v1664_v55  ;;  %v5453_v22 = vmul.f32 -1.442695, %v1666_v3  ;;  %v7398_v52 = vld [vmem:[#allocation10 + $0xcc] ss:$16 sps:$4 sm:$0xff]  }
 0x372   :  { %6508 = vpow2.f32 %v5451_v58  ;;  %v7402_v54 = vld [vmem:[#allocation10 + $0xc8] ss:$16 sps:$4 sm:$0xff]   ;;  %v7408_v55 = vld [vmem:[#allocation10 + $0xe4] ss:$16 sps:$4 sm:$0xff]   ;;  %v7410_v56 = vld [vmem:[#allocation10 + $0xec] ss:$16 sps:$4 sm:$0xff]  }
 0x373   :  { %6510 = vpow2.f32 %v5452_v61  ;;  %v7412_v57 = vld [vmem:[#allocation10 + $0xe0] ss:$16 sps:$4 sm:$0xff]   ;;  %v7414_v58 = vld [vmem:[#allocation10 + $0xe8] ss:$16 sps:$4 sm:$0xff]   ;;  %v7420_v59 = vld [vmem:[#allocation10 + $0x104] ss:$16 sps:$4 sm:$0xff]  }
 0x374   :  { %6512 = vpow2.f32 %v5453_v22  ;;  %v7422_v60 = vld [vmem:[#allocation10 + $0x10c] ss:$16 sps:$4 sm:$0xff]   ;;  %v7424_v61 = vld [vmem:[#allocation10 + $0x100] ss:$16 sps:$4 sm:$0xff]   ;;  %v7426_v63 = vld [vmem:[#allocation10 + $0x108] ss:$16 sps:$4 sm:$0xff]  }
 0x375   :  { %6514 = vtanh.f32 %v1665_v19  ;;  %v7434_v3 = vld [vmem:[#allocation10 + $0x12c] ss:$16 sps:$4 sm:$0xff]   ;;  %v7436_v4 = vld [vmem:[#allocation10 + $0x120] ss:$16 sps:$4 sm:$0xff]   ;;  %v7438_v22 = vld [vmem:[#allocation10 + $0x128] ss:$16 sps:$4 sm:$0xff]  }
 0x376   :  { %8235 = vst [vmem:[#allocation26_spill] sm:$0xff] %v7438_v22  ;;  %v7444_v19 = vld [vmem:[#allocation10 + $0x144] ss:$16 sps:$4 sm:$0xff]  }
 0x377   :  { %8236 = vst [vmem:[#allocation23_spill] sm:$0xff] %v7444_v19 }
 0x37c   :  { %v6509_v20 = vpop.eup %6508 }
 0x37d   :  { %v6511_v6 = vpop.eup %6510  ;;  %v1670_v11 = vadd.f32 1.0, %v6509_v20  ;;  %v7446_v20 = vld [vmem:[#allocation10 + $0x14c] ss:$16 sps:$4 sm:$0xff]  }
 0x37e   :  { %v1676_v18 = vadd.f32 1.0, %v6511_v6  ;;  %v6513_v26 = vpop.eup %6512  ;;  %8237 = vst [vmem:[#allocation29_spill] sm:$0xff] %v7446_v20  ;;  %v7448_v6 = vld [vmem:[#allocation10 + $0x140] ss:$16 sps:$4 sm:$0xff]  }
 0x37f   :  { %6516 = vrcp.f32 %v1670_v11  ;;  %v6515_v8 = vpop.eup %6514  ;;  %v1683_v1 = vadd.f32 1.0, %v6513_v26  ;;  %8238 = vst [vmem:[#allocation24_spill] sm:$0xff] %v7448_v6  ;;  %v7450_v11 = vld [vmem:[#allocation10 + $0x148] ss:$16 sps:$4 sm:$0xff]   ;;  %v7458_v26 = vld [vmem:[#allocation10 + $0x16c] ss:$16 sps:$4 sm:$0xff]  }
 0x380   :  { %6518 = vrcp.f32 %v1676_v18  ;;  %8239 = vst [vmem:[#allocation30_spill] sm:$0xff] %v7450_v11  ;;  %v7456_v18 = vld [vmem:[#allocation10 + $0x164] ss:$16 sps:$4 sm:$0xff]   ;;  %8241 = vst [vmem:[#allocation33_spill] sm:$0xff] %v7458_v26 }
 0x381   :  { %6520 = vrcp.f32 %v1683_v1  ;;  %8240 = vst [vmem:[#allocation27_spill] sm:$0xff] %v7456_v18  ;;  %v7472_v1 = vld [vmem:[#allocation10 + $0x180] ss:$16 sps:$4 sm:$0xff]  }
 0x382   :  { %8246 = vst [vmem:[#allocation32_spill] sm:$0xff] %v7472_v1 }
 0x389   :  { %v6517_v5 = vpop.eup %6516 }
 0x38a   :  { %v6519_v13 = vpop.eup %6518  ;;  %v1687_v2 = vmul.f32 %v6517_v5, %v6515_v8  ;;  %v7460_v8 = vld [vmem:[#allocation10 + $0x160] ss:$16 sps:$4 sm:$0xff]   ;;  %v7462_v5 = vld [vmem:[#allocation10 + $0x168] ss:$16 sps:$4 sm:$0xff]  }
 0x38b   :  { %v1686_v9 = vmul.f32 %v6519_v13, %v7219_v15  ;;  %v6521_v12 = vpop.eup %6520  ;;  %v7340_v15 = vld [vmem:[#allocation10 + $0x20] ss:$16 sps:$4 sm:$0xff]   ;;  %8242 = vst [vmem:[#allocation28_spill] sm:$0xff] %v7460_v8  ;;  %8243 = vst [vmem:[#allocation34_spill] sm:$0xff] %v7462_v5  ;;  %v7468_v13 = vld [vmem:[#allocation10 + $0x184] ss:$16 sps:$4 sm:$0xff]  }
 0x38c   :  { %8244 = vst [vmem:[#allocation31_spill] sm:$0xff] %v7468_v13 }
 0x38d   :  { %v7315_v10 = vadd.f32 %v1687_v2, %v1686_v9  ;;  %v7470_v2 = vld [vmem:[#allocation10 + $0x18c] ss:$16 sps:$4 sm:$0xff]   ;;  %v7474_v9 = vld [vmem:[#allocation10 + $0x188] ss:$16 sps:$4 sm:$0xff]  }
 0x38e   :  { %8245 = vst [vmem:[#allocation36_spill] sm:$0xff] %v7470_v2  ;;  %8247 = vst [vmem:[#allocation37_spill] sm:$0xff] %v7474_v9 }
 0x38f   :  { %6522 = vtanh.f32 %v7315_v10 }
 0x399   :  { %v6523_v21 = vpop.eup %6522 }
 0x39a   :  { %v7318_v23 = vmul.f32 %v6523_v21, %v6521_v12  ;;  %v7478_v12 = vld [vmem:[#allocation10 + $0x1a4] ss:$16 sps:$4 sm:$0xff]   ;;  %v7480_v21 = vld [vmem:[#allocation10 + $0x1ac] ss:$16 sps:$4 sm:$0xff]  }
 0x39b   :  { %8248 = vst [vmem:[#allocation35_spill] sm:$0xff] %v7478_v12  ;;  %8249 = vst [vmem:[#allocation38_spill] sm:$0xff] %v7480_v21 }
 0x39c   :  { %8234 = vst [vmem:[#allocation22_spill] sm:$0xff] %v7318_v23  ;;  %v5521_v24 = vpack.c.bf16 %v7318_v23, %v7318_v23  ;;  %v7486_v23 = vld [vmem:[#allocation10 + $0x1a8] ss:$16 sps:$4 sm:$0xff]  }
 0x39d   :  { %8251 = vst [vmem:[#allocation40_spill] sm:$0xff] %v7486_v23 }
 0x39e   :  { %5522 = vmatprep.mubr.msk.bf16.mxu0 %vm7224_vm2, %v5521_v24  ;;  %5530 = vmatprep.mubr.msk.bf16.mxu1 %vm7224_vm2, %v5521_v24 }
 0x39f   :  { %5525 = vmatmul.mubr.msk.bf16.vlgmr.msra.gmra.mrb[8].mxu0 %vm7230_vm3, %v5521_v24  ;;  %5533 = vmatmul.mubr.msk.bf16.vlgmr.msra.gmra.mrb[8].mxu1 %vm7230_vm3, %v5521_v24  ;;  %v7484_v24 = vld [vmem:[#allocation10 + $0x1a0] ss:$16 sps:$4 sm:$0xff]  }
 0x3a0   :  { %2626 = vmatpush1.bf16.msra.mxu0 %v7322_v25  ;;  %2667 = vmatpush1.bf16.msra.mxu1 %v7324_v27  ;;  %8250 = vst [vmem:[#allocation39_spill] sm:$0xff] %v7484_v24 }
 0x3a1   :  { %2627 = vmatprep.subr.bf16.mxu0 %v7326_v28  ;;  %2668 = vmatprep.subr.bf16.mxu1 %v7328_v29 }
 0x3a4   :  { %2628 = vmatpush1.bf16.msra.mxu0 %v7340_v15  ;;  %2669 = vmatpush1.bf16.msra.mxu1 %v7342_v30 }
 0x3a5   :  { %2629 = vmatprep.subr.bf16.mxu0 %v7346_v31  ;;  %2670 = vmatprep.subr.bf16.mxu1 %v7348_v32 }
 0x3a8   :  { %2630 = vmatpush1.bf16.msra.mxu0 %v7352_v33  ;;  %2671 = vmatpush1.bf16.msra.mxu1 %v7354_v34 }
 0x3a9   :  { %2631 = vmatprep.subr.bf16.mxu0 %v7358_v35  ;;  %2672 = vmatprep.subr.bf16.mxu1 %v7360_v36 }
 0x3ac   :  { %2632 = vmatpush1.bf16.msra.mxu0 %v7364_v37  ;;  %2673 = vmatpush1.bf16.msra.mxu1 %v7366_v38 }
 0x3ad   :  { %2633 = vmatprep.subr.bf16.mxu0 %v7372_v39  ;;  %2674 = vmatprep.subr.bf16.mxu1 %v7374_v40 }
 0x3b0   :  { %2634 = vmatpush1.bf16.msra.mxu0 %v7376_v43  ;;  %2675 = vmatpush1.bf16.msra.mxu1 %v7378_v44 }
 0x3b1   :  { %2635 = vmatprep.subr.bf16.mxu0 %v7384_v46  ;;  %2676 = vmatprep.subr.bf16.mxu1 %v7386_v48 }
 0x3b4   :  { %2636 = vmatpush1.bf16.msra.mxu0 %v7388_v49  ;;  %2677 = vmatpush1.bf16.msra.mxu1 %v7390_v50 }
 0x3b5   :  { %2637 = vmatprep.subr.bf16.mxu0 %v7396_v51  ;;  %2678 = vmatprep.subr.bf16.mxu1 %v7398_v52 }
 0x3b8   :  { %2638 = vmatpush1.bf16.msra.mxu0 %v7400_v53  ;;  %2679 = vmatpush1.bf16.msra.mxu1 %v7402_v54 }
 0x3b9   :  { %2639 = vmatprep.subr.bf16.mxu0 %v7408_v55  ;;  %2680 = vmatprep.subr.bf16.mxu1 %v7410_v56 }
 0x3bc   :  { %2640 = vmatpush1.bf16.msra.mxu0 %v7412_v57  ;;  %2681 = vmatpush1.bf16.msra.mxu1 %v7414_v58 }
 0x3bd   :  { %2641 = vmatprep.subr.bf16.mxu0 %v7420_v59  ;;  %2682 = vmatprep.subr.bf16.mxu1 %v7422_v60 }
 0x3c0   :  { %2642 = vmatpush1.bf16.msra.mxu0 %v7424_v61  ;;  %2683 = vmatpush1.bf16.msra.mxu1 %v7426_v63 }
 0x3c1   :  { %2643 = vmatprep.subr.bf16.mxu0 %v7432_v0  ;;  %2684 = vmatprep.subr.bf16.mxu1 %v7434_v3 }
 0x3c4   :  { %2644 = vmatpush1.bf16.msra.mxu0 %v7436_v4  ;;  %2685 = vmatpush1.bf16.msra.mxu1 %v7438_v22 }
 0x3c5   :  { %2645 = vmatprep.subr.bf16.mxu0 %v7444_v19  ;;  %2686 = vmatprep.subr.bf16.mxu1 %v7446_v20  ;;  %v1709_v19 = vld [vmem:[#allocation2 + $0x50] sm:$0xff] }
 0x3c8   :  { %2646 = vmatpush1.bf16.msra.mxu0 %v7448_v6  ;;  %2687 = vmatpush1.bf16.msra.mxu1 %v7450_v11 }
 0x3c9   :  { %2647 = vmatprep.subr.bf16.mxu0 %v7456_v18  ;;  %2688 = vmatprep.subr.bf16.mxu1 %v7458_v26  ;;  %v1710_v26 = vld [vmem:[#allocation2 + $0x58] sm:$0xff] }
 0x3cc   :  { %2648 = vmatpush1.bf16.msra.mxu0 %v7460_v8  ;;  %2689 = vmatpush1.bf16.msra.mxu1 %v7462_v5 }
 0x3cd   :  { %2649 = vmatprep.subr.bf16.mxu0 %v7468_v13  ;;  %2690 = vmatprep.subr.bf16.mxu1 %v7470_v2  ;;  %v7492_v13 = vld [vmem:[#allocation10 + $0x1cc] ss:$16 sps:$4 sm:$0xff]   ;;  %v7496_v2 = vld [vmem:[#allocation10 + $0x1c0] ss:$16 sps:$4 sm:$0xff]  }
 0x3ce   :  { %8253 = vst [vmem:[#allocation43_spill] sm:$0xff] %v7492_v13  ;;  %8254 = vst [vmem:[#allocation44_spill] sm:$0xff] %v7496_v2 }
 0x3d0   :  { %2650 = vmatpush1.bf16.msra.mxu0 %v7472_v1  ;;  %2691 = vmatpush1.bf16.msra.mxu1 %v7474_v9  ;;  %v7498_v1 = vld [vmem:[#allocation10 + $0x1c8] ss:$16 sps:$4 sm:$0xff]   ;;  %v7502_v9 = vld [vmem:[#allocation10 + $0x1e4] ss:$16 sps:$4 sm:$0xff]  }
 0x3d1   :  { %2651 = vmatprep.subr.bf16.mxu0 %v7478_v12  ;;  %2692 = vmatprep.subr.bf16.mxu1 %v7480_v21  ;;  %8255 = vst [vmem:[#allocation45_spill] sm:$0xff] %v7498_v1  ;;  %8256 = vst [vmem:[#allocation46_spill] sm:$0xff] %v7502_v9  ;;  %v7504_v12 = vld [vmem:[#allocation10 + $0x1ec] ss:$16 sps:$4 sm:$0xff]   ;;  %v7508_v21 = vld [vmem:[#allocation10 + $0x1e0] ss:$16 sps:$4 sm:$0xff]  }
 0x3d2   :  { %8257 = vst [vmem:[#allocation47_spill] sm:$0xff] %v7504_v12  ;;  %8258 = vst [vmem:[#allocation48_spill] sm:$0xff] %v7508_v21 }
 0x3d4   :  { %2652 = vmatpush1.bf16.msra.mxu0 %v7484_v24  ;;  %2693 = vmatpush1.bf16.msra.mxu1 %v7486_v23  ;;  %v7510_v24 = vld [vmem:[#allocation10 + $0x1e8] ss:$16 sps:$4 sm:$0xff]  }
 0x3d5   :  { %2653 = vmatprep.subr.bf16.mxu0 %v7490_v14  ;;  %2694 = vmatprep.subr.bf16.mxu1 %v7492_v13  ;;  %8259 = vst [vmem:[#allocation49_spill] sm:$0xff] %v7510_v24  ;;  %v1707_v13 = vld [vmem:[#allocation2 + $0x40] sm:$0xff] }
 0x3d8   :  { %2654 = vmatpush1.bf16.msra.mxu0 %v7496_v2  ;;  %2695 = vmatpush1.bf16.msra.mxu1 %v7498_v1  ;;  %v1708_v2 = vld [vmem:[#allocation2 + $0x48] sm:$0xff]  ;;  %v1715_v1 = vadd.f32 %v1707_v13, %v8231_v45 }
 0x3d9   :  { %2655 = vmatprep.subr.bf16.mxu0 %v7502_v9  ;;  %2696 = vmatprep.subr.bf16.mxu1 %v7504_v12  ;;  %v1716_v14 = vadd.f32 %v1708_v2, %v8232_v47  ;;  %v1717_v47 = vadd.f32 %v1709_v19, %v7216_v7 }
 0x3dc   :  { %2656 = vmatpush1.bf16.msra.mxu0 %v7508_v21  ;;  %2697 = vmatpush1.bf16.msra.mxu1 %v7510_v24 }
 0x3dd   :  { %3147 = vmatprep.subr.bf16.mxu0 %v7304_v41  ;;  %3188 = vmatprep.subr.bf16.mxu1 %v7306_v42  ;;  %v1718_v42 = vadd.f32 %v1710_v26, %v8233_v62 }
 0x472   :  { %v2137_v23 = vpop.f32.mrb[8].mxu0  ;;  %v2178_v5 = vpop.f32.mrb[8].mxu1 }
 0x473   :  { %v2185_v8 = vadd.f32 %v2137_v23, %v1715_v1  ;;  %v2139_v9 = vpop.f32.mrb[9].mxu0  ;;  %v2180_v12 = vpop.f32.mrb[9].mxu1  ;;  %v2187_v23 = vadd.f32 %v2178_v5, %v1717_v47  ;;  %v8262_v5 = vld [vmem:[#allocation23_spill] sm:$0xff]  ;;  %v8268_v47 = vld [vmem:[#allocation28_spill] sm:$0xff] }
 0x474   :  { %v2186_v18 = vadd.f32 %v2139_v9, %v1716_v14  ;;  %v2141_v21 = vpop.f32.mrb[10].mxu0  ;;  %v2182_v11 = vpop.f32.mrb[10].mxu1  ;;  %v2188_v45 = vadd.f32 %v2180_v12, %v1718_v42  ;;  %v8263_v9 = vld [vmem:[#allocation29_spill] sm:$0xff]  ;;  %v8264_v12 = vld [vmem:[#allocation24_spill] sm:$0xff] }
 0x475   :  { %v5534_v24 = vmul.f32 -1.442695, %v2185_v8  ;;  %v2142_v6 = vpop.f32.mrb[11].mxu0  ;;  %v2183_v41 = vpop.f32.mrb[11].mxu1  ;;  %v8265_v21 = vld [vmem:[#allocation30_spill] sm:$0xff] }
 0x476   :  { %v5535_v20 = vmul.f32 -1.442695, %v2186_v18  ;;  %v5536_v13 = vmul.f32 -1.442695, %v2188_v45  ;;  %v8267_v45 = vld [vmem:[#allocation33_spill] sm:$0xff] }
 0x477   :  { %6524 = vpow2.f32 %v5534_v24  ;;  %v8266_v24 = vld [vmem:[#allocation27_spill] sm:$0xff] }
 0x478   :  { %6526 = vpow2.f32 %v5535_v20 }
 0x479   :  { %6528 = vpow2.f32 %v5536_v13  ;;  %v8269_v13 = vld [vmem:[#allocation34_spill] sm:$0xff] }
 0x47a   :  { %6530 = vtanh.f32 %v2187_v23  ;;  %v8270_v23 = vld [vmem:[#allocation31_spill] sm:$0xff] }
 0x481   :  { %v6525_v2 = vpop.eup %6524 }
 0x482   :  { %v6527_v1 = vpop.eup %6526  ;;  %v2192_v22 = vadd.f32 1.0, %v6525_v2  ;;  %v8271_v2 = vld [vmem:[#allocation36_spill] sm:$0xff] }
 0x483   :  { %v2198_v14 = vadd.f32 1.0, %v6527_v1  ;;  %v6529_v41 = vpop.eup %6528  ;;  %v8272_v1 = vld [vmem:[#allocation32_spill] sm:$0xff] }
 0x484   :  { %6532 = vrcp.f32 %v2192_v22  ;;  %v6531_v6 = vpop.eup %6530  ;;  %v2205_v26 = vadd.f32 1.0, %v6529_v41  ;;  %v8274_v41 = vld [vmem:[#allocation35_spill] sm:$0xff] }
 0x485   :  { %6534 = vrcp.f32 %v2198_v14  ;;  %v8273_v14 = vld [vmem:[#allocation37_spill] sm:$0xff] }
 0x486   :  { %6536 = vrcp.f32 %v2205_v26  ;;  %v8279_v26 = vld [vmem:[#allocation43_spill] sm:$0xff] }
 0x48e   :  { %v6533_v11 = vpop.eup %6532 }
 0x48f   :  { %v6535_v62 = vpop.eup %6534  ;;  %v2209_v18 = vmul.f32 %v6533_v11, %v6531_v6  ;;  %v8275_v6 = vld [vmem:[#allocation38_spill] sm:$0xff]  ;;  %v8276_v11 = vld [vmem:[#allocation39_spill] sm:$0xff] }
 0x490   :  { %v2208_v42 = vmul.f32 %v6535_v62, %v7315_v10  ;;  %v6537_v7 = vpop.eup %6536  ;;  %v8261_v10 = vld [vmem:[#allocation26_spill] sm:$0xff]  ;;  %v8277_v62 = vld [vmem:[#allocation40_spill] sm:$0xff] }
 0x492   :  { %v7523_v20 = vadd.f32 %v2209_v18, %v2208_v42  ;;  %v8278_v18 = vld [vmem:[#allocation41_spill] sm:$0xff]  ;;  %v8280_v42 = vld [vmem:[#allocation44_spill] sm:$0xff] }
 0x494   :  { %6538 = vtanh.f32 %v7523_v20 }
 0x49e   :  { %v6539_v19 = vpop.eup %6538 }
 0x49f   :  { %v7526_v8 = vmul.f32 %v6539_v19, %v6537_v7  ;;  %v8281_v7 = vld [vmem:[#allocation45_spill] sm:$0xff]  ;;  %v8282_v19 = vld [vmem:[#allocation46_spill] sm:$0xff] }
 0x4a1   :  { %8260 = vst [vmem:[#allocation50_spill] sm:$0xff] %v7526_v8  ;;  %v5604_v22 = vpack.c.bf16 %v7526_v8, %v7526_v8  ;;  %v8284_v8 = vld [vmem:[#allocation48_spill] sm:$0xff] }
 0x4a3   :  { %5605 = vmatprep.mubr.msk.bf16.mxu0 %vm7224_vm2, %v5604_v22  ;;  %5613 = vmatprep.mubr.msk.bf16.mxu1 %vm7224_vm2, %v5604_v22 }
 0x4a4   :  { %5608 = vmatmul.mubr.msk.bf16.vlgmr.msra.gmra.mrb[12].mxu0 %vm7230_vm3, %v5604_v22  ;;  %5616 = vmatmul.mubr.msk.bf16.vlgmr.msra.gmra.mrb[12].mxu1 %vm7230_vm3, %v5604_v22  ;;  %v8283_v22 = vld [vmem:[#allocation47_spill] sm:$0xff] }
 0x4a5   :  { %3148 = vmatpush1.bf16.msra.mxu0 %v7322_v25  ;;  %3189 = vmatpush1.bf16.msra.mxu1 %v7324_v27 }
 0x4a6   :  { %3149 = vmatprep.subr.bf16.mxu0 %v7326_v28  ;;  %3190 = vmatprep.subr.bf16.mxu1 %v7328_v29 }
 0x4a9   :  { %3150 = vmatpush1.bf16.msra.mxu0 %v7340_v15  ;;  %3191 = vmatpush1.bf16.msra.mxu1 %v7342_v30 }
 0x4aa   :  { %3151 = vmatprep.subr.bf16.mxu0 %v7346_v31  ;;  %3192 = vmatprep.subr.bf16.mxu1 %v7348_v32 }
 0x4ad   :  { %3152 = vmatpush1.bf16.msra.mxu0 %v7352_v33  ;;  %3193 = vmatpush1.bf16.msra.mxu1 %v7354_v34 }
 0x4ae   :  { %3153 = vmatprep.subr.bf16.mxu0 %v7358_v35  ;;  %3194 = vmatprep.subr.bf16.mxu1 %v7360_v36 }
 0x4b1   :  { %3154 = vmatpush1.bf16.msra.mxu0 %v7364_v37  ;;  %3195 = vmatpush1.bf16.msra.mxu1 %v7366_v38 }
 0x4b2   :  { %3155 = vmatprep.subr.bf16.mxu0 %v7372_v39  ;;  %3196 = vmatprep.subr.bf16.mxu1 %v7374_v40 }
 0x4b5   :  { %3156 = vmatpush1.bf16.msra.mxu0 %v7376_v43  ;;  %3197 = vmatpush1.bf16.msra.mxu1 %v7378_v44 }
 0x4b6   :  { %3157 = vmatprep.subr.bf16.mxu0 %v7384_v46  ;;  %3198 = vmatprep.subr.bf16.mxu1 %v7386_v48 }
 0x4b9   :  { %3158 = vmatpush1.bf16.msra.mxu0 %v7388_v49  ;;  %3199 = vmatpush1.bf16.msra.mxu1 %v7390_v50 }
 0x4ba   :  { %3159 = vmatprep.subr.bf16.mxu0 %v7396_v51  ;;  %3200 = vmatprep.subr.bf16.mxu1 %v7398_v52 }
 0x4bd   :  { %3160 = vmatpush1.bf16.msra.mxu0 %v7400_v53  ;;  %3201 = vmatpush1.bf16.msra.mxu1 %v7402_v54 }
 0x4be   :  { %3161 = vmatprep.subr.bf16.mxu0 %v7408_v55  ;;  %3202 = vmatprep.subr.bf16.mxu1 %v7410_v56 }
 0x4c1   :  { %3162 = vmatpush1.bf16.msra.mxu0 %v7412_v57  ;;  %3203 = vmatpush1.bf16.msra.mxu1 %v7414_v58 }
 0x4c2   :  { %3163 = vmatprep.subr.bf16.mxu0 %v7420_v59  ;;  %3204 = vmatprep.subr.bf16.mxu1 %v7422_v60 }
 0x4c5   :  { %3164 = vmatpush1.bf16.msra.mxu0 %v7424_v61  ;;  %3205 = vmatpush1.bf16.msra.mxu1 %v7426_v63 }
 0x4c6   :  { %3165 = vmatprep.subr.bf16.mxu0 %v7432_v0  ;;  %3206 = vmatprep.subr.bf16.mxu1 %v7434_v3 }
 0x4c9   :  { %3166 = vmatpush1.bf16.msra.mxu0 %v7436_v4  ;;  %3207 = vmatpush1.bf16.msra.mxu1 %v8261_v10 }
 0x4ca   :  { %3167 = vmatprep.subr.bf16.mxu0 %v8262_v5  ;;  %3208 = vmatprep.subr.bf16.mxu1 %v8263_v9 }
 0x4cd   :  { %3168 = vmatpush1.bf16.msra.mxu0 %v8264_v12  ;;  %3209 = vmatpush1.bf16.msra.mxu1 %v8265_v21 }
 0x4ce   :  { %3169 = vmatprep.subr.bf16.mxu0 %v8266_v24  ;;  %3210 = vmatprep.subr.bf16.mxu1 %v8267_v45 }
 0x4d1   :  { %3170 = vmatpush1.bf16.msra.mxu0 %v8268_v47  ;;  %3211 = vmatpush1.bf16.msra.mxu1 %v8269_v13 }
 0x4d2   :  { %3171 = vmatprep.subr.bf16.mxu0 %v8270_v23  ;;  %3212 = vmatprep.subr.bf16.mxu1 %v8271_v2  ;;  %v2232_v2 = vld [vmem:[#allocation2 + $0x78] sm:$0xff] }
 0x4d5   :  { %3172 = vmatpush1.bf16.msra.mxu0 %v8272_v1  ;;  %3213 = vmatpush1.bf16.msra.mxu1 %v8273_v14  ;;  %v7604_v14 = vld [vmem:[#allocation9 + $0x8] sm:$0xff] }
 0x4d6   :  { %3173 = vmatprep.subr.bf16.mxu0 %v8274_v41  ;;  %3214 = vmatprep.subr.bf16.mxu1 %v8275_v6  ;;  %v8285_v41 = vld [vmem:[#allocation49_spill] sm:$0xff]  ;;  %8289 = vst [vmem:[#allocation23_spill] sm:$0xff] %v7604_v14 }
 0x4d7   :  { %v8286_v6 = vld [vmem:[#allocation21_spill] sm:$0xff] }
 0x4d9   :  { %3174 = vmatpush1.bf16.msra.mxu0 %v8276_v11  ;;  %3215 = vmatpush1.bf16.msra.mxu1 %v8277_v62  ;;  %v8287_v11 = vld [vmem:[#allocation25_spill] sm:$0xff] }
 0x4da   :  { %3175 = vmatprep.subr.bf16.mxu0 %v8278_v18  ;;  %3216 = vmatprep.subr.bf16.mxu1 %v8279_v26  ;;  %v2229_v62 = vld [vmem:[#allocation2 + $0x60] sm:$0xff]  ;;  %v2230_v26 = vld [vmem:[#allocation2 + $0x68] sm:$0xff] }
 0x4db   :  { %v7602_v18 = vld [vmem:[#allocation9] sm:$0xff] }
 0x4dc   :  { %8288 = vst [vmem:[#allocation26_spill] sm:$0xff] %v7602_v18 }
 0x4dd   :  { %3176 = vmatpush1.bf16.msra.mxu0 %v8280_v42  ;;  %3217 = vmatpush1.bf16.msra.mxu1 %v8281_v7  ;;  %v2237_v7 = vadd.f32 %v7602_v18, %v2229_v62  ;;  %v2231_v62 = vld [vmem:[#allocation2 + $0x70] sm:$0xff] }
 0x4de   :  { %3177 = vmatprep.subr.bf16.mxu0 %v8282_v19  ;;  %3218 = vmatprep.subr.bf16.mxu1 %v8283_v22  ;;  %v2238_v19 = vadd.f32 %v7604_v14, %v2230_v26  ;;  %v7611_v26 = vld [vmem:[#allocation9 + $0x10] sm:$0xff] }
 0x4e1   :  { %3178 = vmatpush1.bf16.msra.mxu0 %v8284_v8  ;;  %3219 = vmatpush1.bf16.msra.mxu1 %v8285_v41  ;;  %v7608_v41 = vld [vmem:[#allocation9 + $0x18] sm:$0xff] }
 0x4e2   :  { %3663 = vmatprep.subr.bf16.mxu0 %v8286_v6  ;;  %3704 = vmatprep.subr.bf16.mxu1 %v8287_v11  ;;  %v2240_v12 = vadd.f32 %v7608_v41, %v2232_v2 }
 0x577   :  { %v2659_v42 = vpop.f32.mrb[12].mxu0  ;;  %v2700_v22 = vpop.f32.mrb[12].mxu1 }
 0x578   :  { %v2707_v1 = vadd.f32 %v2659_v42, %v2237_v7  ;;  %v2661_v8 = vpop.f32.mrb[13].mxu0  ;;  %v2702_v6 = vpop.f32.mrb[13].mxu1  ;;  %v2239_v7 = vadd.f32 %v7611_v26, %v2231_v62 }
 0x579   :  { %v2708_v23 = vadd.f32 %v2661_v8, %v2238_v19  ;;  %v2663_v11 = vpop.f32.mrb[14].mxu0  ;;  %v2704_v13 = vpop.f32.mrb[14].mxu1  ;;  %v2710_v42 = vadd.f32 %v2702_v6, %v2240_v12 }
 0x57a   :  { %v5617_v47 = vmul.f32 -1.442695, %v2707_v1  ;;  %v2664_v45 = vpop.f32.mrb[15].mxu0  ;;  %v2705_v24 = vpop.f32.mrb[15].mxu1  ;;  %v2709_v18 = vadd.f32 %v2700_v22, %v2239_v7 }
 0x57b   :  { %v5618_v21 = vmul.f32 -1.442695, %v2708_v23  ;;  %v5619_v14 = vmul.f32 -1.442695, %v2710_v42 }
 0x57c   :  { %6540 = vpow2.f32 %v5617_v47 }
 0x57d   :  { %6542 = vpow2.f32 %v5618_v21 }
 0x57e   :  { %6544 = vpow2.f32 %v5619_v14 }
 0x57f   :  { %6546 = vtanh.f32 %v2709_v18 }
 0x586   :  { %v6541_v9 = vpop.eup %6540 }
 0x587   :  { %v6543_v8 = vpop.eup %6542  ;;  %v2714_v19 = vadd.f32 1.0, %v6541_v9 }
 0x588   :  { %v2720_v45 = vadd.f32 1.0, %v6543_v8  ;;  %v6545_v24 = vpop.eup %6544  ;;  %v2753_v8 = vld [vmem:[#allocation2 + $0x90] sm:$0xff] }
 0x589   :  { %6548 = vrcp.f32 %v2714_v19  ;;  %v6547_v13 = vpop.eup %6546  ;;  %v2727_v1 = vadd.f32 1.0, %v6545_v24 }
 0x58a   :  { %6550 = vrcp.f32 %v2720_v45  ;;  %v2761_v45 = vadd.f32 %v2753_v8, %v7611_v26  ;;  %v7820_v8 = vld [vmem:[#allocation10 + $0x124] ss:$16 sps:$4 sm:$0xff]  }
 0x58b   :  { %6552 = vrcp.f32 %v2727_v1 }
 0x593   :  { %v6549_v47 = vpop.eup %6548 }
 0x594   :  { %v6551_v23 = vpop.eup %6550  ;;  %v2731_v2 = vmul.f32 %v6549_v47, %v6547_v13 }
 0x595   :  { %v2730_v12 = vmul.f32 %v6551_v23, %v7523_v20  ;;  %v6553_v22 = vpop.eup %6552 }
 0x597   :  { %v7615_v21 = vadd.f32 %v2731_v2, %v2730_v12 }
 0x599   :  { %6554 = vtanh.f32 %v7615_v21 }
 0x5a3   :  { %v6555_v9 = vpop.eup %6554 }
 0x5a4   :  { %v7618_v14 = vmul.f32 %v6555_v9, %v6553_v22 }
 0x5a6   :  { %8290 = vst [vmem:[#allocation21_spill] sm:$0xff] %v7618_v14  ;;  %v5687_v18 = vpack.c.bf16 %v7618_v14, %v7618_v14  ;;  %v7874_v14 = vld [vmem:[#allocation10 + $0x1a8] ss:$16 sps:$4 sm:$0xff]  }
 0x5a8   :  { %5688 = vmatprep.mubr.msk.bf16.mxu0 %vm7224_vm2, %v5687_v18  ;;  %5696 = vmatprep.mubr.msk.bf16.mxu1 %vm7224_vm2, %v5687_v18 }
 0x5a9   :  { %5691 = vmatmul.mubr.msk.bf16.vlgmr.msra.gmra.mrb[16].mxu0 %vm7230_vm3, %v5687_v18  ;;  %5699 = vmatmul.mubr.msk.bf16.vlgmr.msra.gmra.mrb[16].mxu1 %vm7230_vm3, %v5687_v18 }
 0x5aa   :  { %3664 = vmatpush1.bf16.msra.mxu0 %v7322_v25  ;;  %3705 = vmatpush1.bf16.msra.mxu1 %v7324_v27  ;;  %v8291_v25 = vld [vmem:[#allocation29_spill] sm:$0xff]  ;;  %v8292_v27 = vld [vmem:[#allocation24_spill] sm:$0xff] }
 0x5ab   :  { %3665 = vmatprep.subr.bf16.mxu0 %v7326_v28  ;;  %3706 = vmatprep.subr.bf16.mxu1 %v7328_v29  ;;  %v8293_v28 = vld [vmem:[#allocation30_spill] sm:$0xff]  ;;  %v8294_v29 = vld [vmem:[#allocation27_spill] sm:$0xff] }
 0x5ae   :  { %3666 = vmatpush1.bf16.msra.mxu0 %v7340_v15  ;;  %3707 = vmatpush1.bf16.msra.mxu1 %v7342_v30  ;;  %v8295_v15 = vld [vmem:[#allocation33_spill] sm:$0xff]  ;;  %v8296_v30 = vld [vmem:[#allocation28_spill] sm:$0xff] }
 0x5af   :  { %3667 = vmatprep.subr.bf16.mxu0 %v7346_v31  ;;  %3708 = vmatprep.subr.bf16.mxu1 %v7348_v32  ;;  %v8297_v31 = vld [vmem:[#allocation34_spill] sm:$0xff]  ;;  %v8298_v32 = vld [vmem:[#allocation31_spill] sm:$0xff] }
 0x5b2   :  { %3668 = vmatpush1.bf16.msra.mxu0 %v7352_v33  ;;  %3709 = vmatpush1.bf16.msra.mxu1 %v7354_v34  ;;  %v8299_v33 = vld [vmem:[#allocation36_spill] sm:$0xff] }
 0x5b3   :  { %3669 = vmatprep.subr.bf16.mxu0 %v7358_v35  ;;  %3710 = vmatprep.subr.bf16.mxu1 %v7360_v36  ;;  %v8300_v34 = vld [vmem:[#allocation32_spill] sm:$0xff]  ;;  %v8301_v35 = vld [vmem:[#allocation37_spill] sm:$0xff]  ;;  %v8302_v36 = vld [vmem:[#allocation35_spill] sm:$0xff] }
 0x5b6   :  { %3670 = vmatpush1.bf16.msra.mxu0 %v7364_v37  ;;  %3711 = vmatpush1.bf16.msra.mxu1 %v7366_v38  ;;  %v8303_v37 = vld [vmem:[#allocation38_spill] sm:$0xff]  ;;  %v8304_v38 = vld [vmem:[#allocation39_spill] sm:$0xff] }
 0x5b7   :  { %3671 = vmatprep.subr.bf16.mxu0 %v7372_v39  ;;  %3712 = vmatprep.subr.bf16.mxu1 %v7374_v40  ;;  %v8305_v39 = vld [vmem:[#allocation40_spill] sm:$0xff]  ;;  %v8306_v40 = vld [vmem:[#allocation41_spill] sm:$0xff] }
 0x5ba   :  { %3672 = vmatpush1.bf16.msra.mxu0 %v7376_v43  ;;  %3713 = vmatpush1.bf16.msra.mxu1 %v7378_v44  ;;  %v8307_v43 = vld [vmem:[#allocation43_spill] sm:$0xff]  ;;  %v8308_v44 = vld [vmem:[#allocation44_spill] sm:$0xff] }
 0x5bb   :  { %3673 = vmatprep.subr.bf16.mxu0 %v7384_v46  ;;  %3714 = vmatprep.subr.bf16.mxu1 %v7386_v48  ;;  %v8309_v46 = vld [vmem:[#allocation45_spill] sm:$0xff]  ;;  %v8310_v48 = vld [vmem:[#allocation46_spill] sm:$0xff]  ;;  %8333 = vst [vmem:[#allocation43_spill] sm:$0xff] %v7874_v14 }
 0x5be   :  { %3674 = vmatpush1.bf16.msra.mxu0 %v7388_v49  ;;  %3715 = vmatpush1.bf16.msra.mxu1 %v7390_v50  ;;  %v8311_v49 = vld [vmem:[#allocation47_spill] sm:$0xff]  ;;  %v8312_v50 = vld [vmem:[#allocation48_spill] sm:$0xff] }
 0x5bf   :  { %3675 = vmatprep.subr.bf16.mxu0 %v7396_v51  ;;  %3716 = vmatprep.subr.bf16.mxu1 %v7398_v52  ;;  %v8313_v51 = vld [vmem:[#allocation49_spill] sm:$0xff] }
 0x5c0   :  { %v7692_v52 = vld [vmem:[#allocation10 + $0x4] ss:$16 sps:$4 sm:$0xff]  }
 0x5c2   :  { %3676 = vmatpush1.bf16.msra.mxu0 %v7400_v53  ;;  %3717 = vmatpush1.bf16.msra.mxu1 %v7402_v54  ;;  %v7694_v53 = vld [vmem:[#allocation10 + $0xc] ss:$16 sps:$4 sm:$0xff]   ;;  %v2751_v54 = vld [vmem:[#allocation2 + $0x80] sm:$0xff] }
 0x5c3   :  { %3677 = vmatprep.subr.bf16.mxu0 %v7408_v55  ;;  %3718 = vmatprep.subr.bf16.mxu1 %v7410_v56  ;;  %v2752_v55 = vld [vmem:[#allocation2 + $0x88] sm:$0xff] }
 0x5c4   :  { %v8314_v56 = vld [vmem:[#allocation26_spill] sm:$0xff] }
 0x5c6   :  { %3678 = vmatpush1.bf16.msra.mxu0 %v7412_v57  ;;  %3719 = vmatpush1.bf16.msra.mxu1 %v7414_v58  ;;  %v2759_v57 = vadd.f32 %v2751_v54, %v8314_v56  ;;  %v8315_v58 = vld [vmem:[#allocation23_spill] sm:$0xff] }
 0x5c7   :  { %3679 = vmatprep.subr.bf16.mxu0 %v7420_v59  ;;  %3720 = vmatprep.subr.bf16.mxu1 %v7422_v60  ;;  %v2760_v59 = vadd.f32 %v2752_v55, %v8315_v58  ;;  %v7764_v54 = vld [vmem:[#allocation10 + $0x80] ss:$16 sps:$4 sm:$0xff]   ;;  %v7766_v55 = vld [vmem:[#allocation10 + $0x88] ss:$16 sps:$4 sm:$0xff]  }
 0x5ca   :  { %3680 = vmatpush1.bf16.msra.mxu0 %v7424_v61  ;;  %3721 = vmatpush1.bf16.msra.mxu1 %v7426_v63 }
 0x5cb   :  { %3681 = vmatprep.subr.bf16.mxu0 %v7432_v0  ;;  %3722 = vmatprep.subr.bf16.mxu1 %v7434_v3  ;;  %v2754_v3 = vld [vmem:[#allocation2 + $0x98] sm:$0xff] }
 0x5cc   :  { %v2762_v7 = vadd.f32 %v2754_v3, %v7608_v41  ;;  %v7788_v3 = vld [vmem:[#allocation10 + $0xc0] ss:$16 sps:$4 sm:$0xff]  }
 0x5ce   :  { %3682 = vmatpush1.bf16.msra.mxu0 %v7436_v4  ;;  %3723 = vmatpush1.bf16.msra.mxu1 %v8261_v10 }
 0x5cf   :  { %3683 = vmatprep.subr.bf16.mxu0 %v8262_v5  ;;  %3724 = vmatprep.subr.bf16.mxu1 %v8291_v25 }
 0x5d2   :  { %3684 = vmatpush1.bf16.msra.mxu0 %v8292_v27  ;;  %3725 = vmatpush1.bf16.msra.mxu1 %v8293_v28 }
 0x5d3   :  { %3685 = vmatprep.subr.bf16.mxu0 %v8294_v29  ;;  %3726 = vmatprep.subr.bf16.mxu1 %v8295_v15 }
 0x5d6   :  { %3686 = vmatpush1.bf16.msra.mxu0 %v8296_v30  ;;  %3727 = vmatpush1.bf16.msra.mxu1 %v8297_v31 }
 0x5d7   :  { %3687 = vmatprep.subr.bf16.mxu0 %v8298_v32  ;;  %3728 = vmatprep.subr.bf16.mxu1 %v8299_v33  ;;  %v7710_v33 = vld [vmem:[#allocation10] ss:$16 sps:$4 sm:$0xff]  }
 0x5da   :  { %3688 = vmatpush1.bf16.msra.mxu0 %v8300_v34  ;;  %3729 = vmatpush1.bf16.msra.mxu1 %v8301_v35  ;;  %v7712_v34 = vld [vmem:[#allocation10 + $0x8] ss:$16 sps:$4 sm:$0xff]   ;;  %v7714_v35 = vld [vmem:[#allocation10 + $0x24] ss:$16 sps:$4 sm:$0xff]  }
 0x5db   :  { %3689 = vmatprep.subr.bf16.mxu0 %v8302_v36  ;;  %3730 = vmatprep.subr.bf16.mxu1 %v8303_v37  ;;  %v7716_v36 = vld [vmem:[#allocation10 + $0x2c] ss:$16 sps:$4 sm:$0xff]   ;;  %v7730_v37 = vld [vmem:[#allocation10 + $0x28] ss:$16 sps:$4 sm:$0xff]  }
 0x5de   :  { %3690 = vmatpush1.bf16.msra.mxu0 %v8304_v38  ;;  %3731 = vmatpush1.bf16.msra.mxu1 %v8305_v39  ;;  %v7734_v38 = vld [vmem:[#allocation10 + $0x44] ss:$16 sps:$4 sm:$0xff]   ;;  %v7736_v39 = vld [vmem:[#allocation10 + $0x4c] ss:$16 sps:$4 sm:$0xff]  }
 0x5df   :  { %3691 = vmatprep.subr.bf16.mxu0 %v8306_v40  ;;  %3732 = vmatprep.subr.bf16.mxu1 %v8307_v43  ;;  %v7740_v40 = vld [vmem:[#allocation10 + $0x40] ss:$16 sps:$4 sm:$0xff]   ;;  %v7742_v43 = vld [vmem:[#allocation10 + $0x48] ss:$16 sps:$4 sm:$0xff]  }
 0x5e2   :  { %3692 = vmatpush1.bf16.msra.mxu0 %v8308_v44  ;;  %3733 = vmatpush1.bf16.msra.mxu1 %v8309_v46  ;;  %v7746_v44 = vld [vmem:[#allocation10 + $0x64] ss:$16 sps:$4 sm:$0xff]   ;;  %v7748_v46 = vld [vmem:[#allocation10 + $0x6c] ss:$16 sps:$4 sm:$0xff]  }
 0x5e3   :  { %3693 = vmatprep.subr.bf16.mxu0 %v8310_v48  ;;  %3734 = vmatprep.subr.bf16.mxu1 %v8311_v49  ;;  %v7752_v48 = vld [vmem:[#allocation10 + $0x60] ss:$16 sps:$4 sm:$0xff]   ;;  %v7754_v49 = vld [vmem:[#allocation10 + $0x68] ss:$16 sps:$4 sm:$0xff]  }
 0x5e6   :  { %3694 = vmatpush1.bf16.msra.mxu0 %v8312_v50  ;;  %3735 = vmatpush1.bf16.msra.mxu1 %v8313_v51  ;;  %v7760_v50 = vld [vmem:[#allocation10 + $0x84] ss:$16 sps:$4 sm:$0xff]   ;;  %v7762_v51 = vld [vmem:[#allocation10 + $0x8c] ss:$16 sps:$4 sm:$0xff]  }
 0x5e7   :  { %4179 = vmatprep.subr.bf16.mxu0 %v7692_v52  ;;  %4220 = vmatprep.subr.bf16.mxu1 %v7694_v53 }
 0x67c   :  { %v3181_v60 = vpop.f32.mrb[16].mxu0  ;;  %v3222_v61 = vpop.f32.mrb[16].mxu1 }
 0x67d   :  { %v3229_v63 = vadd.f32 %v3181_v60, %v2759_v57  ;;  %v3183_v0 = vpop.f32.mrb[17].mxu0  ;;  %v3224_v4 = vpop.f32.mrb[17].mxu1  ;;  %v3231_v13 = vadd.f32 %v3222_v61, %v2761_v45  ;;  %v7772_v57 = vld [vmem:[#allocation10 + $0xa4] ss:$16 sps:$4 sm:$0xff]   ;;  %v7776_v60 = vld [vmem:[#allocation10 + $0xa0] ss:$16 sps:$4 sm:$0xff]  }
 0x67e   :  { %v3230_v20 = vadd.f32 %v3183_v0, %v2760_v59  ;;  %v3185_v10 = vpop.f32.mrb[18].mxu0  ;;  %v3226_v5 = vpop.f32.mrb[18].mxu1  ;;  %v3232_v19 = vadd.f32 %v3224_v4, %v2762_v7  ;;  %v7774_v59 = vld [vmem:[#allocation10 + $0xac] ss:$16 sps:$4 sm:$0xff]   ;;  %v7778_v61 = vld [vmem:[#allocation10 + $0xa8] ss:$16 sps:$4 sm:$0xff]  }
 0x67f   :  { %v5700_v6 = vmul.f32 -1.442695, %v3229_v63  ;;  %v3186_v11 = vpop.f32.mrb[19].mxu0  ;;  %v3227_v62 = vpop.f32.mrb[19].mxu1  ;;  %v7784_v63 = vld [vmem:[#allocation10 + $0xc4] ss:$16 sps:$4 sm:$0xff]  }
 0x680   :  { %v5701_v42 = vmul.f32 -1.442695, %v3230_v20  ;;  %v5702_v24 = vmul.f32 -1.442695, %v3232_v19  ;;  %v7786_v0 = vld [vmem:[#allocation10 + $0xcc] ss:$16 sps:$4 sm:$0xff]  }
 0x681   :  { %6556 = vpow2.f32 %v5700_v6  ;;  %v7790_v4 = vld [vmem:[#allocation10 + $0xc8] ss:$16 sps:$4 sm:$0xff]   ;;  %v7796_v20 = vld [vmem:[#allocation10 + $0xe4] ss:$16 sps:$4 sm:$0xff]   ;;  %v7798_v10 = vld [vmem:[#allocation10 + $0xec] ss:$16 sps:$4 sm:$0xff]  }
 0x682   :  { %6558 = vpow2.f32 %v5701_v42  ;;  %v7800_v5 = vld [vmem:[#allocation10 + $0xe0] ss:$16 sps:$4 sm:$0xff]   ;;  %v7802_v6 = vld [vmem:[#allocation10 + $0xe8] ss:$16 sps:$4 sm:$0xff]   ;;  %v7808_v11 = vld [vmem:[#allocation10 + $0x104] ss:$16 sps:$4 sm:$0xff]  }
 0x683   :  { %6560 = vpow2.f32 %v5702_v24  ;;  %v7810_v62 = vld [vmem:[#allocation10 + $0x10c] ss:$16 sps:$4 sm:$0xff]   ;;  %v7812_v42 = vld [vmem:[#allocation10 + $0x100] ss:$16 sps:$4 sm:$0xff]   ;;  %v7814_v7 = vld [vmem:[#allocation10 + $0x108] ss:$16 sps:$4 sm:$0xff]  }
 0x684   :  { %6562 = vtanh.f32 %v3231_v13  ;;  %v7822_v19 = vld [vmem:[#allocation10 + $0x12c] ss:$16 sps:$4 sm:$0xff]   ;;  %v7824_v45 = vld [vmem:[#allocation10 + $0x120] ss:$16 sps:$4 sm:$0xff]   ;;  %v7826_v24 = vld [vmem:[#allocation10 + $0x128] ss:$16 sps:$4 sm:$0xff]  }
 0x685   :  { %8317 = vst [vmem:[#allocation29_spill] sm:$0xff] %v7826_v24  ;;  %v7832_v13 = vld [vmem:[#allocation10 + $0x144] ss:$16 sps:$4 sm:$0xff]  }
 0x686   :  { %8318 = vst [vmem:[#allocation24_spill] sm:$0xff] %v7832_v13 }
 0x68b   :  { %v6557_v47 = vpop.eup %6556 }
 0x68c   :  { %v6559_v23 = vpop.eup %6558  ;;  %v3236_v2 = vadd.f32 1.0, %v6557_v47  ;;  %v7834_v47 = vld [vmem:[#allocation10 + $0x14c] ss:$16 sps:$4 sm:$0xff]  }
 0x68d   :  { %v3242_v1 = vadd.f32 1.0, %v6559_v23  ;;  %v6561_v12 = vpop.eup %6560  ;;  %8319 = vst [vmem:[#allocation30_spill] sm:$0xff] %v7834_v47  ;;  %v7836_v23 = vld [vmem:[#allocation10 + $0x140] ss:$16 sps:$4 sm:$0xff]  }
 0x68e   :  { %6564 = vrcp.f32 %v3236_v2  ;;  %v6563_v22 = vpop.eup %6562  ;;  %v3249_v27 = vadd.f32 1.0, %v6561_v12  ;;  %8320 = vst [vmem:[#allocation27_spill] sm:$0xff] %v7836_v23  ;;  %v7838_v2 = vld [vmem:[#allocation10 + $0x148] ss:$16 sps:$4 sm:$0xff]   ;;  %v7846_v12 = vld [vmem:[#allocation10 + $0x16c] ss:$16 sps:$4 sm:$0xff]  }
 0x68f   :  { %6566 = vrcp.f32 %v3242_v1  ;;  %8321 = vst [vmem:[#allocation33_spill] sm:$0xff] %v7838_v2  ;;  %v7844_v1 = vld [vmem:[#allocation10 + $0x164] ss:$16 sps:$4 sm:$0xff]   ;;  %8323 = vst [vmem:[#allocation34_spill] sm:$0xff] %v7846_v12 }
 0x690   :  { %6568 = vrcp.f32 %v3249_v27  ;;  %8322 = vst [vmem:[#allocation28_spill] sm:$0xff] %v7844_v1  ;;  %v7860_v27 = vld [vmem:[#allocation10 + $0x180] ss:$16 sps:$4 sm:$0xff]  }
 0x691   :  { %8328 = vst [vmem:[#allocation35_spill] sm:$0xff] %v7860_v27 }
 0x698   :  { %v6565_v9 = vpop.eup %6564 }
 0x699   :  { %v6567_v18 = vpop.eup %6566  ;;  %v3253_v25 = vmul.f32 %v6565_v9, %v6563_v22  ;;  %v7848_v22 = vld [vmem:[#allocation10 + $0x160] ss:$16 sps:$4 sm:$0xff]   ;;  %v7850_v9 = vld [vmem:[#allocation10 + $0x168] ss:$16 sps:$4 sm:$0xff]  }
 0x69a   :  { %v3252_v28 = vmul.f32 %v6567_v18, %v7615_v21  ;;  %v6569_v15 = vpop.eup %6568  ;;  %v7728_v21 = vld [vmem:[#allocation10 + $0x20] ss:$16 sps:$4 sm:$0xff]   ;;  %8324 = vst [vmem:[#allocation31_spill] sm:$0xff] %v7848_v22  ;;  %8325 = vst [vmem:[#allocation36_spill] sm:$0xff] %v7850_v9  ;;  %v7856_v18 = vld [vmem:[#allocation10 + $0x184] ss:$16 sps:$4 sm:$0xff]  }
 0x69b   :  { %8326 = vst [vmem:[#allocation32_spill] sm:$0xff] %v7856_v18 }
 0x69c   :  { %v7703_v29 = vadd.f32 %v3253_v25, %v3252_v28  ;;  %v7858_v25 = vld [vmem:[#allocation10 + $0x18c] ss:$16 sps:$4 sm:$0xff]   ;;  %v7862_v28 = vld [vmem:[#allocation10 + $0x188] ss:$16 sps:$4 sm:$0xff]  }
 0x69d   :  { %8327 = vst [vmem:[#allocation37_spill] sm:$0xff] %v7858_v25  ;;  %8329 = vst [vmem:[#allocation38_spill] sm:$0xff] %v7862_v28 }
 0x69e   :  { %6570 = vtanh.f32 %v7703_v29 }
 0x6a8   :  { %v6571_v30 = vpop.eup %6570 }
 0x6a9   :  { %v7706_v31 = vmul.f32 %v6571_v30, %v6569_v15  ;;  %v7866_v15 = vld [vmem:[#allocation10 + $0x1a4] ss:$16 sps:$4 sm:$0xff]   ;;  %v7868_v30 = vld [vmem:[#allocation10 + $0x1ac] ss:$16 sps:$4 sm:$0xff]  }
 0x6aa   :  { %8330 = vst [vmem:[#allocation39_spill] sm:$0xff] %v7866_v15  ;;  %8331 = vst [vmem:[#allocation40_spill] sm:$0xff] %v7868_v30 }
 0x6ab   :  { %8316 = vst [vmem:[#allocation25_spill] sm:$0xff] %v7706_v31  ;;  %v5770_v32 = vpack.c.bf16 %v7706_v31, %v7706_v31  ;;  %v7878_v31 = vld [vmem:[#allocation10 + $0x1c4] ss:$16 sps:$4 sm:$0xff]  }
 0x6ac   :  { %8334 = vst [vmem:[#allocation44_spill] sm:$0xff] %v7878_v31 }
 0x6ad   :  { %5771 = vmatprep.mubr.msk.bf16.mxu0 %vm7224_vm2, %v5770_v32  ;;  %5779 = vmatprep.mubr.msk.bf16.mxu1 %vm7224_vm2, %v5770_v32 }
 0x6ae   :  { %5774 = vmatmul.mubr.msk.bf16.vlgmr.msra.gmra.mrb[20].mxu0 %vm7230_vm3, %v5770_v32  ;;  %5782 = vmatmul.mubr.msk.bf16.vlgmr.msra.gmra.mrb[20].mxu1 %vm7230_vm3, %v5770_v32  ;;  %v7872_v32 = vld [vmem:[#allocation10 + $0x1a0] ss:$16 sps:$4 sm:$0xff]  }
 0x6af   :  { %4180 = vmatpush1.bf16.msra.mxu0 %v7710_v33  ;;  %4221 = vmatpush1.bf16.msra.mxu1 %v7712_v34  ;;  %8332 = vst [vmem:[#allocation41_spill] sm:$0xff] %v7872_v32 }
 0x6b0   :  { %4181 = vmatprep.subr.bf16.mxu0 %v7714_v35  ;;  %4222 = vmatprep.subr.bf16.mxu1 %v7716_v36 }
 0x6b3   :  { %4182 = vmatpush1.bf16.msra.mxu0 %v7728_v21  ;;  %4223 = vmatpush1.bf16.msra.mxu1 %v7730_v37 }
 0x6b4   :  { %4183 = vmatprep.subr.bf16.mxu0 %v7734_v38  ;;  %4224 = vmatprep.subr.bf16.mxu1 %v7736_v39 }
 0x6b7   :  { %4184 = vmatpush1.bf16.msra.mxu0 %v7740_v40  ;;  %4225 = vmatpush1.bf16.msra.mxu1 %v7742_v43 }
 0x6b8   :  { %4185 = vmatprep.subr.bf16.mxu0 %v7746_v44  ;;  %4226 = vmatprep.subr.bf16.mxu1 %v7748_v46 }
 0x6bb   :  { %4186 = vmatpush1.bf16.msra.mxu0 %v7752_v48  ;;  %4227 = vmatpush1.bf16.msra.mxu1 %v7754_v49 }
 0x6bc   :  { %4187 = vmatprep.subr.bf16.mxu0 %v7760_v50  ;;  %4228 = vmatprep.subr.bf16.mxu1 %v7762_v51 }
 0x6bf   :  { %4188 = vmatpush1.bf16.msra.mxu0 %v7764_v54  ;;  %4229 = vmatpush1.bf16.msra.mxu1 %v7766_v55 }
 0x6c0   :  { %4189 = vmatprep.subr.bf16.mxu0 %v7772_v57  ;;  %4230 = vmatprep.subr.bf16.mxu1 %v7774_v59 }
 0x6c3   :  { %4190 = vmatpush1.bf16.msra.mxu0 %v7776_v60  ;;  %4231 = vmatpush1.bf16.msra.mxu1 %v7778_v61 }
 0x6c4   :  { %4191 = vmatprep.subr.bf16.mxu0 %v7784_v63  ;;  %4232 = vmatprep.subr.bf16.mxu1 %v7786_v0 }
 0x6c7   :  { %4192 = vmatpush1.bf16.msra.mxu0 %v7788_v3  ;;  %4233 = vmatpush1.bf16.msra.mxu1 %v7790_v4 }
 0x6c8   :  { %4193 = vmatprep.subr.bf16.mxu0 %v7796_v20  ;;  %4234 = vmatprep.subr.bf16.mxu1 %v7798_v10 }
 0x6cb   :  { %4194 = vmatpush1.bf16.msra.mxu0 %v7800_v5  ;;  %4235 = vmatpush1.bf16.msra.mxu1 %v7802_v6 }
 0x6cc   :  { %4195 = vmatprep.subr.bf16.mxu0 %v7808_v11  ;;  %4236 = vmatprep.subr.bf16.mxu1 %v7810_v62 }
 0x6cf   :  { %4196 = vmatpush1.bf16.msra.mxu0 %v7812_v42  ;;  %4237 = vmatpush1.bf16.msra.mxu1 %v7814_v7 }
 0x6d0   :  { %4197 = vmatprep.subr.bf16.mxu0 %v7820_v8  ;;  %4238 = vmatprep.subr.bf16.mxu1 %v7822_v19 }
 0x6d3   :  { %4198 = vmatpush1.bf16.msra.mxu0 %v7824_v45  ;;  %4239 = vmatpush1.bf16.msra.mxu1 %v7826_v24 }
 0x6d4   :  { %4199 = vmatprep.subr.bf16.mxu0 %v7832_v13  ;;  %4240 = vmatprep.subr.bf16.mxu1 %v7834_v47  ;;  %v3269_v13 = vld [vmem:[#allocation2 + $0xb0] sm:$0xff] }
 0x6d7   :  { %4200 = vmatpush1.bf16.msra.mxu0 %v7836_v23  ;;  %4241 = vmatpush1.bf16.msra.mxu1 %v7838_v2 }
 0x6d8   :  { %4201 = vmatprep.subr.bf16.mxu0 %v7844_v1  ;;  %4242 = vmatprep.subr.bf16.mxu1 %v7846_v12  ;;  %v3270_v12 = vld [vmem:[#allocation2 + $0xb8] sm:$0xff] }
 0x6db   :  { %4202 = vmatpush1.bf16.msra.mxu0 %v7848_v22  ;;  %4243 = vmatpush1.bf16.msra.mxu1 %v7850_v9 }
 0x6dc   :  { %4203 = vmatprep.subr.bf16.mxu0 %v7856_v18  ;;  %4244 = vmatprep.subr.bf16.mxu1 %v7858_v25  ;;  %v7880_v18 = vld [vmem:[#allocation10 + $0x1cc] ss:$16 sps:$4 sm:$0xff]   ;;  %v7884_v25 = vld [vmem:[#allocation10 + $0x1c0] ss:$16 sps:$4 sm:$0xff]  }
 0x6dd   :  { %8335 = vst [vmem:[#allocation45_spill] sm:$0xff] %v7880_v18  ;;  %8336 = vst [vmem:[#allocation46_spill] sm:$0xff] %v7884_v25 }
 0x6df   :  { %4204 = vmatpush1.bf16.msra.mxu0 %v7860_v27  ;;  %4245 = vmatpush1.bf16.msra.mxu1 %v7862_v28  ;;  %v7886_v27 = vld [vmem:[#allocation10 + $0x1c8] ss:$16 sps:$4 sm:$0xff]   ;;  %v7890_v28 = vld [vmem:[#allocation10 + $0x1e4] ss:$16 sps:$4 sm:$0xff]  }
 0x6e0   :  { %4205 = vmatprep.subr.bf16.mxu0 %v7866_v15  ;;  %4246 = vmatprep.subr.bf16.mxu1 %v7868_v30  ;;  %8337 = vst [vmem:[#allocation47_spill] sm:$0xff] %v7886_v27  ;;  %8338 = vst [vmem:[#allocation48_spill] sm:$0xff] %v7890_v28  ;;  %v7892_v15 = vld [vmem:[#allocation10 + $0x1ec] ss:$16 sps:$4 sm:$0xff]   ;;  %v7896_v30 = vld [vmem:[#allocation10 + $0x1e0] ss:$16 sps:$4 sm:$0xff]  }
 0x6e1   :  { %8339 = vst [vmem:[#allocation49_spill] sm:$0xff] %v7892_v15  ;;  %8340 = vst [vmem:[#allocation26_spill] sm:$0xff] %v7896_v30 }
 0x6e3   :  { %4206 = vmatpush1.bf16.msra.mxu0 %v7872_v32  ;;  %4247 = vmatpush1.bf16.msra.mxu1 %v7874_v14  ;;  %v7898_v32 = vld [vmem:[#allocation10 + $0x1e8] ss:$16 sps:$4 sm:$0xff]  }
 0x6e4   :  { %4207 = vmatprep.subr.bf16.mxu0 %v7878_v31  ;;  %4248 = vmatprep.subr.bf16.mxu1 %v7880_v18  ;;  %8341 = vst [vmem:[#allocation23_spill] sm:$0xff] %v7898_v32  ;;  %v3267_v18 = vld [vmem:[#allocation2 + $0xa0] sm:$0xff] }
 0x6e7   :  { %4208 = vmatpush1.bf16.msra.mxu0 %v7884_v25  ;;  %4249 = vmatpush1.bf16.msra.mxu1 %v7886_v27  ;;  %v3268_v25 = vld [vmem:[#allocation2 + $0xa8] sm:$0xff]  ;;  %v3275_v27 = vadd.f32 %v3267_v18, %v8314_v56 }
 0x6e8   :  { %4209 = vmatprep.subr.bf16.mxu0 %v7890_v28  ;;  %4250 = vmatprep.subr.bf16.mxu1 %v7892_v15  ;;  %v3276_v31 = vadd.f32 %v3268_v25, %v8315_v58  ;;  %v3277_v58 = vadd.f32 %v3269_v13, %v7611_v26 }
 0x6eb   :  { %4210 = vmatpush1.bf16.msra.mxu0 %v7896_v30  ;;  %4251 = vmatpush1.bf16.msra.mxu1 %v7898_v32 }
 0x6ec   :  { %4695 = vmatprep.subr.bf16.mxu0 %v7692_v52  ;;  %4736 = vmatprep.subr.bf16.mxu1 %v7694_v53  ;;  %v3278_v53 = vadd.f32 %v3270_v12, %v7608_v41 }
 0x781   :  { %v3697_v14 = vpop.f32.mrb[20].mxu0  ;;  %v3738_v9 = vpop.f32.mrb[20].mxu1 }
 0x782   :  { %v3745_v22 = vadd.f32 %v3697_v14, %v3275_v27  ;;  %v3699_v28 = vpop.f32.mrb[21].mxu0  ;;  %v3740_v15 = vpop.f32.mrb[21].mxu1  ;;  %v3747_v14 = vadd.f32 %v3738_v9, %v3277_v58 }
 0x783   :  { %v3746_v1 = vadd.f32 %v3699_v28, %v3276_v31  ;;  %v3701_v30 = vpop.f32.mrb[22].mxu0  ;;  %v3742_v2 = vpop.f32.mrb[22].mxu1  ;;  %v3748_v56 = vadd.f32 %v3740_v15, %v3278_v53 }
 0x784   :  { %v5783_v32 = vmul.f32 -1.442695, %v3745_v22  ;;  %v3702_v23 = vpop.f32.mrb[23].mxu0  ;;  %v3743_v52 = vpop.f32.mrb[23].mxu1 }
 0x785   :  { %v5784_v47 = vmul.f32 -1.442695, %v3746_v1  ;;  %v5785_v18 = vmul.f32 -1.442695, %v3748_v56 }
 0x786   :  { %6572 = vpow2.f32 %v5783_v32 }
 0x787   :  { %6574 = vpow2.f32 %v5784_v47 }
 0x788   :  { %6576 = vpow2.f32 %v5785_v18 }
 0x789   :  { %6578 = vtanh.f32 %v3747_v14  ;;  %v3785_v14 = vld [vmem:[#allocation2 + $0xd0] sm:$0xff] }
 0x790   :  { %v6573_v25 = vpop.eup %6572 }
 0x791   :  { %v6575_v27 = vpop.eup %6574  ;;  %v3752_v24 = vadd.f32 1.0, %v6573_v25  ;;  %v7997_v25 = vld [vmem:[#allocation9 + $0x10] sm:$0xff] }
 0x792   :  { %v3758_v31 = vadd.f32 1.0, %v6575_v27  ;;  %v6577_v23 = vpop.eup %6576 }
 0x793   :  { %6580 = vrcp.f32 %v3752_v24  ;;  %v6579_v2 = vpop.eup %6578  ;;  %v3765_v22 = vadd.f32 1.0, %v6577_v23 }
 0x794   :  { %6582 = vrcp.f32 %v3758_v31  ;;  %v3793_v31 = vadd.f32 %v7997_v25, %v3785_v14 }
 0x795   :  { %6584 = vrcp.f32 %v3765_v22 }
 0x79d   :  { %v6581_v1 = vpop.eup %6580 }
 0x79e   :  { %v6583_v41 = vpop.eup %6582  ;;  %v3769_v12 = vmul.f32 %v6581_v1, %v6579_v2 }
 0x79f   :  { %v3768_v47 = vmul.f32 %v6583_v41, %v7703_v29  ;;  %v6585_v26 = vpop.eup %6584  ;;  %v8342_v29 = vld [vmem:[#allocation29_spill] sm:$0xff] }
 0x7a1   :  { %v7911_v28 = vadd.f32 %v3769_v12, %v3768_v47 }
 0x7a3   :  { %6586 = vtanh.f32 %v7911_v28 }
 0x7ad   :  { %v6587_v13 = vpop.eup %6586 }
 0x7ae   :  { %v7914_v9 = vmul.f32 %v6587_v13, %v6585_v26 }
 0x7b0   :  { %v5853_v24 = vpack.c.bf16 %v7914_v9, %v7914_v9 }
 0x7b2   :  { %5854 = vmatprep.mubr.msk.bf16.mxu0 %vm7224_vm2, %v5853_v24  ;;  %5862 = vmatprep.mubr.msk.bf16.mxu1 %vm7224_vm2, %v5853_v24 }
 0x7b3   :  { %5857 = vmatmul.mubr.msk.bf16.vlgmr.msra.gmra.mrb[24].mxu0 %vm7230_vm3, %v5853_v24  ;;  %5865 = vmatmul.mubr.msk.bf16.vlgmr.msra.gmra.mrb[24].mxu1 %vm7230_vm3, %v5853_v24 }
 0x7b4   :  { %4696 = vmatpush1.bf16.msra.mxu0 %v7710_v33  ;;  %4737 = vmatpush1.bf16.msra.mxu1 %v7712_v34  ;;  %v8343_v33 = vld [vmem:[#allocation24_spill] sm:$0xff]  ;;  %v8344_v34 = vld [vmem:[#allocation30_spill] sm:$0xff] }
 0x7b5   :  { %4697 = vmatprep.subr.bf16.mxu0 %v7714_v35  ;;  %4738 = vmatprep.subr.bf16.mxu1 %v7716_v36  ;;  %v8345_v35 = vld [vmem:[#allocation27_spill] sm:$0xff]  ;;  %v8346_v36 = vld [vmem:[#allocation33_spill] sm:$0xff] }
 0x7b8   :  { %4698 = vmatpush1.bf16.msra.mxu0 %v7728_v21  ;;  %4739 = vmatpush1.bf16.msra.mxu1 %v7730_v37  ;;  %v8347_v21 = vld [vmem:[#allocation28_spill] sm:$0xff]  ;;  %v8348_v37 = vld [vmem:[#allocation34_spill] sm:$0xff] }
 0x7b9   :  { %4699 = vmatprep.subr.bf16.mxu0 %v7734_v38  ;;  %4740 = vmatprep.subr.bf16.mxu1 %v7736_v39  ;;  %v8349_v38 = vld [vmem:[#allocation31_spill] sm:$0xff]  ;;  %v8350_v39 = vld [vmem:[#allocation36_spill] sm:$0xff] }
 0x7bc   :  { %4700 = vmatpush1.bf16.msra.mxu0 %v7740_v40  ;;  %4741 = vmatpush1.bf16.msra.mxu1 %v7742_v43  ;;  %v8351_v40 = vld [vmem:[#allocation32_spill] sm:$0xff]  ;;  %v8352_v43 = vld [vmem:[#allocation37_spill] sm:$0xff] }
 0x7bd   :  { %4701 = vmatprep.subr.bf16.mxu0 %v7746_v44  ;;  %4742 = vmatprep.subr.bf16.mxu1 %v7748_v46  ;;  %v8353_v44 = vld [vmem:[#allocation35_spill] sm:$0xff]  ;;  %v8354_v46 = vld [vmem:[#allocation38_spill] sm:$0xff] }
 0x7c0   :  { %4702 = vmatpush1.bf16.msra.mxu0 %v7752_v48  ;;  %4743 = vmatpush1.bf16.msra.mxu1 %v7754_v49  ;;  %v8355_v48 = vld [vmem:[#allocation39_spill] sm:$0xff]  ;;  %v8356_v49 = vld [vmem:[#allocation40_spill] sm:$0xff] }
 0x7c1   :  { %4703 = vmatprep.subr.bf16.mxu0 %v7760_v50  ;;  %4744 = vmatprep.subr.bf16.mxu1 %v7762_v51  ;;  %v8357_v50 = vld [vmem:[#allocation41_spill] sm:$0xff]  ;;  %v8358_v51 = vld [vmem:[#allocation43_spill] sm:$0xff] }
 0x7c4   :  { %4704 = vmatpush1.bf16.msra.mxu0 %v7764_v54  ;;  %4745 = vmatpush1.bf16.msra.mxu1 %v7766_v55  ;;  %v8359_v54 = vld [vmem:[#allocation44_spill] sm:$0xff]  ;;  %v8360_v55 = vld [vmem:[#allocation45_spill] sm:$0xff] }
 0x7c5   :  { %4705 = vmatprep.subr.bf16.mxu0 %v7772_v57  ;;  %4746 = vmatprep.subr.bf16.mxu1 %v7774_v59  ;;  %v8361_v57 = vld [vmem:[#allocation46_spill] sm:$0xff]  ;;  %v8362_v59 = vld [vmem:[#allocation47_spill] sm:$0xff] }
 0x7c8   :  { %4706 = vmatpush1.bf16.msra.mxu0 %v7776_v60  ;;  %4747 = vmatpush1.bf16.msra.mxu1 %v7778_v61  ;;  %v8363_v60 = vld [vmem:[#allocation48_spill] sm:$0xff]  ;;  %v8364_v61 = vld [vmem:[#allocation49_spill] sm:$0xff] }
 0x7c9   :  { %4707 = vmatprep.subr.bf16.mxu0 %v7784_v63  ;;  %4748 = vmatprep.subr.bf16.mxu1 %v7786_v0  ;;  %v8365_v63 = vld [vmem:[#allocation26_spill] sm:$0xff]  ;;  %v8366_v0 = vld [vmem:[#allocation23_spill] sm:$0xff] }
 0x7cc   :  { %4708 = vmatpush1.bf16.msra.mxu0 %v7788_v3  ;;  %4749 = vmatpush1.bf16.msra.mxu1 %v7790_v4  ;;  %v3783_v3 = vld [vmem:[#allocation2 + $0xc0] sm:$0xff] }
 0x7cd   :  { %4709 = vmatprep.subr.bf16.mxu0 %v7796_v20  ;;  %4750 = vmatprep.subr.bf16.mxu1 %v7798_v10  ;;  %v7988_v4 = vld [vmem:[#allocation9] sm:$0xff]  ;;  %v3784_v20 = vld [vmem:[#allocation2 + $0xc8] sm:$0xff] }
 0x7ce   :  { %v7990_v10 = vld [vmem:[#allocation9 + $0x8] sm:$0xff] }
 0x7d0   :  { %4710 = vmatpush1.bf16.msra.mxu0 %v7800_v5  ;;  %4751 = vmatpush1.bf16.msra.mxu1 %v7802_v6  ;;  %v3791_v5 = vadd.f32 %v7988_v4, %v3783_v3  ;;  %v3792_v6 = vadd.f32 %v7990_v10, %v3784_v20  ;;  %v4300_v3 = vld [vmem:[#allocation2 + $0xe8] sm:$0xff] }
 0x7d1   :  { %4711 = vmatprep.subr.bf16.mxu0 %v7808_v11  ;;  %4752 = vmatprep.subr.bf16.mxu1 %v7810_v62 }
 0x7d4   :  { %4712 = vmatpush1.bf16.msra.mxu0 %v7812_v42  ;;  %4753 = vmatpush1.bf16.msra.mxu1 %v7814_v7 }
 0x7d5   :  { %4713 = vmatprep.subr.bf16.mxu0 %v7820_v8  ;;  %4754 = vmatprep.subr.bf16.mxu1 %v7822_v19  ;;  %v3786_v8 = vld [vmem:[#allocation2 + $0xd8] sm:$0xff] }
 0x7d6   :  { %v7994_v19 = vld [vmem:[#allocation9 + $0x18] sm:$0xff] }
 0x7d7   :  { %v3794_v18 = vadd.f32 %v7994_v19, %v3786_v8 }
 0x7d8   :  { %4714 = vmatpush1.bf16.msra.mxu0 %v7824_v45  ;;  %4755 = vmatpush1.bf16.msra.mxu1 %v8342_v29 }
 0x7d9   :  { %4715 = vmatprep.subr.bf16.mxu0 %v8343_v33  ;;  %4756 = vmatprep.subr.bf16.mxu1 %v8344_v34 }
 0x7dc   :  { %4716 = vmatpush1.bf16.msra.mxu0 %v8345_v35  ;;  %4757 = vmatpush1.bf16.msra.mxu1 %v8346_v36 }
 0x7dd   :  { %4717 = vmatprep.subr.bf16.mxu0 %v8347_v21  ;;  %4758 = vmatprep.subr.bf16.mxu1 %v8348_v37 }
 0x7e0   :  { %4718 = vmatpush1.bf16.msra.mxu0 %v8349_v38  ;;  %4759 = vmatpush1.bf16.msra.mxu1 %v8350_v39  ;;  %v6469_v39 = vld [vmem:[#allocation12] sm:$0xff]  }
 0x7e1   :  { %4719 = vmatprep.subr.bf16.mxu0 %v8351_v40  ;;  %4760 = vmatprep.subr.bf16.mxu1 %v8352_v43  ;;  %v6470_v40 = vld [vmem:[#allocation12 + $0x48] sm:$0xff]  }
 0x7e2   :  { %v6471_v43 = vld [vmem:[#allocation12 + $0x8] sm:$0xff]  }
 0x7e4   :  { %4720 = vmatpush1.bf16.msra.mxu0 %v8353_v44  ;;  %4761 = vmatpush1.bf16.msra.mxu1 %v8354_v46  ;;  %v6472_v44 = vld [vmem:[#allocation12 + $0x50] sm:$0xff]  }
 0x7e5   :  { %4721 = vmatprep.subr.bf16.mxu0 %v8355_v48  ;;  %4762 = vmatprep.subr.bf16.mxu1 %v8356_v49  ;;  %v6473_v46 = vld [vmem:[#allocation12 + $0x10] sm:$0xff]   ;;  %v6475_v48 = vld [vmem:[#allocation12 + $0x18] sm:$0xff]   ;;  %v6476_v49 = vld [vmem:[#allocation12 + $0x60] sm:$0xff]  }
 0x7e8   :  { %4722 = vmatpush1.bf16.msra.mxu0 %v8357_v50  ;;  %4763 = vmatpush1.bf16.msra.mxu1 %v8358_v51  ;;  %v6477_v50 = vld [vmem:[#allocation12 + $0x20] sm:$0xff]   ;;  %v6479_v51 = vld [vmem:[#allocation12 + $0x28] sm:$0xff]  }
 0x7e9   :  { %4723 = vmatprep.subr.bf16.mxu0 %v8359_v54  ;;  %4764 = vmatprep.subr.bf16.mxu1 %v8360_v55  ;;  %v6480_v54 = vld [vmem:[#allocation12 + $0x70] sm:$0xff]  }
 0x7ea   :  { %v6481_v55 = vld [vmem:[#allocation12 + $0x30] sm:$0xff]  }
 0x7ec   :  { %4724 = vmatpush1.bf16.msra.mxu0 %v8361_v57  ;;  %4765 = vmatpush1.bf16.msra.mxu1 %v8362_v59  ;;  %v6482_v57 = vld [vmem:[#allocation12 + $0x78] sm:$0xff]  }
 0x7ed   :  { %4725 = vmatprep.subr.bf16.mxu0 %v8363_v60  ;;  %4766 = vmatprep.subr.bf16.mxu1 %v8364_v61  ;;  %v6483_v59 = vld [vmem:[#allocation12 + $0x38] sm:$0xff]   ;;  %v6484_v60 = vld [vmem:[#allocation13] sm:$0xff]   ;;  %v6485_v61 = vld [vmem:[#allocation13 + $0x8] sm:$0xff]  }
 0x7f0   :  { %4726 = vmatpush1.bf16.msra.mxu0 %v8365_v63  ;;  %4767 = vmatpush1.bf16.msra.mxu1 %v8366_v0  ;;  %v6486_v63 = vld [vmem:[#allocation13 + $0x10] sm:$0xff]   ;;  %v4299_v0 = vld [vmem:[#allocation2 + $0xe0] sm:$0xff] }
 0x7f1   :  { %6032 = vmatprep.subr.bf16.mxu1 %v6484_v60  ;;  %v4307_v20 = vadd.f32 %v4299_v0, %v7988_v4  ;;  %v6490_v0 = vld [vmem:[#allocation13 + $0x30] sm:$0xff]  }
 0x886   :  { %v4213_v11 = vpop.f32.mrb[24].mxu0  ;;  %v4254_v62 = vpop.f32.mrb[24].mxu1 }
 0x887   :  { %v4261_v42 = vadd.f32 %v4213_v11, %v3791_v5  ;;  %v4215_v7 = vpop.f32.mrb[25].mxu0  ;;  %v4256_v45 = vpop.f32.mrb[25].mxu1  ;;  %v4263_v2 = vadd.f32 %v4254_v62, %v3793_v31  ;;  %v4308_v5 = vadd.f32 %v4300_v3, %v7990_v10  ;;  %v6491_v3 = vld [vmem:[#allocation13 + $0x38] sm:$0xff]  }
 0x888   :  { %v4262_v15 = vadd.f32 %v4215_v7, %v3792_v6  ;;  %v4217_v30 = vpop.f32.mrb[26].mxu0  ;;  %v4258_v32 = vpop.f32.mrb[26].mxu1  ;;  %v4264_v27 = vadd.f32 %v4256_v45, %v3794_v18  ;;  %v4302_v7 = vld [vmem:[#allocation2 + $0xf8] sm:$0xff]  ;;  %v4301_v18 = vld [vmem:[#allocation2 + $0xf0] sm:$0xff] }
 0x889   :  { %v5866_v52 = vmul.f32 -1.442695, %v4261_v42  ;;  %v4218_v53 = vpop.f32.mrb[27].mxu0  ;;  %v4259_v56 = vpop.f32.mrb[27].mxu1  ;;  %v4309_v10 = vadd.f32 %v4301_v18, %v7997_v25 }
 0x88a   :  { %v5867_v58 = vmul.f32 -1.442695, %v4262_v15  ;;  %v5868_v23 = vmul.f32 -1.442695, %v4264_v27 }
 0x88b   :  { %6588 = vpow2.f32 %v5866_v52 }
 0x88c   :  { %6590 = vpow2.f32 %v5867_v58  ;;  %v4310_v58 = vadd.f32 %v4302_v7, %v7994_v19 }
 0x88d   :  { %6592 = vpow2.f32 %v5868_v23 }
 0x88e   :  { %6594 = vtanh.f32 %v4263_v2 }
 0x895   :  { %v6589_v1 = vpop.eup %6588 }
 0x896   :  { %v6591_v41 = vpop.eup %6590  ;;  %v4268_v12 = vadd.f32 1.0, %v6589_v1 }
 0x897   :  { %v4274_v22 = vadd.f32 1.0, %v6591_v41  ;;  %v6593_v47 = vpop.eup %6592 }
 0x898   :  { %6596 = vrcp.f32 %v4268_v12  ;;  %v6595_v26 = vpop.eup %6594  ;;  %v4281_v33 = vadd.f32 1.0, %v6593_v47 }
 0x899   :  { %6598 = vrcp.f32 %v4274_v22 }
 0x89a   :  { %6600 = vrcp.f32 %v4281_v33 }
 0x8a2   :  { %v6597_v13 = vpop.eup %6596 }
 0x8a3   :  { %v6599_v24 = vpop.eup %6598  ;;  %v4285_v29 = vmul.f32 %v6597_v13, %v6595_v26 }
 0x8a4   :  { %v4284_v34 = vmul.f32 %v6599_v24, %v7911_v28  ;;  %v6601_v36 = vpop.eup %6600  ;;  %v6468_v28 = vld [vmem:[#allocation12 + $0x40] sm:$0xff]  }
 0x8a5   :  { %5980 = vmatprep.subr.bf16.mxu0 %v6468_v28  ;;  %v8367_v28 = vld [vmem:[#allocation25_spill] sm:$0xff] }
 0x8a6   :  { %v8001_v35 = vadd.f32 %v4285_v29, %v4284_v34 }
 0x8a8   :  { %6602 = vtanh.f32 %v8001_v35 }
 0x8b2   :  { %v6603_v21 = vpop.eup %6602 }
 0x8b3   :  { %v8004_v37 = vmul.f32 %v6603_v21, %v6601_v36  ;;  %v3774_v21 = vrot.slane %v7914_v9, 4 }
 0x8b5   :  { %v5936_v38 = vpack.c.bf16 %v8004_v37, %v8004_v37  ;;  %v4290_v34 = vrot.slane %v8004_v37, 4 }
 0x8b7   :  { %5937 = vmatprep.mubr.msk.bf16.mxu0 %vm7224_vm2, %v5936_v38  ;;  %5945 = vmatprep.mubr.msk.bf16.mxu1 %vm7224_vm2, %v5936_v38 }
 0x8b8   :  { %5940 = vmatmul.mubr.msk.bf16.vlgmr.msra.gmra.mrb[28].mxu0 %vm7230_vm3, %v5936_v38  ;;  %5948 = vmatmul.mubr.msk.bf16.vlgmr.msra.gmra.mrb[28].mxu1 %vm7230_vm3, %v5936_v38 }
 0x8b9   :  { %5981 = vmatpush3.bf16.msra.mxu0 %v6469_v39  ;;  %6033 = vmatpush3.bf16.msra.mxu1 %v6484_v60  ;;  %v3258_v39 = vrot.slane %v8367_v28, 4  ;;  %v6487_v60 = vld [vmem:[#allocation13 + $0x18] sm:$0xff]  }
 0x8ba   :  { %5982 = vmatprep.subr.bf16.mxu0 %v6470_v40  ;;  %6034 = vmatprep.subr.bf16.mxu1 %v6485_v61  ;;  %v8368_v40 = vld [vmem:[#allocation42_spill] sm:$0xff] }
 0x8bd   :  { %5983 = vmatpush3.bf16.msra.mxu0 %v6471_v43  ;;  %6035 = vmatpush3.bf16.msra.mxu1 %v6485_v61  ;;  %v8369_v43 = vld [vmem:[#allocation22_spill] sm:$0xff]  ;;  %v6488_v61 = vld [vmem:[#allocation13 + $0x20] sm:$0xff]  }
 0x8be   :  { %5984 = vmatprep.subr.bf16.mxu0 %v6472_v44  ;;  %6036 = vmatprep.subr.bf16.mxu1 %v6486_v63  ;;  %v4824_v44 = vpack.c.bf16 %v8369_v43, %v8368_v40 }
 0x8c1   :  { %5985 = vmatpush3.bf16.msra.mxu0 %v6473_v46  ;;  %6037 = vmatpush3.bf16.msra.mxu1 %v6486_v63  ;;  %v4827_v46 = vpack.c.bf16 %v3258_v39, %v3774_v21  ;;  %v6489_v63 = vld [vmem:[#allocation13 + $0x28] sm:$0xff]  }
 0x8c2   :  { %5986 = vmatprep.subr.bf16.mxu0 %v6474_v16  ;;  %6038 = vmatprep.subr.bf16.mxu1 %v6487_v60 }
 0x8c5   :  { %5987 = vmatpush3.bf16.msra.mxu0 %v6475_v48  ;;  %v8371_v48 = vld [vmem:[#allocation50_spill] sm:$0xff]  ;;  %6039 = vmatpush3.bf16.msra.mxu1 %v6487_v60 }
 0x8c6   :  { %5988 = vmatprep.subr.bf16.mxu0 %v6476_v49  ;;  %v2217_v49 = vrot.slane %v8371_v48, 4  ;;  %6040 = vmatprep.subr.bf16.mxu1 %v6488_v61 }
 0x8c9   :  { %5989 = vmatpush3.bf16.msra.mxu0 %v6477_v50  ;;  %6041 = vmatpush3.bf16.msra.mxu1 %v6488_v61 }
 0x8ca   :  { %5990 = vmatprep.subr.bf16.mxu0 %v6478_v17  ;;  %6042 = vmatprep.subr.bf16.mxu1 %v6489_v63 }
 0x8cd   :  { %5991 = vmatpush3.bf16.msra.mxu0 %v6479_v51  ;;  %v1695_v51 = vrot.slane %v8369_v43, 4  ;;  %6043 = vmatpush3.bf16.msra.mxu1 %v6489_v63  ;;  %v5969_v43 = vld [vmem:[%s8063_s7] ss:$0 sm:$0xff]  ;;  %s6752_s7 = scalar_lea.vmem %s5194_s2, 1024 }
 0x8ce   :  { %5992 = vmatprep.subr.bf16.mxu0 %v6480_v54  ;;  %v1173_v54 = vrot.slane %v8368_v40, 4  ;;  %6044 = vmatprep.subr.bf16.mxu1 %v6490_v0  ;;  %p6753_p7 = scmp.ne.s32.totalorder %s5194_s2, %s6752_s7  ;;  %p6758_p9 = scmp.lt.s32.totalorder %s6752_s7, %s6752_s7 }
 0x8d0   :  { %p6759_p10 = por %p6758_p9, %p6757_p8 }
 0x8d1   :  { %5993 = vmatpush3.bf16.msra.mxu0 %v6481_v55  ;;  %v4828_v55 = vpack.c.bf16 %v7914_v9, %v8367_v28  ;;  %6045 = vmatpush3.bf16.msra.mxu1 %v6490_v0 }
 0x8d2   :  { %5994 = vmatprep.subr.bf16.mxu0 %v6482_v57  ;;  %v4831_v57 = vpack.c.bf16 %v1173_v54, %v1695_v51  ;;  %6046 = vmatprep.subr.bf16.mxu1 %v6491_v3  ;;  %p6760_p11 = pnand %p6759_p10, %p6753_p7 }
 0x8d5   :  { %5995 = vmatpush3.bf16.msra.mxu0 %v6483_v59  ;;  %6047 = vmatpush3.bf16.msra.mxu1 %v6491_v3 }
 0x98b   :  { %v4729_v6 = vpop.f32.mrb[28].mxu0  ;;  %v4770_v11 = vpop.f32.mrb[28].mxu1 }
 0x98c   :  { %v4777_v62 = vadd.f32 %v4729_v6, %v4307_v20  ;;  %v4731_v42 = vpop.f32.mrb[29].mxu0  ;;  %v4772_v8 = vpop.f32.mrb[29].mxu1  ;;  %v4779_v27 = vadd.f32 %v4770_v11, %v4309_v10 }
 0x98d   :  { %v4778_v45 = vadd.f32 %v4731_v42, %v4308_v5  ;;  %v4733_v15 = vpop.f32.mrb[30].mxu0  ;;  %v4774_v30 = vpop.f32.mrb[30].mxu1  ;;  %v4780_v4 = vadd.f32 %v4772_v8, %v4310_v58 }
 0x98e   :  { %v5949_v32 = vmul.f32 -1.442695, %v4777_v62  ;;  %v4734_v52 = vpop.f32.mrb[31].mxu0  ;;  %v4775_v53 = vpop.f32.mrb[31].mxu1 }
 0x98f   :  { %v5950_v56 = vmul.f32 -1.442695, %v4778_v45  ;;  %v5951_v14 = vmul.f32 -1.442695, %v4780_v4 }
 0x990   :  { %6604 = vpow2.f32 %v5949_v32 }
 0x991   :  { %6606 = vpow2.f32 %v5950_v56 }
 0x992   :  { %6608 = vpow2.f32 %v5951_v14 }
 0x993   :  { %6610 = vtanh.f32 %v4779_v27 }
 0x99a   :  { %v6605_v31 = vpop.eup %6604 }
 0x99b   :  { %v6607_v23 = vpop.eup %6606  ;;  %v4784_v2 = vadd.f32 1.0, %v6605_v31 }
 0x99c   :  { %v4790_v1 = vadd.f32 1.0, %v6607_v23  ;;  %v6609_v41 = vpop.eup %6608 }
 0x99d   :  { %6612 = vrcp.f32 %v4784_v2  ;;  %v6611_v12 = vpop.eup %6610  ;;  %v4797_v26 = vadd.f32 1.0, %v6609_v41 }
 0x99e   :  { %6614 = vrcp.f32 %v4790_v1 }
 0x99f   :  { %6616 = vrcp.f32 %v4797_v26 }
 0x9a7   :  { %v6613_v22 = vpop.eup %6612 }
 0x9a8   :  { %v6615_v19 = vpop.eup %6614  ;;  %v4801_v47 = vmul.f32 %v6613_v22, %v6611_v12 }
 0x9a9   :  { %v4800_v13 = vmul.f32 %v6615_v19, %v8001_v35  ;;  %v6617_v25 = vpop.eup %6616  ;;  %v8370_v35 = vld [vmem:[#allocation21_spill] sm:$0xff] }
 0x9aa   :  { %v2739_v16 = vrot.slane %v8370_v35, 4  ;;  %v4826_v50 = vpack.c.bf16 %v8370_v35, %v8371_v48 }
 0x9ab   :  { %v4802_v24 = vadd.f32 %v4801_v47, %v4800_v13 }
 0x9ac   :  { %v4829_v17 = vpack.c.bf16 %v2217_v49, %v2739_v16 }
 0x9ad   :  { %6618 = vtanh.f32 %v4802_v24 }
 0x9b7   :  { %v6619_v29 = vpop.eup %6618 }
 0x9b8   :  { %v4804_v33 = vmul.f32 %v6619_v29, %v6617_v25 }
 0x9ba   :  { %v4806_v36 = vrot.slane %v4804_v33, 4  ;;  %v4830_v59 = vpack.c.bf16 %v4804_v33, %v8004_v37  ;;  %v5952_v37 = vld [vmem:[%s8061_s5] ss:$0 sm:$0xff] }
 0x9bc   :  { %v4825_v38 = vpack.c.bf16 %v4290_v34, %v4806_v36 }
 0x9be   :  { %4999 = vmatprep.mubr.bf16.mxu0 %v4825_v38 }
 0x9bf   :  { %5000 = vmatmul.mubr.bf16.vlgmr.msra.gmra.mrb[32].mxu0 %v4824_v44 }
 0x9c0   :  { %5007 = vmatprep.mubr.bf16.mxu0 %v4827_v46 }
 0x9c7   :  { %5008 = vmatmul.mubr.bf16.gmra.mrb[36].mxu0 %v4826_v50 }
 0x9c8   :  { %5015 = vmatprep.mubr.bf16.mxu0 %v4829_v17 }
 0x9cf   :  { %5016 = vmatmul.mubr.bf16.gmra.mrb[40].mxu0 %v4828_v55 }
 0x9d0   :  { %5023 = vmatprep.mubr.bf16.mxu0 %v4831_v57 }
 0x9d7   :  { %5024 = vmatmul.mubr.bf16.gmra.mrb[44].mxu0 %v4830_v59 }
 0xa92   :  { %v5996_v9 = vpop.f32.mrb[32].mxu0 }
 0xa93   :  { %v5997_v20 = vpop.f32.mrb[33].mxu0 }
 0xa94   :  { %v5998_v5 = vadd.f32 %v5997_v20, %v5996_v9  ;;  %v5999_v6 = vpop.f32.mrb[34].mxu0 }
 0xa95   :  { %v6000_v11 = vpop.f32.mrb[35].mxu0 }
 0xa96   :  { %v5002_v62 = vadd.f32 %v5998_v5, %v5952_v37  ;;  %v6001_v42 = vadd.f32 %v6000_v11, %v5999_v6 }
 0xa98   :  { %v5005_v7 = vadd.f32 %v6001_v42, %v5952_v37  ;;  %v5032_v8 = vmax.f32 %v5002_v62, 0.0 }
 0xa9a   :  { %v5033_v45 = vmax.f32 %v5005_v7, 0.0  ;;  %v6002_v15 = vpop.f32.mrb[36].mxu0 }
 0xa9b   :  { %v6003_v30 = vpop.f32.mrb[37].mxu0 }
 0xa9c   :  { %v6004_v32 = vadd.f32 %v6003_v30, %v6002_v15  ;;  %v6005_v52 = vpop.f32.mrb[38].mxu0  ;;  %v5040_v53 = vpack.c.bf16 %v5033_v45, %v5032_v8 }
 0xa9d   :  { %v6006_v56 = vpop.f32.mrb[39].mxu0 }
 0xa9e   :  { %v5010_v58 = vadd.f32 %v6004_v32, %v5952_v37  ;;  %v6007_v18 = vadd.f32 %v6006_v56, %v6005_v52  ;;  %6048 = vmatprep.mubr.bf16.mxu1 %v5040_v53 }
 0xaa0   :  { %v5013_v4 = vadd.f32 %v6007_v18, %v5952_v37  ;;  %v5034_v10 = vmax.f32 %v5010_v58, 0.0 }
 0xaa2   :  { %v5035_v14 = vmax.f32 %v5013_v4, 0.0  ;;  %v6008_v27 = vpop.f32.mrb[40].mxu0 }
 0xaa3   :  { %v6009_v31 = vpop.f32.mrb[41].mxu0 }
 0xaa4   :  { %v5041_v23 = vpack.c.bf16 %v5035_v14, %v5034_v10  ;;  %v6010_v2 = vadd.f32 %v6009_v31, %v6008_v27  ;;  %v6011_v1 = vpop.f32.mrb[42].mxu0 }
 0xaa5   :  { %v6012_v41 = vpop.f32.mrb[43].mxu0 }
 0xaa6   :  { %v5018_v12 = vadd.f32 %v6010_v2, %v5952_v37  ;;  %v6013_v22 = vadd.f32 %v6012_v41, %v6011_v1  ;;  %6049 = vmatmul.mubr.bf16.vlgmr.msra.gmra.mrb[32].mxu1 %v5041_v23 }
 0xaa8   :  { %v5021_v19 = vadd.f32 %v6013_v22, %v5952_v37  ;;  %v5036_v47 = vmax.f32 %v5018_v12, 0.0 }
 0xaaa   :  { %v5037_v26 = vmax.f32 %v5021_v19, 0.0  ;;  %v6014_v13 = vpop.f32.mrb[44].mxu0 }
 0xaab   :  { %v6015_v24 = vpop.f32.mrb[45].mxu0 }
 0xaac   :  { %v6016_v25 = vadd.f32 %v6015_v24, %v6014_v13  ;;  %v6017_v29 = vpop.f32.mrb[46].mxu0  ;;  %v5042_v33 = vpack.c.bf16 %v5037_v26, %v5036_v47 }
 0xaad   :  { %v6018_v34 = vpop.f32.mrb[47].mxu0 }
 0xaae   :  { %v5026_v36 = vadd.f32 %v6016_v25, %v5952_v37  ;;  %v6019_v21 = vadd.f32 %v6018_v34, %v6017_v29  ;;  %6052 = vmatprep.mubr.bf16.mxu1 %v5042_v33 }
 0xab0   :  { %v5029_v38 = vadd.f32 %v6019_v21, %v5952_v37  ;;  %v5038_v28 = vmax.f32 %v5026_v36, 0.0 }
 0xab2   :  { %v5039_v39 = vmax.f32 %v5029_v38, 0.0 }
 0xab4   :  { %v5043_v40 = vpack.c.bf16 %v5039_v39, %v5038_v28 }
 0xab6   :  { %6053 = vmatmul.mubr.bf16.gmra.mrb[36].mxu1 %v5043_v40 }
 0xb79   :  { %v6050_v44 = vpop.f32.mrb[32].mxu1 }
 0xb7a   :  { %v5158_v46 = vadd.f32 %v6050_v44, %v5969_v43  ;;  %v5149_v35 = vpop.f32.mrb[33].mxu1 }
 0xb7b   :  { %v5150_v16 = vadd.f32 %v5969_v43, %v5149_v35  ;;  %v6051_v48 = vpop.f32.mrb[34].mxu1 }
 0xb7c   :  { %5182 = vst [vmem:[#allocation15 + $0x10] sm:$0xff] %v5158_v46  ;;  %v5161_v49 = vadd.f32 %v6051_v48, %v5969_v43  ;;  %v5152_v50 = vpop.f32.mrb[35].mxu1 }
 0xb7d   :  { %5180 = vst [vmem:[#allocation15] sm:$0xff] %v5150_v16  ;;  %v5153_v17 = vadd.f32 %v5969_v43, %v5152_v50 }
 0xb7e   :  { %5183 = vst [vmem:[#allocation15 + $0x18] sm:$0xff] %v5161_v49 }
 0xb7f   :  { %5181 = vst [vmem:[#allocation15 + $0x8] sm:$0xff] %v5153_v17 }
 0xb89   :  { %v6054_v51 = vpop.f32.mrb[36].mxu1 }
 0xb8a   :  { %v5174_v54 = vadd.f32 %v6054_v51, %v5969_v43  ;;  %v5165_v55 = vpop.f32.mrb[37].mxu1 }
 0xb8b   :  { %v5166_v57 = vadd.f32 %v5969_v43, %v5165_v55  ;;  %v6055_v59 = vpop.f32.mrb[38].mxu1 }
 0xb8c   :  { %5186 = vst [vmem:[#allocation15 + $0x30] sm:$0xff] %v5174_v54  ;;  %v5177_v60 = vadd.f32 %v6055_v59, %v5969_v43  ;;  %v5168_v61 = vpop.f32.mrb[39].mxu1 }
 0xb8d   :  { %5184 = vst [vmem:[#allocation15 + $0x20] sm:$0xff] %v5166_v57  ;;  %v5169_v63 = vadd.f32 %v5969_v43, %v5168_v61 }
 0xb8e   :  { %5187 = vst [vmem:[#allocation15 + $0x38] sm:$0xff] %v5177_v60 }
 0xb8f   :  { %5185 = vst [vmem:[#allocation15 + $0x28] sm:$0xff] %v5169_v63 }
 0xb90   :  { %6763 = shalt.err (!%p6760_p11)
}
 0xb91   :  { %s6764_s23 = scalar_lea.hbm %s8064_s8, 1024 }
 0xb92   :  { %p6765_p12 = scmp.ne.s32.totalorder %s8064_s8, %s6764_s23  ;;  %p6768_p13 = scmp.lt.u32.totalorder %s6764_s23, %s8064_s8 }
 0xb94   :  { %p6770_p0 = pnand %p6768_p13, %p6765_p12 }
 0xb96   :  { %6773 = shalt.err (!%p6770_p0)
}
 0xb97   :  { %5199 = dma.vmem_to_hbm [thread:$0]  %s5194_s2, 1024, %s8064_s8, [#allocation6], %s6797_s3, %s6797_s3, %s6798_s15  }
 0xb98   :  { %6786 = dma.done.wait [#allocation6], 1024  }
 0xb99   :  { %6787 = vsyncadd [#allocation6], 4294966272 }
 0xb9a   :  { %5203 = vsyncpa [#allocation5], 1 }
 0xb9b   :  { %5204 = vsyncpa [#allocation8], 1 }
 0xb9c   :  { %5205 = vsyncpa [#allocation11], 1 }
 0xb9d   :  { %5206 = vsyncpa [#allocation14], 1 }
 0xb9e   :  { %5207 = vsyncpa [#allocation6], 1 }

</bundles_post_ra>
